<compile_context>
chip_gen: v5e
topology: v5e:2x2
jax: 0.10.0
libtpu: 0.0.40
codegen_flags: <defaults>
</compile_context>

<pallas_src>
import jax
import jax.numpy as jnp
from jax.experimental import pallas as pl
from jax.experimental.pallas import tpu as pltpu


# ----------------------------------------------------------------------------
# Fused Pallas kernel (specialized to the module's only valid case: T == 1).
# ----------------------------------------------------------------------------
def _brnn_t1_kernel(x_ref, w1_ref, b1_ref, w2_ref, b2_ref, fcw_ref, fcb_ref, out_ref):
    # Packed gate layout per direction: [i | g | o], each H wide; fwd at 0, bwd at 3H.
    # The 0.5 sigmoid pre-scale is folded into the i/o weight columns offline.
    H = w2_ref.shape[0] // 2

    def gates_to_h(gates, base):
        i = 0.5 * (jnp.tanh(gates[:, base:base + H]) + 1.0)            # sigmoid (folded)
        g = jnp.tanh(gates[:, base + H:base + 2 * H])
        o = 0.5 * (jnp.tanh(gates[:, base + 2 * H:base + 3 * H]) + 1.0)
        return o * jnp.tanh(i * g)                                      # h0=c0=0 -> c = i*g

    # ---- Layer 1: both directions in one matmul -------------------------------------
    x = x_ref[...].astype(jnp.bfloat16)                                 # (Bt, Din)
    g1 = jnp.dot(x, w1_ref[...], preferred_element_type=jnp.float32) + b1_ref[...]
    y1f = gates_to_h(g1, 0).astype(jnp.bfloat16)                        # (Bt, H)
    y1b = gates_to_h(g1, 3 * H).astype(jnp.bfloat16)

    # ---- Layer 2: input [y1f | y1b], weight rows split (no concat) ------------------
    g2 = (jnp.dot(y1f, w2_ref[0:H, :], preferred_element_type=jnp.float32)
          + jnp.dot(y1b, w2_ref[H:2 * H, :], preferred_element_type=jnp.float32)
          + b2_ref[...])
    y2f = gates_to_h(g2, 0).astype(jnp.bfloat16)
    y2b = gates_to_h(g2, 3 * H).astype(jnp.bfloat16)

    # ---- fc head on reshape(B, T*2H) == [y2f | y2b]  (lane-padded classes) ----------
    out = (jnp.dot(y2f, fcw_ref[0:H, :], preferred_element_type=jnp.float32)
           + jnp.dot(y2b, fcw_ref[H:2 * H, :], preferred_element_type=jnp.float32)
           + fcb_ref[...])
    out_ref[...] = out.astype(out_ref.dtype)


def brnn_forward(x, packed):
    """x: (B, T, input_size) f32, batch_first. Returns (B, C_PAD) f32 logits
    (padded along classes; slice [:, :num_classes] outside)."""
    B, T, Din = x.shape
    w1, b1 = packed["w1"], packed["b1"]
    w2, b2 = packed["w2"], packed["b2"]
    fcw, fcb = packed["fcw"], packed["fcb"]
    H = w2.shape[0] // 2
    C_PAD = fcw.shape[1]
    # The module's reshape(B, T*2H) -> fc(in_features=2H) is only shape-valid for T==1.
    assert T == 1, "BRNN's reshape->fc is only shape-valid for seq_len == 1"

    x2d = x.reshape(B, Din)

    # Batch tiling: weights resident across tiles; batch axis is "parallel".
    B_TILE = B if B <= 256 else 256
    Bp = ((B + B_TILE - 1) // B_TILE) * B_TILE
    if Bp != B:
        x2d = jnp.pad(x2d, ((0, Bp - B), (0, 0)))

    out = pl.pallas_call(
        _brnn_t1_kernel,
        out_shape=jax.ShapeDtypeStruct((Bp, C_PAD), jnp.float32),
        grid=(Bp // B_TILE,),
        in_specs=[
            pl.BlockSpec((B_TILE, Din), lambda b: (b, 0)),
            pl.BlockSpec(w1.shape, lambda b: (0, 0)),       # weights: constant block ->
            pl.BlockSpec(b1.shape, lambda b: (0, 0)),       # DMA'd once, VMEM-resident
            pl.BlockSpec(w2.shape, lambda b: (0, 0)),
            pl.BlockSpec(b2.shape, lambda b: (0, 0)),
            pl.BlockSpec(fcw.shape, lambda b: (0, 0)),
            pl.BlockSpec(fcb.shape, lambda b: (0, 0)),
        ],
        out_specs=pl.BlockSpec((B_TILE, C_PAD), lambda b: (b, 0)),
        compiler_params=pltpu.CompilerParams(
            dimension_semantics=("parallel",),
            vmem_limit_bytes=32 * 1024 * 1024,
        ),
    )(x2d, w1, b1, w2, b2, fcw, fcb)
    return out[:B]


# ----------------------------------------------------------------------------
# Raw (PyTorch-layout) parameters + packing into the kernel's fused layout.
# ----------------------------------------------------------------------------
def make_raw_params(key, input_size, hidden_size, num_layers, num_classes):
    H = hidden_size
    k_lstm = 1.0 / jnp.sqrt(H)
    lstm = []
    for layer in range(num_layers):
        d_in = input_size if layer == 0 else 2 * H
        dirs = {}
        for dname in ("fwd", "bwd"):
            key, k1, k2, k3, k4 = jax.random.split(key, 5)
            dirs[dname] = {
                "w_ih": jax.random.uniform(k1, (4 * H, d_in), jnp.float32, -k_lstm, k_lstm),
                "w_hh": jax.random.uniform(k2, (4 * H, H), jnp.float32, -k_lstm, k_lstm),
                "b_ih": jax.random.uniform(k3, (4 * H,), jnp.float32, -k_lstm, k_lstm),
                "b_hh": jax.random.uniform(k4, (4 * H,), jnp.float32, -k_lstm, k_lstm),
            }
        lstm.append(dirs)
    key, kf1, kf2 = jax.random.split(key, 3)
    k_fc = 1.0 / jnp.sqrt(2 * H)
    fc_w = jax.random.uniform(kf1, (num_classes, 2 * H), jnp.float32, -k_fc, k_fc)
    fc_b = jax.random.uniform(kf2, (num_classes,), jnp.float32, -k_fc, k_fc)
    return {"lstm": lstm, "fc_w": fc_w, "fc_b": fc_b}


def pack_params(raw, class_pad=128):
    """Build the kernel's fused weights:
       - drop w_hh and the forget-gate columns (never used at T==1 with h0=c0=0),
       - concat fwd/bwd along the gate axis, gate layout [i|g|o] per direction,
       - fold the sigmoid 0.5 pre-scale into the i/o columns + biases,
       - bf16 weights / f32 biases, fc padded to 128 output lanes."""
    lstm = raw["lstm"]
    H = lstm[0]["fwd"]["w_hh"].shape[1]

    def dir_igo(d):
        w, b = d["w_ih"], d["b_ih"] + d["b_hh"]            # torch gate order [i,f,g,o]
        wi, wg, wo = w[0:H], w[2 * H:3 * H], w[3 * H:4 * H]
        bi, bg, bo = b[0:H], b[2 * H:3 * H], b[3 * H:4 * H]
        W = jnp.concatenate([0.5 * wi, wg, 0.5 * wo], axis=0)   # (3H, Din)
        bv = jnp.concatenate([0.5 * bi, bg, 0.5 * bo])
        return W, bv

    def layer_pack(layer):
        Wf, bf = dir_igo(layer["fwd"])
        Wb, bb = dir_igo(layer["bwd"])
        W = jnp.concatenate([Wf, Wb], axis=0).T.astype(jnp.bfloat16)   # (Din, 6H)
        b = jnp.concatenate([bf, bb]).reshape(1, -1).astype(jnp.float32)
        return W, b

    w1, b1 = layer_pack(lstm[0])
    w2, b2 = layer_pack(lstm[1])

    C = raw["fc_w"].shape[0]
    fcw = jnp.zeros((2 * H, class_pad), jnp.float32).at[:, :C].set(raw["fc_w"].T)
    fcb = jnp.zeros((1, class_pad), jnp.float32).at[0, :C].set(raw["fc_b"])
    return {"w1": w1, "b1": b1, "w2": w2, "b2": b2,
            "fcw": fcw.astype(jnp.bfloat16), "fcb": fcb}


# ----------------------------------------------------------------------------
# Pure-JAX f32 reference — faithful to the PyTorch module's forward.
# ----------------------------------------------------------------------------
def _lstm_dir_ref(x, w_ih, w_hh, b_ih, b_hh, reverse):
    B = x.shape[0]
    H = w_hh.shape[1]
    xs = jnp.swapaxes(x, 0, 1)
    if reverse:
        xs = xs[::-1]

    def step(carry, x_t):
        h, c = carry
        gates = x_t @ w_ih.T + h @ w_hh.T + b_ih + b_hh
        i = jax.nn.sigmoid(gates[:, 0 * H:1 * H])
        f = jax.nn.sigmoid(gates[:, 1 * H:2 * H])
        g = jnp.tanh(gates[:, 2 * H:3 * H])
        o = jax.nn.sigmoid(gates[:, 3 * H:4 * H])
        c = f * c + i * g
        h = o * jnp.tanh(c)
        return (h, c), h

    init = (jnp.zeros((B, H), jnp.float32), jnp.zeros((B, H), jnp.float32))
    _, ys = jax.lax.scan(step, init, xs)
    if reverse:
        ys = ys[::-1]
    return jnp.swapaxes(ys, 0, 1)


def brnn_forward_ref(x, raw):
    h = x
    for layer in raw["lstm"]:
        yf = _lstm_dir_ref(h, reverse=False, **layer["fwd"])
        yb = _lstm_dir_ref(h, reverse=True, **layer["bwd"])
        h = jnp.concatenate([yf, yb], axis=-1)
    B = h.shape[0]
    h = h.reshape(B, -1)                               # (B, T*2H); valid only for T == 1
    return h @ raw["fc_w"].T + raw["fc_b"]


if __name__ == "__main__":
    # Module config: input_size=28, hidden=256, 2 layers, 10 classes.
    # seq_len must be 1 for the module's reshape->fc to be shape-valid.
    batch = 2
    seq_len = 1
    input_size = 28
    hidden_size = 256
    num_layers = 2
    num_classes = 10

    root = jax.random.PRNGKey(0)
    k_param, k_x = jax.random.split(root)
    raw = make_raw_params(k_param, input_size, hidden_size, num_layers, num_classes)
    packed = pack_params(raw)
    x = jax.random.normal(k_x, (batch, seq_len, input_size), jnp.float32)

    out_padded = jax.block_until_ready(jax.jit(brnn_forward)(x, packed))
    out = out_padded[:, :num_classes]
    assert out.shape == (batch, num_classes), out.shape

    ref = jax.block_until_ready(jax.jit(brnn_forward_ref)(x, raw))
    # bf16 weights/activations in the kernel vs f32 reference -> ~1e-3 deviation.
    assert jnp.allclose(out, ref, atol=1e-2, rtol=1e-2), (out, ref)

    print("KERNEL_OK")
</pallas_src>

<mosaic_0001>
module attributes {stable_mosaic.version = 11 : i64} {
  func.func @_brnn_t1_kernel(%arg0: i32, %arg1: memref<2x28xf32, #tpu.memory_space<vmem>>, %arg2: memref<28x1536xbf16, #tpu.memory_space<vmem>>, %arg3: memref<1x1536xf32, #tpu.memory_space<vmem>>, %arg4: memref<512x1536xbf16, #tpu.memory_space<vmem>>, %arg5: memref<1x1536xf32, #tpu.memory_space<vmem>>, %arg6: memref<512x128xbf16, #tpu.memory_space<vmem>>, %arg7: memref<1x128xf32, #tpu.memory_space<vmem>>, %arg8: memref<2x128xf32, #tpu.memory_space<vmem>>) attributes {dimension_semantics = [#tpu.dimension_semantics<parallel>], iteration_bounds = array<i64: 1>, scalar_prefetch = 0 : i64, scratch_operands = 0 : i64, tpu.core_type = #tpu.core_type<tc>, window_params = [{transform_indices = @transform_0, window_bounds = array<i64: 2, 28>}, {pipeline_mode = #tpu.pipeline_mode<synchronous>, transform_indices = @transform_1, window_bounds = array<i64: 28, 1536>}, {pipeline_mode = #tpu.pipeline_mode<synchronous>, transform_indices = @transform_2, window_bounds = array<i64: 1, 1536>}, {pipeline_mode = #tpu.pipeline_mode<synchronous>, transform_indices = @transform_3, window_bounds = array<i64: 512, 1536>}, {pipeline_mode = #tpu.pipeline_mode<synchronous>, transform_indices = @transform_4, window_bounds = array<i64: 1, 1536>}, {pipeline_mode = #tpu.pipeline_mode<synchronous>, transform_indices = @transform_5, window_bounds = array<i64: 512, 128>}, {pipeline_mode = #tpu.pipeline_mode<synchronous>, transform_indices = @transform_6, window_bounds = array<i64: 1, 128>}, {transform_indices = @transform_7, window_bounds = array<i64: 2, 128>}]} {
    %c0 = arith.constant 0 : index
    %c0_0 = arith.constant 0 : index
    %0 = vector.load %arg1[%c0, %c0_0] : memref<2x28xf32, #tpu.memory_space<vmem>>, vector<2x28xf32>
    %1 = arith.truncf %0 : vector<2x28xf32> to vector<2x28xbf16>
    %c0_1 = arith.constant 0 : index
    %c0_2 = arith.constant 0 : index
    %2 = vector.load %arg2[%c0_1, %c0_2] : memref<28x1536xbf16, #tpu.memory_space<vmem>>, vector<28x1536xbf16>
    %cst = arith.constant dense<0.000000e+00> : vector<2x1536xf32>
    %3 = tpu.matmul %1, %2, %cst {dimension_numbers = #tpu.dot_dimension_numbers<[1], [0], [0], [1], [0, 0, 1, 1], [], []>} : vector<2x28xbf16>, vector<28x1536xbf16>, vector<2x1536xf32> -> vector<2x1536xf32>
    %c0_3 = arith.constant 0 : index
    %c0_4 = arith.constant 0 : index
    %4 = vector.load %arg3[%c0_3, %c0_4] : memref<1x1536xf32, #tpu.memory_space<vmem>>, vector<1x1536xf32>
    %5 = vector.broadcast %4 : vector<1x1536xf32> to vector<2x1536xf32>
    %6 = arith.addf %3, %5 : vector<2x1536xf32>
    %7 = vector.extract_strided_slice %6 {offsets = [0, 0], sizes = [2, 256], strides = [1, 1]} : vector<2x1536xf32> to vector<2x256xf32>
    %8 = math.tanh %7 : vector<2x256xf32>
    %cst_5 = arith.constant 1.000000e+00 : f32
    %9 = vector.broadcast %cst_5 : f32 to vector<2x256xf32>
    %10 = arith.addf %8, %9 : vector<2x256xf32>
    %cst_6 = arith.constant 5.000000e-01 : f32
    %11 = vector.broadcast %cst_6 : f32 to vector<2x256xf32>
    %12 = arith.mulf %11, %10 : vector<2x256xf32>
    %13 = vector.extract_strided_slice %6 {offsets = [0, 256], sizes = [2, 256], strides = [1, 1]} : vector<2x1536xf32> to vector<2x256xf32>
    %14 = math.tanh %13 : vector<2x256xf32>
    %15 = vector.extract_strided_slice %6 {offsets = [0, 512], sizes = [2, 256], strides = [1, 1]} : vector<2x1536xf32> to vector<2x256xf32>
    %16 = math.tanh %15 : vector<2x256xf32>
    %cst_7 = arith.constant 1.000000e+00 : f32
    %17 = vector.broadcast %cst_7 : f32 to vector<2x256xf32>
    %18 = arith.addf %16, %17 : vector<2x256xf32>
    %cst_8 = arith.constant 5.000000e-01 : f32
    %19 = vector.broadcast %cst_8 : f32 to vector<2x256xf32>
    %20 = arith.mulf %19, %18 : vector<2x256xf32>
    %21 = arith.mulf %12, %14 : vector<2x256xf32>
    %22 = math.tanh %21 : vector<2x256xf32>
    %23 = arith.mulf %20, %22 : vector<2x256xf32>
    %24 = arith.truncf %23 : vector<2x256xf32> to vector<2x256xbf16>
    %25 = vector.extract_strided_slice %6 {offsets = [0, 768], sizes = [2, 256], strides = [1, 1]} : vector<2x1536xf32> to vector<2x256xf32>
    %26 = math.tanh %25 : vector<2x256xf32>
    %cst_9 = arith.constant 1.000000e+00 : f32
    %27 = vector.broadcast %cst_9 : f32 to vector<2x256xf32>
    %28 = arith.addf %26, %27 : vector<2x256xf32>
    %cst_10 = arith.constant 5.000000e-01 : f32
    %29 = vector.broadcast %cst_10 : f32 to vector<2x256xf32>
    %30 = arith.mulf %29, %28 : vector<2x256xf32>
    %31 = vector.extract_strided_slice %6 {offsets = [0, 1024], sizes = [2, 256], strides = [1, 1]} : vector<2x1536xf32> to vector<2x256xf32>
    %32 = math.tanh %31 : vector<2x256xf32>
    %33 = vector.extract_strided_slice %6 {offsets = [0, 1280], sizes = [2, 256], strides = [1, 1]} : vector<2x1536xf32> to vector<2x256xf32>
    %34 = math.tanh %33 : vector<2x256xf32>
    %cst_11 = arith.constant 1.000000e+00 : f32
    %35 = vector.broadcast %cst_11 : f32 to vector<2x256xf32>
    %36 = arith.addf %34, %35 : vector<2x256xf32>
    %cst_12 = arith.constant 5.000000e-01 : f32
    %37 = vector.broadcast %cst_12 : f32 to vector<2x256xf32>
    %38 = arith.mulf %37, %36 : vector<2x256xf32>
    %39 = arith.mulf %30, %32 : vector<2x256xf32>
    %40 = math.tanh %39 : vector<2x256xf32>
    %41 = arith.mulf %38, %40 : vector<2x256xf32>
    %42 = arith.truncf %41 : vector<2x256xf32> to vector<2x256xbf16>
    %c0_13 = arith.constant 0 : index
    %c0_14 = arith.constant 0 : index
    %43 = vector.load %arg4[%c0_13, %c0_14] : memref<512x1536xbf16, #tpu.memory_space<vmem>>, vector<256x1536xbf16>
    %cst_15 = arith.constant dense<0.000000e+00> : vector<2x1536xf32>
    %44 = tpu.matmul %24, %43, %cst_15 {dimension_numbers = #tpu.dot_dimension_numbers<[1], [0], [0], [1], [0, 0, 1, 1], [], []>} : vector<2x256xbf16>, vector<256x1536xbf16>, vector<2x1536xf32> -> vector<2x1536xf32>
    %c256 = arith.constant 256 : index
    %c0_16 = arith.constant 0 : index
    %45 = vector.load %arg4[%c256, %c0_16] : memref<512x1536xbf16, #tpu.memory_space<vmem>>, vector<256x1536xbf16>
    %cst_17 = arith.constant dense<0.000000e+00> : vector<2x1536xf32>
    %46 = tpu.matmul %42, %45, %cst_17 {dimension_numbers = #tpu.dot_dimension_numbers<[1], [0], [0], [1], [0, 0, 1, 1], [], []>} : vector<2x256xbf16>, vector<256x1536xbf16>, vector<2x1536xf32> -> vector<2x1536xf32>
    %47 = arith.addf %44, %46 : vector<2x1536xf32>
    %c0_18 = arith.constant 0 : index
    %c0_19 = arith.constant 0 : index
    %48 = vector.load %arg5[%c0_18, %c0_19] : memref<1x1536xf32, #tpu.memory_space<vmem>>, vector<1x1536xf32>
    %49 = vector.broadcast %48 : vector<1x1536xf32> to vector<2x1536xf32>
    %50 = arith.addf %47, %49 : vector<2x1536xf32>
    %51 = vector.extract_strided_slice %50 {offsets = [0, 0], sizes = [2, 256], strides = [1, 1]} : vector<2x1536xf32> to vector<2x256xf32>
    %52 = math.tanh %51 : vector<2x256xf32>
    %cst_20 = arith.constant 1.000000e+00 : f32
    %53 = vector.broadcast %cst_20 : f32 to vector<2x256xf32>
    %54 = arith.addf %52, %53 : vector<2x256xf32>
    %cst_21 = arith.constant 5.000000e-01 : f32
    %55 = vector.broadcast %cst_21 : f32 to vector<2x256xf32>
    %56 = arith.mulf %55, %54 : vector<2x256xf32>
    %57 = vector.extract_strided_slice %50 {offsets = [0, 256], sizes = [2, 256], strides = [1, 1]} : vector<2x1536xf32> to vector<2x256xf32>
    %58 = math.tanh %57 : vector<2x256xf32>
    %59 = vector.extract_strided_slice %50 {offsets = [0, 512], sizes = [2, 256], strides = [1, 1]} : vector<2x1536xf32> to vector<2x256xf32>
    %60 = math.tanh %59 : vector<2x256xf32>
    %cst_22 = arith.constant 1.000000e+00 : f32
    %61 = vector.broadcast %cst_22 : f32 to vector<2x256xf32>
    %62 = arith.addf %60, %61 : vector<2x256xf32>
    %cst_23 = arith.constant 5.000000e-01 : f32
    %63 = vector.broadcast %cst_23 : f32 to vector<2x256xf32>
    %64 = arith.mulf %63, %62 : vector<2x256xf32>
    %65 = arith.mulf %56, %58 : vector<2x256xf32>
    %66 = math.tanh %65 : vector<2x256xf32>
    %67 = arith.mulf %64, %66 : vector<2x256xf32>
    %68 = arith.truncf %67 : vector<2x256xf32> to vector<2x256xbf16>
    %69 = vector.extract_strided_slice %50 {offsets = [0, 768], sizes = [2, 256], strides = [1, 1]} : vector<2x1536xf32> to vector<2x256xf32>
    %70 = math.tanh %69 : vector<2x256xf32>
    %cst_24 = arith.constant 1.000000e+00 : f32
    %71 = vector.broadcast %cst_24 : f32 to vector<2x256xf32>
    %72 = arith.addf %70, %71 : vector<2x256xf32>
    %cst_25 = arith.constant 5.000000e-01 : f32
    %73 = vector.broadcast %cst_25 : f32 to vector<2x256xf32>
    %74 = arith.mulf %73, %72 : vector<2x256xf32>
    %75 = vector.extract_strided_slice %50 {offsets = [0, 1024], sizes = [2, 256], strides = [1, 1]} : vector<2x1536xf32> to vector<2x256xf32>
    %76 = math.tanh %75 : vector<2x256xf32>
    %77 = vector.extract_strided_slice %50 {offsets = [0, 1280], sizes = [2, 256], strides = [1, 1]} : vector<2x1536xf32> to vector<2x256xf32>
    %78 = math.tanh %77 : vector<2x256xf32>
    %cst_26 = arith.constant 1.000000e+00 : f32
    %79 = vector.broadcast %cst_26 : f32 to vector<2x256xf32>
    %80 = arith.addf %78, %79 : vector<2x256xf32>
    %cst_27 = arith.constant 5.000000e-01 : f32
    %81 = vector.broadcast %cst_27 : f32 to vector<2x256xf32>
    %82 = arith.mulf %81, %80 : vector<2x256xf32>
    %83 = arith.mulf %74, %76 : vector<2x256xf32>
    %84 = math.tanh %83 : vector<2x256xf32>
    %85 = arith.mulf %82, %84 : vector<2x256xf32>
    %86 = arith.truncf %85 : vector<2x256xf32> to vector<2x256xbf16>
    %c0_28 = arith.constant 0 : index
    %c0_29 = arith.constant 0 : index
    %87 = vector.load %arg6[%c0_28, %c0_29] : memref<512x128xbf16, #tpu.memory_space<vmem>>, vector<256x128xbf16>
    %cst_30 = arith.constant dense<0.000000e+00> : vector<2x128xf32>
    %88 = tpu.matmul %68, %87, %cst_30 {dimension_numbers = #tpu.dot_dimension_numbers<[1], [0], [0], [1], [0, 0, 1, 1], [], []>} : vector<2x256xbf16>, vector<256x128xbf16>, vector<2x128xf32> -> vector<2x128xf32>
    %c256_31 = arith.constant 256 : index
    %c0_32 = arith.constant 0 : index
    %89 = vector.load %arg6[%c256_31, %c0_32] : memref<512x128xbf16, #tpu.memory_space<vmem>>, vector<256x128xbf16>
    %cst_33 = arith.constant dense<0.000000e+00> : vector<2x128xf32>
    %90 = tpu.matmul %86, %89, %cst_33 {dimension_numbers = #tpu.dot_dimension_numbers<[1], [0], [0], [1], [0, 0, 1, 1], [], []>} : vector<2x256xbf16>, vector<256x128xbf16>, vector<2x128xf32> -> vector<2x128xf32>
    %91 = arith.addf %88, %90 : vector<2x128xf32>
    %c0_34 = arith.constant 0 : index
    %c0_35 = arith.constant 0 : index
    %92 = vector.load %arg7[%c0_34, %c0_35] : memref<1x128xf32, #tpu.memory_space<vmem>>, vector<1x128xf32>
    %93 = vector.broadcast %92 : vector<1x128xf32> to vector<2x128xf32>
    %94 = arith.addf %91, %93 : vector<2x128xf32>
    %c0_36 = arith.constant 0 : index
    %c0_37 = arith.constant 0 : index
    %95 = vector.load %arg8[%c0_36, %c0_37] : memref<2x128xf32, #tpu.memory_space<vmem>>, vector<2x128xf32>
    tpu.vector_store %arg8[%c0_36, %c0_37], %94 {strides = array<i32>} : memref<2x128xf32, #tpu.memory_space<vmem>>, vector<2x128xf32>,
    return
  }
  func.func @transform_0(%arg0: i32) -> (i32, i32) {
    %c0_i32 = arith.constant 0 : i32
    %c0_i32_0 = arith.constant 0 : i32
    return %arg0, %c0_i32 : i32, i32
  }
  func.func @transform_1(%arg0: i32) -> (i32, i32) {
    %c0_i32 = arith.constant 0 : i32
    %c0_i32_0 = arith.constant 0 : i32
    %c0_i32_1 = arith.constant 0 : i32
    return %c0_i32, %c0_i32_0 : i32, i32
  }
  func.func @transform_2(%arg0: i32) -> (i32, i32) {
    %c0_i32 = arith.constant 0 : i32
    %c0_i32_0 = arith.constant 0 : i32
    %c0_i32_1 = arith.constant 0 : i32
    return %c0_i32, %c0_i32_0 : i32, i32
  }
  func.func @transform_3(%arg0: i32) -> (i32, i32) {
    %c0_i32 = arith.constant 0 : i32
    %c0_i32_0 = arith.constant 0 : i32
    %c0_i32_1 = arith.constant 0 : i32
    return %c0_i32, %c0_i32_0 : i32, i32
  }
  func.func @transform_4(%arg0: i32) -> (i32, i32) {
    %c0_i32 = arith.constant 0 : i32
    %c0_i32_0 = arith.constant 0 : i32
    %c0_i32_1 = arith.constant 0 : i32
    return %c0_i32, %c0_i32_0 : i32, i32
  }
  func.func @transform_5(%arg0: i32) -> (i32, i32) {
    %c0_i32 = arith.constant 0 : i32
    %c0_i32_0 = arith.constant 0 : i32
    %c0_i32_1 = arith.constant 0 : i32
    return %c0_i32, %c0_i32_0 : i32, i32
  }
  func.func @transform_6(%arg0: i32) -> (i32, i32) {
    %c0_i32 = arith.constant 0 : i32
    %c0_i32_0 = arith.constant 0 : i32
    %c0_i32_1 = arith.constant 0 : i32
    return %c0_i32, %c0_i32_0 : i32, i32
  }
  func.func @transform_7(%arg0: i32) -> (i32, i32) {
    %c0_i32 = arith.constant 0 : i32
    %c0_i32_0 = arith.constant 0 : i32
    return %arg0, %c0_i32 : i32, i32
  }
}

</mosaic_0001>

<bundles_post_ra>
// kernel: brnn_forward.1
= control target key start
LH: loop header
LB: loop body
LE: loop exit
PB: predicated region body
PF: predicated region fallthrough
CT: control target
= control target key end

     0   :  { %12 = vsyncpa [#allocation3], 0  ;;  %s6618_s0 = inlined_call_operand.hbm [shape: f32[2,28], index: 0, kind: input, shape index: {}]   ;;  %s6619_s1 = inlined_call_operand.hbm [shape: bf16[28,1536], index: 1, kind: input, shape index: {}]   ;;  %s6620_s2 = inlined_call_operand.hbm [shape: f32[1,1536], index: 2, kind: input, shape index: {}]   ;;  %s6621_s3 = inlined_call_operand.hbm [shape: bf16[512,1536], index: 3, kind: input, shape index: {}]   ;;  %s6622_s4 = inlined_call_operand.hbm [shape: f32[1,1536], index: 4, kind: input, shape index: {}]   ;;  %s6623_s5 = inlined_call_operand.hbm [shape: bf16[512,128], index: 5, kind: input, shape index: {}]   ;;  %s6624_s6 = inlined_call_operand.hbm [shape: f32[1,128], index: 6, kind: input, shape index: {}]   ;;  %s6625_s7 = inlined_call_operand.hbm [shape: f32[2,128], index: 7, kind: output, shape index: {}]  }
   0x1   :  { %13 = vsyncpa [#allocation6], 0 }
   0x2   :  { %14 = vsyncpa [#allocation9], 0 }
   0x3   :  { %15 = vsyncpa [#allocation12], 0  ;;  %s32_s26 = sshll.u32 %s6619_s1, 4  ;;  %s33_s26 = int_to_ptr.hbm [resolvable:$true] %s32_s26 }
   0x4   :  { %16 = vsyncpa [#allocation4], 0  ;;  %s6369_s27 = smov [#allocation5]   ;;  %s56_s8 = sshll.u32 %s6621_s3, 4  ;;  %s57_s8 = int_to_ptr.hbm [resolvable:$true] %s56_s8 }
   0x5   :  { %s34_s28 = sshll.u32 %s6369_s27, 4  ;;  %s6370_s9 = smov 768   ;;  %s35_s28 = int_to_ptr.vmem [resolvable:$true] %s34_s28 }
   0x6   :  { %s6371_s10 = smov 48   ;;  %s6372_s11 = smov [#allocation8]  }
   0x7   :  { %40 = dma.hbm_to_vmem [thread:$0]  %s33_s26, 3072, %s35_s28, [#allocation6], %s6370_s9, %s6370_s9, %s6371_s10  }
   0x8   :  { %s58_s12 = sshll.u32 %s6372_s11, 4  ;;  %s80_s15 = sshll.u32 %s6623_s5, 4  ;;  %s59_s12 = int_to_ptr.vmem [resolvable:$true] %s58_s12  ;;  %s81_s15 = int_to_ptr.hbm [resolvable:$true] %s80_s15 }
   0x9   :  { %64 = dma.hbm_to_vmem [thread:$0]  %s57_s8, 49152, %s59_s12, [#allocation9], %s6370_s9, %s6370_s9, %s6371_s10  }
   0xa   :  { %s6373_s1 = smov [#allocation11]   ;;  %s22_s3 = sshll.u32 %s6618_s0, 4  ;;  %s23_s3 = int_to_ptr.hbm [resolvable:$true] %s22_s3 }
   0xb   :  { %s82_s16 = sshll.u32 %s6373_s1, 4  ;;  %s6374_s19 = smov 64   ;;  %s83_s16 = int_to_ptr.vmem [resolvable:$true] %s82_s16 }
   0xc   :  { %s6375_s20 = smov 4   ;;  %s6376_s21 = smov [#allocation2]  }
   0xd   :  { %88 = dma.hbm_to_vmem [thread:$0]  %s81_s15, 4096, %s83_s16, [#allocation12], %s6374_s19, %s6374_s19, %s6375_s20  }
   0xe   :  { %s24_s22 = sshll.u32 %s6376_s21, 4  ;;  %s46_s5 = sshll.u32 %s6620_s2, 4  ;;  %s25_s22 = int_to_ptr.vmem [resolvable:$true] %s24_s22  ;;  %s47_s5 = int_to_ptr.hbm [resolvable:$true] %s46_s5 }
   0xf   :  { %27 = dma.hbm_to_vmem [thread:$0]  %s23_s3, 32, %s25_s22, [#allocation3]  }
  0x10   :  { %s70_s27 = sshll.u32 %s6622_s4, 4  ;;  %s6377_s28 = smov [#allocation7]   ;;  %s71_s27 = int_to_ptr.hbm [resolvable:$true] %s70_s27 }
  0x11   :  { %s48_s29 = sshll.u32 %s6377_s28, 4  ;;  %s6378_s0 = smov [#allocation10]   ;;  %s49_s29 = int_to_ptr.vmem [resolvable:$true] %s48_s29 }
  0x12   :  { %51 = dma.hbm_to_vmem [thread:$0]  %s47_s5, 192, %s49_s29, [#allocation6]  }
  0x13   :  { %s72_s30 = sshll.u32 %s6378_s0, 4  ;;  %s94_s10 = sshll.u32 %s6624_s6, 4  ;;  %s73_s30 = int_to_ptr.vmem [resolvable:$true] %s72_s30  ;;  %s95_s10 = int_to_ptr.hbm [resolvable:$true] %s94_s10 }
  0x14   :  { %75 = dma.hbm_to_vmem [thread:$0]  %s71_s27, 192, %s73_s30, [#allocation9]  }
  0x15   :  { %s6379_s2 = smov [#allocation13]  }
  0x16   :  { %s96_s11 = sshll.u32 %s6379_s2, 4  ;;  %s97_s11 = int_to_ptr.vmem [resolvable:$true] %s96_s11 }
  0x17   :  { %99 = dma.hbm_to_vmem [thread:$0]  %s95_s10, 16, %s97_s11, [#allocation12]  }
  0x18   :  { %6359 = dma.done.wait [#allocation3], 32  }
  0x19   :  { %6360 = vsyncadd [#allocation3], 4294967264 }
  0x1a   :  { %6361 = dma.done.wait [#allocation6], 3264  }
  0x1b   :  { %6362 = vsyncadd [#allocation6], 4294964032 }
  0x1c   :  { %6363 = dma.done.wait [#allocation9], 49344  }
  0x1d   :  { %6364 = vsyncadd [#allocation9], 4294917952 }
  0x1e   :  { %6365 = dma.done.wait [#allocation12], 4112  }
  0x1f   :  { %6366 = vsyncadd [#allocation12], 4294963184  ;;  %vm295_vm0 = vcmask 1045504   ;;  %v3928_v0 = vld [vmem:[#allocation5 + $0x60] sm:$0xf]  ;;  %vm291_vm1 = vcmask 228352  }
  0x20   :  { %v5668_v1 = vld [vmem:[#allocation5 + $0x8c] sm:$0x30]  ;;  %v5662_v2 = vld [vmem:[#allocation5 + $0x64] sm:$0xf]  ;;  %v3930_v4 = vld [vmem:[#allocation5 + $0x90] sm:$0x30] }
  0x21   :  { %v3929_v3 = vor.u32 %v5668_v1, %v3928_v0  ;;  %v3936_v5 = vld [vmem:[#allocation5 + $0x68] sm:$0xf]  ;;  %v5669_v6 = vld [vmem:[#allocation5 + $0x94] sm:$0x30]  ;;  %v3933_v7 = vor.u32 %v5662_v2, %v3930_v4  ;;  %v5663_v9 = vld [vmem:[#allocation5 + $0x6c] sm:$0xf] }
  0x22   :  { %v3937_v8 = vor.u32 %v5669_v6, %v3936_v5  ;;  %v3938_v10 = vld [vmem:[#allocation5 + $0x98] sm:$0x30]  ;;  %v3880_v11 = vld [vmem:[#allocation5] sm:$0xf]  ;;  %v5656_v14 = vld [vmem:[#allocation5 + $0x2c] sm:$0xf0] }
  0x23   :  { %v297_v12 = vsel %vm295_vm0, %v3929_v3, 0  ;;  %v3941_v13 = vor.u32 %v5663_v9, %v3938_v10  ;;  %v5650_v15 = vld [vmem:[#allocation5 + $0x4] sm:$0xf]  ;;  %v300_v16 = vsel %vm295_vm0, %v3933_v7, 0  ;;  %v3881_v18 = vor.u32 %v5656_v14, %v3880_v11  ;;  %v3882_v19 = vld [vmem:[#allocation5 + $0x30] sm:$0xf0] }
  0x24   :  { %338 = vmatpush.bf16.msra.mxu0 %v297_v12  ;;  %v303_v17 = vsel %vm295_vm0, %v3937_v8, 0  ;;  %v3888_v20 = vld [vmem:[#allocation5 + $0x8] sm:$0xf]  ;;  %351 = vmatpush.bf16.msra.mxu1 %v300_v16  ;;  %v3885_v22 = vor.u32 %v5650_v15, %v3882_v19  ;;  %v5657_v23 = vld [vmem:[#allocation5 + $0x34] sm:$0xf0]  ;;  %s6380_s4 = smov [#allocation14]  }
  0x25   :  { %364 = vmatpush.bf16.msra.mxu2 %v303_v17  ;;  %v306_v21 = vsel %vm295_vm0, %v3941_v13, 0  ;;  %v5651_v24 = vld [vmem:[#allocation5 + $0xc] sm:$0xf]  ;;  %v3889_v25 = vor.u32 %v5657_v23, %v3888_v20  ;;  %v3890_v26 = vld [vmem:[#allocation5 + $0x38] sm:$0xf0]  ;;  %s3863_s6 = sshll.u32 %s6380_s4, 4  ;;  %s3864_s6 = int_to_ptr.vmem [resolvable:$true] %s3863_s6 }
  0x26   :  { %377 = vmatpush.bf16.msra.mxu3 %v306_v21  ;;  %v129_v27 = vld [vmem:[#allocation2] sm:$0x3]  ;;  %v3944_v28 = vld [vmem:[#allocation5 + $0x70] sm:$0xf]  ;;  %v3893_v29 = vor.u32 %v5651_v24, %v3890_v26  ;;  %v5670_v31 = vld [vmem:[#allocation5 + $0x9c] sm:$0x30] }
  0x27   :  { %v6446_v30 = vpack.c.bf16 %v129_v27, %v129_v27  ;;  %v5664_v32 = vld [vmem:[#allocation5 + $0x74] sm:$0xf]  ;;  %v3946_v33 = vld [vmem:[#allocation5 + $0xa0] sm:$0x30]  ;;  %v3945_v34 = vor.u32 %v5670_v31, %v3944_v28  ;;  %v3952_v36 = vld [vmem:[#allocation5 + $0x78] sm:$0xf] }
  0x28   :  { %339 = vmatpush.bf16.msra.mxu0 %v3881_v18  ;;  %v3949_v35 = vor.u32 %v5664_v32, %v3946_v33  ;;  %v5671_v37 = vld [vmem:[#allocation5 + $0xa4] sm:$0x30]  ;;  %v5665_v38 = vld [vmem:[#allocation5 + $0x7c] sm:$0xf]  ;;  %352 = vmatpush.bf16.msra.mxu1 %v3885_v22  ;;  %v3954_v40 = vld [vmem:[#allocation5 + $0xa8] sm:$0x30] }
  0x29   :  { %365 = vmatpush.bf16.msra.mxu2 %v3889_v25  ;;  %v3953_v39 = vor.u32 %v5671_v37, %v3952_v36  ;;  %v3896_v41 = vld [vmem:[#allocation5 + $0x10] sm:$0xf]  ;;  %v5658_v42 = vld [vmem:[#allocation5 + $0x3c] sm:$0xf0]  ;;  %v309_v43 = vsel %vm295_vm0, %v3945_v34, 0  ;;  %v3957_v45 = vor.u32 %v5665_v38, %v3954_v40  ;;  %s3865_s14 = sshll.u32 %s6625_s7, 4  ;;  %s3866_s14 = int_to_ptr.hbm [resolvable:$true] %s3865_s14 }
  0x2a   :  { %378 = vmatpush.bf16.msra.mxu3 %v3893_v29  ;;  %v312_v44 = vsel %vm295_vm0, %v3949_v35, 0  ;;  %v5652_v46 = vld [vmem:[#allocation5 + $0x14] sm:$0xf]  ;;  %v3898_v47 = vld [vmem:[#allocation5 + $0x40] sm:$0xf0]  ;;  %v3897_v55 = vor.u32 %v5658_v42, %v3896_v41 }
  0x2b   :  { %3974 = vmatmul.msk.bf16.vlgmr.msra.gmra.mxu0 %vm291_vm1, %v6446_v30  ;;  %v315_v48 = vsel %vm295_vm0, %v3953_v39, 0  ;;  %v3901_v49 = vor.u32 %v5652_v46, %v3898_v47  ;;  %v3904_v50 = vld [vmem:[#allocation5 + $0x18] sm:$0xf]  ;;  %v5659_v51 = vld [vmem:[#allocation5 + $0x44] sm:$0xf0]  ;;  %3975 = vmatmul.msk.bf16.vlgmr.msra.gmra.mxu1 %vm291_vm1, %v6446_v30  ;;  %v318_v52 = vsel %vm295_vm0, %v3957_v45, 0 }
  0x2c   :  { %403 = vmatpush.bf16.msrb.mxu1 %v312_v44  ;;  %3976 = vmatmul.msk.bf16.vlgmr.msra.gmra.mxu2 %vm291_vm1, %v6446_v30  ;;  %v5653_v53 = vld [vmem:[#allocation5 + $0x1c] sm:$0xf]  ;;  %v3906_v54 = vld [vmem:[#allocation5 + $0x48] sm:$0xf0]  ;;  %v3960_v56 = vld [vmem:[#allocation5 + $0x80] sm:$0xf]  ;;  %v3905_v59 = vor.u32 %v5659_v51, %v3904_v50 }
  0x2d   :  { %3977 = vmatmul.msk.bf16.vlgmr.msra.gmra.mxu3 %vm291_vm1, %v6446_v30  ;;  %390 = vmatpush.bf16.msrb.mxu0 %v309_v43  ;;  %v5672_v57 = vld [vmem:[#allocation5 + $0xac] sm:$0x30]  ;;  %v5666_v58 = vld [vmem:[#allocation5 + $0x84] sm:$0xf]  ;;  %v3909_v60 = vor.u32 %v5653_v53, %v3906_v54  ;;  %v3962_v62 = vld [vmem:[#allocation5 + $0xb0] sm:$0x30] }
  0x2e   :  { %416 = vmatpush.bf16.msrb.mxu2 %v315_v48  ;;  %429 = vmatpush.bf16.msrb.mxu3 %v318_v52  ;;  %v3961_v61 = vor.u32 %v5672_v57, %v3960_v56  ;;  %v3968_v63 = vld [vmem:[#allocation5 + $0x88] sm:$0xf]  ;;  %v5673_v0 = vld [vmem:[#allocation5 + $0xb4] sm:$0x30]  ;;  %v3965_v1 = vor.u32 %v5666_v58, %v3962_v62  ;;  %v5667_v3 = vld [vmem:[#allocation5 + $0x8c] sm:$0xf] }
  0x2f   :  { %v3969_v2 = vor.u32 %v5673_v0, %v3968_v63  ;;  %v3970_v4 = vld [vmem:[#allocation5 + $0xb8] sm:$0x30]  ;;  %v3912_v5 = vld [vmem:[#allocation5 + $0x20] sm:$0xf]  ;;  %v5660_v8 = vld [vmem:[#allocation5 + $0x4c] sm:$0xf0] }
  0x30   :  { %404 = vmatpush.bf16.msrb.mxu1 %v3901_v49  ;;  %v321_v6 = vsel %vm295_vm0, %v3961_v61, 0  ;;  %v3973_v7 = vor.u32 %v5667_v3, %v3970_v4  ;;  %v5654_v9 = vld [vmem:[#allocation5 + $0x24] sm:$0xf]  ;;  %v324_v10 = vsel %vm295_vm0, %v3965_v1, 0  ;;  %v3914_v12 = vld [vmem:[#allocation5 + $0x50] sm:$0xf0]  ;;  %v3913_v17 = vor.u32 %v5660_v8, %v3912_v5 }
  0x31   :  { %391 = vmatpush.bf16.msrb.mxu0 %v3897_v55  ;;  %v327_v11 = vsel %vm295_vm0, %v3969_v2, 0  ;;  %v3920_v13 = vld [vmem:[#allocation5 + $0x28] sm:$0xf]  ;;  %v5661_v15 = vld [vmem:[#allocation5 + $0x54] sm:$0xf0]  ;;  %v3917_v18 = vor.u32 %v5654_v9, %v3914_v12 }
  0x32   :  { %417 = vmatpush.bf16.msrb.mxu2 %v3905_v59  ;;  %430 = vmatpush.bf16.msrb.mxu3 %v3909_v60  ;;  %v330_v14 = vsel %vm295_vm0, %v3973_v7, 0  ;;  %v5655_v16 = vld [vmem:[#allocation5 + $0x2c] sm:$0xf]  ;;  %v3922_v19 = vld [vmem:[#allocation5 + $0x58] sm:$0xf0]  ;;  %v3921_v20 = vor.u32 %v5661_v15, %v3920_v13 }
  0x33   :  { %v3925_v21 = vor.u32 %v5655_v16, %v3922_v19  ;;  %v4324_v22 = vld [vmem:[#allocation8 + $0x8a0] sm:$0xf]  ;;  %v5956_v23 = vld [vmem:[#allocation8 + $0x8cc] sm:$0xf0]  ;;  %v5950_v26 = vld [vmem:[#allocation8 + $0x8a4] sm:$0xf] }
  0x34   :  { %455 = vmatpush.bf16.msra.mxu1 %v324_v10  ;;  %v4708_v24 = vld [vmem:[#allocation8 + $0xba0] sm:$0xf]  ;;  %v6052_v25 = vld [vmem:[#allocation8 + $0xbcc] sm:$0xf0]  ;;  %v4326_v27 = vld [vmem:[#allocation8 + $0x8d0] sm:$0xf0]  ;;  %v4325_v31 = vor.u32 %v5956_v23, %v4324_v22 }
  0x35   :  { %442 = vmatpush.bf16.msra.mxu0 %v321_v6  ;;  %v6046_v28 = vld [vmem:[#allocation8 + $0xba4] sm:$0xf]  ;;  %v4710_v29 = vld [vmem:[#allocation8 + $0xbd0] sm:$0xf0]  ;;  %v4709_v32 = vor.u32 %v6052_v25, %v4708_v24  ;;  %v4329_v33 = vor.u32 %v5950_v26, %v4326_v27  ;;  %v4276_v35 = vld [vmem:[#allocation8 + $0x840] sm:$0xf] }
  0x36   :  { %468 = vmatpush.bf16.msra.mxu2 %v327_v11  ;;  %481 = vmatpush.bf16.msra.mxu3 %v330_v14  ;;  %v4713_v34 = vor.u32 %v6046_v28, %v4710_v29  ;;  %v5944_v36 = vld [vmem:[#allocation8 + $0x86c] sm:$0xf0]  ;;  %v4660_v37 = vld [vmem:[#allocation8 + $0xb40] sm:$0xf]  ;;  %v5938_v40 = vld [vmem:[#allocation8 + $0x844] sm:$0xf] }
  0x37   :  { %v4277_v38 = vor.u32 %v5944_v36, %v4276_v35  ;;  %v6040_v39 = vld [vmem:[#allocation8 + $0xb6c] sm:$0xf0]  ;;  %v4278_v41 = vld [vmem:[#allocation8 + $0x870] sm:$0xf0]  ;;  %v6034_v44 = vld [vmem:[#allocation8 + $0xb44] sm:$0xf] }
  0x38   :  { %456 = vmatpush.bf16.msra.mxu1 %v3917_v18  ;;  %v4661_v42 = vor.u32 %v6040_v39, %v4660_v37  ;;  %v4281_v43 = vor.u32 %v5938_v40, %v4278_v41  ;;  %v4662_v45 = vld [vmem:[#allocation8 + $0xb70] sm:$0xf0]  ;;  %v4228_v47 = vld [vmem:[#allocation8 + $0x7e0] sm:$0xf]  ;;  %v5932_v48 = vld [vmem:[#allocation8 + $0x80c] sm:$0xf0] }
  0x39   :  { %443 = vmatpush.bf16.msra.mxu0 %v3913_v17  ;;  %v4665_v46 = vor.u32 %v6034_v44, %v4662_v45  ;;  %v4612_v49 = vld [vmem:[#allocation8 + $0xae0] sm:$0xf]  ;;  %v6028_v50 = vld [vmem:[#allocation8 + $0xb0c] sm:$0xf0]  ;;  %v5926_v51 = vld [vmem:[#allocation8 + $0x7e4] sm:$0xf] }
  0x3a   :  { %469 = vmatpush.bf16.msra.mxu2 %v3921_v20  ;;  %482 = vmatpush.bf16.msra.mxu3 %v3925_v21  ;;  %v4230_v52 = vld [vmem:[#allocation8 + $0x810] sm:$0xf0]  ;;  %v4613_v53 = vor.u32 %v6028_v50, %v4612_v49  ;;  %v6022_v55 = vld [vmem:[#allocation8 + $0xae4] sm:$0xf]  ;;  %v4180_v58 = vld [vmem:[#allocation8 + $0x780] sm:$0xf] }
  0x3b   :  { %3978 = vmatmul.msk.bf16.vlgmr.msrb.gmra.mxu0 %vm291_vm1, %v6446_v30  ;;  %3979 = vmatmul.msk.bf16.vlgmr.msrb.gmra.mxu1 %vm291_vm1, %v6446_v30  ;;  %v4233_v54 = vor.u32 %v5926_v51, %v4230_v52  ;;  %v4614_v56 = vld [vmem:[#allocation8 + $0xb10] sm:$0xf0]  ;;  %v5920_v59 = vld [vmem:[#allocation8 + $0x7ac] sm:$0xf0]  ;;  %v4564_v60 = vld [vmem:[#allocation8 + $0xa80] sm:$0xf] }
  0x3c   :  { %3980 = vmatmul.msk.bf16.vlgmr.msrb.gmra.mxu2 %vm291_vm1, %v6446_v30  ;;  %1889 = vmatpush.bf16.msrb.mxu1 %v4709_v32  ;;  %v4617_v57 = vor.u32 %v6022_v55, %v4614_v56  ;;  %v4181_v61 = vor.u32 %v5920_v59, %v4180_v58  ;;  %v6016_v62 = vld [vmem:[#allocation8 + $0xaac] sm:$0xf0]  ;;  %v5914_v63 = vld [vmem:[#allocation8 + $0x784] sm:$0xf]  ;;  %v4182_v0 = vld [vmem:[#allocation8 + $0x7b0] sm:$0xf0] }
  0x3d   :  { %3981 = vmatmul.msk.bf16.vlgmr.msrb.gmra.mxu3 %vm291_vm1, %v6446_v30  ;;  %1876 = vmatpush.bf16.msrb.mxu0 %v4325_v31  ;;  %v4565_v1 = vor.u32 %v6016_v62, %v4564_v60  ;;  %v4185_v2 = vor.u32 %v5914_v63, %v4182_v0  ;;  %v6010_v3 = vld [vmem:[#allocation8 + $0xa84] sm:$0xf]  ;;  %v4566_v4 = vld [vmem:[#allocation8 + $0xab0] sm:$0xf0]  ;;  %v4132_v6 = vld [vmem:[#allocation8 + $0x720] sm:$0xf] }
  0x3e   :  { %1902 = vmatpush.bf16.msrb.mxu2 %v4329_v33  ;;  %1915 = vmatpush.bf16.msrb.mxu3 %v4713_v34  ;;  %v4569_v5 = vor.u32 %v6010_v3, %v4566_v4  ;;  %v5908_v7 = vld [vmem:[#allocation8 + $0x74c] sm:$0xf0]  ;;  %v4516_v8 = vld [vmem:[#allocation8 + $0xa20] sm:$0xf]  ;;  %v5902_v11 = vld [vmem:[#allocation8 + $0x724] sm:$0xf] }
  0x3f   :  { %v4133_v9 = vor.u32 %v5908_v7, %v4132_v6  ;;  %v6004_v10 = vld [vmem:[#allocation8 + $0xa4c] sm:$0xf0]  ;;  %v4134_v12 = vld [vmem:[#allocation8 + $0x750] sm:$0xf0]  ;;  %v5998_v15 = vld [vmem:[#allocation8 + $0xa24] sm:$0xf] }
  0x40   :  { %1890 = vmatpush.bf16.msrb.mxu1 %v4661_v42  ;;  %v4517_v13 = vor.u32 %v6004_v10, %v4516_v8  ;;  %v4137_v14 = vor.u32 %v5902_v11, %v4134_v12  ;;  %v4518_v16 = vld [vmem:[#allocation8 + $0xa50] sm:$0xf0]  ;;  %v4084_v18 = vld [vmem:[#allocation8 + $0x6c0] sm:$0xf]  ;;  %v5896_v19 = vld [vmem:[#allocation8 + $0x6ec] sm:$0xf0] }
  0x41   :  { %1877 = vmatpush.bf16.msrb.mxu0 %v4277_v38  ;;  %v4521_v17 = vor.u32 %v5998_v15, %v4518_v16  ;;  %v4468_v20 = vld [vmem:[#allocation8 + $0x9c0] sm:$0xf]  ;;  %v4085_v21 = vor.u32 %v5896_v19, %v4084_v18  ;;  %v5992_v22 = vld [vmem:[#allocation8 + $0x9ec] sm:$0xf0]  ;;  %v5890_v23 = vld [vmem:[#allocation8 + $0x6c4] sm:$0xf] }
  0x42   :  { %1903 = vmatpush.bf16.msrb.mxu2 %v4281_v43  ;;  %1916 = vmatpush.bf16.msrb.mxu3 %v4665_v46  ;;  %v4086_v24 = vld [vmem:[#allocation8 + $0x6f0] sm:$0xf0]  ;;  %v4469_v25 = vor.u32 %v5992_v22, %v4468_v20  ;;  %v5986_v27 = vld [vmem:[#allocation8 + $0x9c4] sm:$0xf]  ;;  %v4036_v32 = vld [vmem:[#allocation8 + $0x660] sm:$0xf] }
  0x43   :  { %v4089_v26 = vor.u32 %v5890_v23, %v4086_v24  ;;  %v4470_v28 = vld [vmem:[#allocation8 + $0x9f0] sm:$0xf0]  ;;  %v5884_v33 = vld [vmem:[#allocation8 + $0x68c] sm:$0xf0]  ;;  %v4420_v34 = vld [vmem:[#allocation8 + $0x960] sm:$0xf] }
  0x44   :  { %1891 = vmatpush.bf16.msrb.mxu1 %v4613_v53  ;;  %v6480_v29 = vld [vmem:[#allocation7] sm:$0xff]  ;;  %v4473_v31 = vor.u32 %v5986_v27, %v4470_v28  ;;  %v4037_v35 = vor.u32 %v5884_v33, %v4036_v32  ;;  %v5980_v36 = vld [vmem:[#allocation8 + $0x98c] sm:$0xf0]  ;;  %v5878_v37 = vld [vmem:[#allocation8 + $0x664] sm:$0xf] }
  0x45   :  { %v4038_v38 = vld [vmem:[#allocation8 + $0x690] sm:$0xf0]  ;;  %v4421_v39 = vor.u32 %v5980_v36, %v4420_v34  ;;  %v5974_v41 = vld [vmem:[#allocation8 + $0x964] sm:$0xf]  ;;  %v159_v44 = vperm.slane %v6480_v29, 0  ;;  %v160_v45 = vperm.slane %v6480_v29, 1 }
  0x46   :  { %1904 = vmatpush.bf16.msrb.mxu2 %v4233_v54  ;;  %1917 = vmatpush.bf16.msrb.mxu3 %v4617_v57  ;;  %v4041_v40 = vor.u32 %v5878_v37, %v4038_v38  ;;  %v4422_v42 = vld [vmem:[#allocation8 + $0x990] sm:$0xf0]  ;;  %v3988_v46 = vld [vmem:[#allocation8 + $0x600] sm:$0xf]  ;;  %v5866_v50 = vld [vmem:[#allocation8 + $0x604] sm:$0xf] }
  0x47   :  { %v4425_v43 = vor.u32 %v5974_v41, %v4422_v42  ;;  %v4372_v49 = vld [vmem:[#allocation8 + $0x900] sm:$0xf]  ;;  %v3990_v52 = vld [vmem:[#allocation8 + $0x630] sm:$0xf0]  ;;  %v5962_v53 = vld [vmem:[#allocation8 + $0x904] sm:$0xf] }
  0x48   :  { %1892 = vmatpush.bf16.msrb.mxu1 %v4565_v1  ;;  %v4374_v54 = vld [vmem:[#allocation8 + $0x930] sm:$0xf0]  ;;  %v3993_v55 = vor.u32 %v5866_v50, %v3990_v52  ;;  %v4332_v57 = vld [vmem:[#allocation8 + $0x8a8] sm:$0xf]  ;;  %v5957_v58 = vld [vmem:[#allocation8 + $0x8d4] sm:$0xf0] }
  0x49   :  { %v4377_v56 = vor.u32 %v5962_v53, %v4374_v54  ;;  %v4716_v59 = vld [vmem:[#allocation8 + $0xba8] sm:$0xf]  ;;  %v4333_v60 = vor.u32 %v5957_v58, %v4332_v57  ;;  %v5951_v62 = vld [vmem:[#allocation8 + $0x8ac] sm:$0xf]  ;;  %v4334_v63 = vld [vmem:[#allocation8 + $0x8d8] sm:$0xf0] }
  0x4a   :  { %1905 = vmatpush.bf16.msrb.mxu2 %v4185_v2  ;;  %1918 = vmatpush.bf16.msrb.mxu3 %v4569_v5  ;;  %v4337_v1 = vor.u32 %v5951_v62, %v4334_v63  ;;  %v6047_v2 = vld [vmem:[#allocation8 + $0xbac] sm:$0xf]  ;;  %v4718_v3 = vld [vmem:[#allocation8 + $0xbd8] sm:$0xf0]  ;;  %v4284_v4 = vld [vmem:[#allocation8 + $0x848] sm:$0xf] }
  0x4b   :  { %3982 = vmatmul.msk.bf16.vlgmr.msra.gmra.mxu0 %vm291_vm1, %v6446_v30  ;;  %3983 = vmatmul.msk.bf16.vlgmr.msra.gmra.mxu1 %vm291_vm1, %v6446_v30  ;;  %v4721_v6 = vor.u32 %v6047_v2, %v4718_v3  ;;  %v5945_v7 = vld [vmem:[#allocation8 + $0x874] sm:$0xf0]  ;;  %v4668_v8 = vld [vmem:[#allocation8 + $0xb48] sm:$0xf]  ;;  %v4286_v15 = vld [vmem:[#allocation8 + $0x878] sm:$0xf0] }
  0x4c   :  { %3984 = vmatmul.msk.bf16.vlgmr.msra.gmra.mxu2 %vm291_vm1, %v6446_v30  ;;  %1893 = vmatpush.bf16.msrb.mxu1 %v4517_v13  ;;  %v4285_v12 = vor.u32 %v5945_v7, %v4284_v4  ;;  %v6035_v16 = vld [vmem:[#allocation8 + $0xb4c] sm:$0xf]  ;;  %v4670_v19 = vld [vmem:[#allocation8 + $0xb78] sm:$0xf0]  ;;  %v161_v20 = vperm.slane %v6480_v29, 2 }
  0x4d   :  { %3985 = vmatmul.msk.bf16.vlgmr.msra.gmra.mxu3 %vm291_vm1, %v6446_v30  ;;  %v4229_v30 = vor.u32 %v5932_v48, %v4228_v47  ;;  %v5872_v47 = vld [vmem:[#allocation8 + $0x62c] sm:$0xf0]  ;;  %v4673_v22 = vor.u32 %v6035_v16, %v4670_v19  ;;  %v4236_v23 = vld [vmem:[#allocation8 + $0x7e8] sm:$0xf]  ;;  %v5933_v24 = vld [vmem:[#allocation8 + $0x814] sm:$0xf0] }
  0x4e   :  { %1906 = vmatpush.bf16.msrb.mxu2 %v4137_v14  ;;  %1919 = vmatpush.bf16.msrb.mxu3 %v4521_v17  ;;  %v3989_v48 = vor.u32 %v5872_v47, %v3988_v46  ;;  %v5939_v14 = vld [vmem:[#allocation8 + $0x84c] sm:$0xf]  ;;  %v6029_v27 = vld [vmem:[#allocation8 + $0xb14] sm:$0xf0]  ;;  %v4238_v32 = vld [vmem:[#allocation8 + $0x818] sm:$0xf0] }
  0x4f   :  { %1878 = vmatpush.bf16.msrb.mxu0 %v4229_v30  ;;  %v5968_v30 = vld [vmem:[#allocation8 + $0x92c] sm:$0xf0]  ;;  %v4289_v18 = vor.u32 %v5939_v14, %v4286_v15  ;;  %v5927_v28 = vld [vmem:[#allocation8 + $0x7ec] sm:$0xf]  ;;  %v4622_v34 = vld [vmem:[#allocation8 + $0xb18] sm:$0xf0] }
  0x50   :  { %1894 = vmatpush.bf16.msrb.mxu1 %v4469_v25  ;;  %v4373_v51 = vor.u32 %v5968_v30, %v4372_v49  ;;  %v4237_v25 = vor.u32 %v5933_v24, %v4236_v23  ;;  %v6023_v33 = vld [vmem:[#allocation8 + $0xaec] sm:$0xf]  ;;  %v4188_v38 = vld [vmem:[#allocation8 + $0x788] sm:$0xf]  ;;  %v4190_v50 = vld [vmem:[#allocation8 + $0x7b8] sm:$0xf0] }
  0x51   :  { %v4625_v36 = vor.u32 %v6023_v33, %v4622_v34  ;;  %v5915_v46 = vld [vmem:[#allocation8 + $0x78c] sm:$0xf]  ;;  %v4574_v52 = vld [vmem:[#allocation8 + $0xab8] sm:$0xf0]  ;;  %v4140_v58 = vld [vmem:[#allocation8 + $0x728] sm:$0xf] }
  0x52   :  { %1907 = vmatpush.bf16.msrb.mxu2 %v4089_v26  ;;  %1920 = vmatpush.bf16.msrb.mxu3 %v4473_v31  ;;  %v4620_v26 = vld [vmem:[#allocation8 + $0xae8] sm:$0xf]  ;;  %v6005_v62 = vld [vmem:[#allocation8 + $0xa54] sm:$0xf0]  ;;  %v5903_v2 = vld [vmem:[#allocation8 + $0x72c] sm:$0xf] }
  0x53   :  { %1879 = vmatpush.bf16.msrb.mxu0 %v4181_v61  ;;  %v6053_v61 = vld [vmem:[#allocation8 + $0xbd4] sm:$0xf0]  ;;  %v4621_v31 = vor.u32 %v6029_v27, %v4620_v26  ;;  %v4142_v3 = vld [vmem:[#allocation8 + $0x758] sm:$0xf0]  ;;  %v5999_v7 = vld [vmem:[#allocation8 + $0xa2c] sm:$0xf] }
  0x54   :  { %1895 = vmatpush.bf16.msrb.mxu1 %v4421_v39  ;;  %v4717_v0 = vor.u32 %v6053_v61, %v4716_v59  ;;  %v5921_v39 = vld [vmem:[#allocation8 + $0x7b4] sm:$0xf0]  ;;  %v4524_v61 = vld [vmem:[#allocation8 + $0xa28] sm:$0xf]  ;;  %v5891_v19 = vld [vmem:[#allocation8 + $0x6cc] sm:$0xf] }
  0x55   :  { %v5909_v59 = vld [vmem:[#allocation8 + $0x754] sm:$0xf0]  ;;  %v5987_v27 = vld [vmem:[#allocation8 + $0x9cc] sm:$0xf] }
  0x56   :  { %1908 = vmatpush.bf16.msrb.mxu2 %v4041_v40  ;;  %1921 = vmatpush.bf16.msrb.mxu3 %v4425_v43  ;;  %v4572_v40 = vld [vmem:[#allocation8 + $0xa88] sm:$0xf] }
  0x57   :  { %1880 = vmatpush.bf16.msrb.mxu0 %v4133_v9  ;;  %v6041_v9 = vld [vmem:[#allocation8 + $0xb74] sm:$0xf0] }
  0x58   :  { %1896 = vmatpush.bf16.msrb.mxu1 %v4373_v51  ;;  %v4669_v13 = vor.u32 %v6041_v9, %v4668_v8  ;;  %v6011_v51 = vld [vmem:[#allocation8 + $0xa8c] sm:$0xf]  ;;  %v4526_v8 = vld [vmem:[#allocation8 + $0xa58] sm:$0xf0] }
  0x5a   :  { %1909 = vmatpush.bf16.msrb.mxu2 %v3993_v55  ;;  %1922 = vmatpush.bf16.msrb.mxu3 %v4377_v56  ;;  %v4193_v55 = vor.u32 %v5915_v46, %v4190_v50  ;;  %v4577_v56 = vor.u32 %v6011_v51, %v4574_v52  ;;  %v4430_v46 = vld [vmem:[#allocation8 + $0x998] sm:$0xf0]  ;;  %v4380_v50 = vld [vmem:[#allocation8 + $0x908] sm:$0xf] }
  0x5b   :  { %1881 = vmatpush.bf16.msrb.mxu0 %v4085_v21  ;;  %v162_v21 = vperm.slane %v6480_v29, 3 }
  0x5c   :  { %1941 = vmatpush.bf16.msra.mxu1 %v4717_v0  ;;  %v163_v0 = vperm.slane %v6480_v29, 4 }
  0x5e   :  { %1954 = vmatpush.bf16.msra.mxu2 %v4337_v1  ;;  %1967 = vmatpush.bf16.msra.mxu3 %v4721_v6  ;;  %v4525_v1 = vor.u32 %v6005_v62, %v4524_v61  ;;  %v4145_v6 = vor.u32 %v5903_v2, %v4142_v3  ;;  %v5963_v61 = vld [vmem:[#allocation8 + $0x90c] sm:$0xf]  ;;  %v4382_v62 = vld [vmem:[#allocation8 + $0x938] sm:$0xf0] }
  0x5f   :  { %1882 = vmatpush.bf16.msrb.mxu0 %v4037_v35  ;;  %v4241_v35 = vor.u32 %v5927_v28, %v4238_v32  ;;  %v4478_v28 = vld [vmem:[#allocation8 + $0x9f8] sm:$0xf0] }
  0x60   :  { %1942 = vmatpush.bf16.msra.mxu1 %v4669_v13  ;;  %v4476_v13 = vld [vmem:[#allocation8 + $0x9c8] sm:$0xf]  ;;  %v4481_v34 = vor.u32 %v5987_v27, %v4478_v28 }
  0x62   :  { %1955 = vmatpush.bf16.msra.mxu2 %v4289_v18  ;;  %1968 = vmatpush.bf16.msra.mxu3 %v4673_v22  ;;  %v5993_v18 = vld [vmem:[#allocation8 + $0x9f4] sm:$0xf0] }
  0x63   :  { %1883 = vmatpush.bf16.msrb.mxu0 %v3989_v48  ;;  %v4477_v26 = vor.u32 %v5993_v18, %v4476_v13 }
  0x64   :  { %1943 = vmatpush.bf16.msra.mxu1 %v4621_v31 }
  0x66   :  { %1956 = vmatpush.bf16.msra.mxu2 %v4241_v35  ;;  %1969 = vmatpush.bf16.msra.mxu3 %v4625_v36  ;;  %v4044_v35 = vld [vmem:[#allocation8 + $0x668] sm:$0xf]  ;;  %v5885_v36 = vld [vmem:[#allocation8 + $0x694] sm:$0xf0] }
  0x67   :  { %1928 = vmatpush.bf16.msra.mxu0 %v4333_v60  ;;  %v4141_v60 = vor.u32 %v5909_v59, %v4140_v58 }
  0x6a   :  { %1957 = vmatpush.bf16.msra.mxu2 %v4193_v55  ;;  %1970 = vmatpush.bf16.msra.mxu3 %v4577_v56  ;;  %v5969_v55 = vld [vmem:[#allocation8 + $0x934] sm:$0xf0]  ;;  %v3998_v56 = vld [vmem:[#allocation8 + $0x638] sm:$0xf0] }
  0x6b   :  { %1929 = vmatpush.bf16.msra.mxu0 %v4285_v12  ;;  %v5897_v12 = vld [vmem:[#allocation8 + $0x6f4] sm:$0xf0]  ;;  %v4381_v59 = vor.u32 %v5969_v55, %v4380_v50  ;;  %v6048_v55 = vld [vmem:[#allocation8 + $0xbb4] sm:$0xf] }
  0x6e   :  { %1958 = vmatpush.bf16.msra.mxu2 %v4145_v6 }
  0x6f   :  { %1930 = vmatpush.bf16.msra.mxu0 %v4237_v25  ;;  %v165_v25 = vperm.slane %v6480_v29, 6 }
  0xa8   :  { %v341_v5 = vpop.f32.mrf.mxu0  ;;  %v354_v11 = vpop.f32.mrf.mxu1 }
  0xa9   :  { %v342_v10 = vadd.f32 %v341_v5, %v159_v44  ;;  %v355_v17 = vadd.f32 %v354_v11, %v160_v45  ;;  %v4189_v44 = vor.u32 %v5921_v39, %v4188_v38  ;;  %v6017_v45 = vld [vmem:[#allocation8 + $0xab4] sm:$0xf0]  ;;  %v164_v5 = vperm.slane %v6480_v29, 5  ;;  %v4092_v11 = vld [vmem:[#allocation8 + $0x6c8] sm:$0xf] }
  0xaa   :  { %v4573_v30 = vor.u32 %v6017_v45, %v4572_v40  ;;  %v4045_v38 = vor.u32 %v5885_v36, %v4044_v35  ;;  %v5981_v39 = vld [vmem:[#allocation8 + $0x994] sm:$0xf0]  ;;  %v5879_v40 = vld [vmem:[#allocation8 + $0x66c] sm:$0xf] }
  0xab   :  { %6103 = vtanh.f32 %v342_v10  ;;  %1931 = vmatpush.bf16.msra.mxu0 %v4189_v44  ;;  %v4529_v10 = vor.u32 %v5999_v7, %v4526_v8  ;;  %v5975_v45 = vld [vmem:[#allocation8 + $0x96c] sm:$0xf] }
  0xac   :  { %6105 = vtanh.f32 %v355_v17  ;;  %1944 = vmatpush.bf16.msra.mxu1 %v4573_v30  ;;  %v4093_v17 = vor.u32 %v5897_v12, %v4092_v11  ;;  %v5873_v30 = vld [vmem:[#allocation8 + $0x634] sm:$0xf0] }
  0xad   :  { %1971 = vmatpush.bf16.msra.mxu3 %v4529_v10 }
  0xaf   :  { %v367_v37 = vpop.f32.mrf.mxu2  ;;  %1932 = vmatpush.bf16.msra.mxu0 %v4141_v60 }
  0xb0   :  { %v368_v41 = vadd.f32 %v367_v37, %v161_v20  ;;  %v380_v42 = vpop.f32.mrf.mxu3  ;;  %v343_v43 = vpop.f32.mrf.mxu0  ;;  %v4094_v20 = vld [vmem:[#allocation8 + $0x6f8] sm:$0xf0]  ;;  %1945 = vmatpush.bf16.msra.mxu1 %v4525_v1  ;;  %v4428_v37 = vld [vmem:[#allocation8 + $0x968] sm:$0xf] }
  0xb1   :  { %v6104_v47 = vpop.eup %6103  ;;  %v381_v48 = vadd.f32 %v380_v42, %v162_v21  ;;  %v356_v49 = vpop.f32.mrf.mxu1  ;;  %v4097_v33 = vor.u32 %v5891_v19, %v4094_v20  ;;  %v166_v42 = vperm.slane %v6480_v29, 7  ;;  %v4429_v43 = vor.u32 %v5981_v39, %v4428_v37  ;;  %1972 = vmatpush.bf16.msra.mxu3 %v4481_v34  ;;  %v5867_v29 = vld [vmem:[#allocation8 + $0x60c] sm:$0xf] }
  0xb2   :  { %v6106_v53 = vpop.eup %6105  ;;  %v490_v54 = vadd.f32 1.0, %v6104_v47  ;;  %6107 = vtanh.f32 %v368_v41  ;;  %v4046_v41 = vld [vmem:[#allocation8 + $0x698] sm:$0xf0]  ;;  %v4433_v47 = vor.u32 %v5975_v45, %v4430_v46  ;;  %v3996_v49 = vld [vmem:[#allocation8 + $0x608] sm:$0xf]  ;;  %v4001_v60 = vor.u32 %v5867_v29, %v3998_v56 }
  0xb3   :  { %v491_v57 = vadd.f32 1.0, %v6106_v53  ;;  %6109 = vtanh.f32 %v381_v48  ;;  %1933 = vmatpush.bf16.msra.mxu0 %v4093_v17  ;;  %1959 = vmatpush.bf16.msra.mxu2 %v4097_v33  ;;  %v4049_v44 = vor.u32 %v5879_v40, %v4046_v41  ;;  %v4340_v46 = vld [vmem:[#allocation8 + $0x8b0] sm:$0xf]  ;;  %v4726_v29 = vld [vmem:[#allocation8 + $0xbe0] sm:$0xf0] }
  0xb4   :  { %v492_v63 = vmul.f32 0.5, %v490_v54  ;;  %1946 = vmatpush.bf16.msra.mxu1 %v4477_v26  ;;  %v3997_v54 = vor.u32 %v5873_v30, %v3996_v49  ;;  %v5958_v49 = vld [vmem:[#allocation8 + $0x8dc] sm:$0xf0]  ;;  %v4724_v30 = vld [vmem:[#allocation8 + $0xbb0] sm:$0xf] }
  0xb5   :  { %v493_v4 = vmul.f32 0.5, %v491_v57  ;;  %1973 = vmatpush.bf16.msra.mxu3 %v4433_v47 }
  0xb7   :  { %v369_v9 = vpop.f32.mrf.mxu2  ;;  %1934 = vmatpush.bf16.msra.mxu0 %v4045_v38  ;;  %1960 = vmatpush.bf16.msra.mxu2 %v4049_v44 }
  0xb8   :  { %v6108_v14 = vpop.eup %6107  ;;  %v382_v15 = vpop.f32.mrf.mxu3  ;;  %1947 = vmatpush.bf16.msra.mxu1 %v4429_v43 }
  0xb9   :  { %v393_v16 = vpop.f32.mrf.mxu0  ;;  %v6110_v21 = vpop.eup %6109  ;;  %v502_v22 = vmul.f32 %v6108_v14, %v492_v63  ;;  %v156_v63 = vld [vmem:[#allocation7 + $0x8] sm:$0xf] }
  0xba   :  { %v394_v23 = vadd.f32 %v393_v16, %v163_v0  ;;  %v406_v24 = vpop.f32.mrf.mxu1  ;;  %v503_v31 = vmul.f32 %v6110_v21, %v493_v4  ;;  %v4385_v0 = vor.u32 %v5963_v61, %v4382_v62  ;;  %v168_v7 = vperm.slane %v156_v63, 1  ;;  %v5946_v61 = vld [vmem:[#allocation8 + $0x87c] sm:$0xf0] }
  0xbb   :  { %v407_v32 = vadd.f32 %v406_v24, %v164_v5  ;;  %1935 = vmatpush.bf16.msra.mxu0 %v3997_v54  ;;  %v167_v5 = vperm.slane %v156_v63, 0  ;;  %1961 = vmatpush.bf16.msra.mxu2 %v4001_v60  ;;  %v170_v24 = vperm.slane %v156_v63, 3  ;;  %v4342_v54 = vld [vmem:[#allocation8 + $0x8e0] sm:$0xf0]  ;;  %v4292_v60 = vld [vmem:[#allocation8 + $0x850] sm:$0xf] }
  0xbc   :  { %6111 = vtanh.f32 %v394_v23  ;;  %1948 = vmatpush.bf16.msra.mxu1 %v4381_v59  ;;  %1974 = vmatpush.bf16.msra.mxu3 %v4385_v0  ;;  %v4729_v0 = vor.u32 %v6048_v55, %v4726_v29  ;;  %v4102_v55 = vld [vmem:[#allocation8 + $0x700] sm:$0xf0]  ;;  %v5988_v29 = vld [vmem:[#allocation8 + $0x9d4] sm:$0xf] }
  0xbd   :  { %6113 = vtanh.f32 %v407_v32 }
  0xbe   :  { %6115 = vtanh.f32 %v502_v22  ;;  %v169_v22 = vperm.slane %v156_v63, 2 }
  0xbf   :  { %v419_v48 = vpop.f32.mrf.mxu2  ;;  %6117 = vtanh.f32 %v503_v31 }
  0xc0   :  { %v420_v51 = vadd.f32 %v419_v48, %v165_v25  ;;  %v432_v52 = vpop.f32.mrf.mxu3 }
  0xc1   :  { %v395_v53 = vpop.f32.mrf.mxu0  ;;  %v433_v57 = vadd.f32 %v432_v52, %v166_v42  ;;  %v5952_v52 = vld [vmem:[#allocation8 + $0x8b4] sm:$0xf] }
  0xc2   :  { %v408_v58 = vpop.f32.mrf.mxu1  ;;  %v6112_v1 = vpop.eup %6111  ;;  %6119 = vtanh.f32 %v420_v51  ;;  %v6054_v51 = vld [vmem:[#allocation8 + $0xbdc] sm:$0xf0]  ;;  %v4345_v63 = vor.u32 %v5952_v52, %v4342_v54  ;;  %v4484_v52 = vld [vmem:[#allocation8 + $0x9d0] sm:$0xf]  ;;  %v5892_v54 = vld [vmem:[#allocation8 + $0x6d4] sm:$0xf] }
  0xc3   :  { %v6114_v2 = vpop.eup %6113  ;;  %v498_v3 = vadd.f32 1.0, %v6112_v1  ;;  %6121 = vtanh.f32 %v433_v57  ;;  %v4341_v58 = vor.u32 %v5958_v49, %v4340_v46  ;;  %v4725_v59 = vor.u32 %v6054_v51, %v4724_v30  ;;  %v4676_v1 = vld [vmem:[#allocation8 + $0xb50] sm:$0xf]  ;;  %v4534_v46 = vld [vmem:[#allocation8 + $0xa60] sm:$0xf0] }
  0xc4   :  { %v499_v4 = vadd.f32 1.0, %v6114_v2  ;;  %v6116_v8 = vpop.eup %6115  ;;  %v6042_v2 = vld [vmem:[#allocation8 + $0xb7c] sm:$0xf0]  ;;  %v4100_v49 = vld [vmem:[#allocation8 + $0x6d0] sm:$0xf] }
  0xc5   :  { %v500_v6 = vmul.f32 0.5, %v498_v3  ;;  %v6118_v11 = vpop.eup %6117  ;;  %v5940_v3 = vld [vmem:[#allocation8 + $0x854] sm:$0xf]  ;;  %v5898_v30 = vld [vmem:[#allocation8 + $0x6fc] sm:$0xf0] }
  0xc6   :  { %v501_v9 = vmul.f32 0.5, %v499_v4  ;;  %v4294_v4 = vld [vmem:[#allocation8 + $0x880] sm:$0xf0] }
  0xc7   :  { %v421_v10 = vpop.f32.mrf.mxu2  ;;  %v6490_v12 = vmul.f32 %v6116_v8, %v500_v6  ;;  %v4678_v6 = vld [vmem:[#allocation8 + $0xb80] sm:$0xf0]  ;;  %v4677_v8 = vor.u32 %v6042_v2, %v4676_v1  ;;  %v4436_v1 = vld [vmem:[#allocation8 + $0x970] sm:$0xf]  ;;  %v5982_v2 = vld [vmem:[#allocation8 + $0x99c] sm:$0xf0] }
  0xc8   :  { %v434_v13 = vpop.f32.mrf.mxu3  ;;  %v6120_v15 = vpop.eup %6119  ;;  %v6492_v16 = vmul.f32 %v6118_v11, %v501_v9  ;;  %v4244_v9 = vld [vmem:[#allocation8 + $0x7f0] sm:$0xf]  ;;  %v5934_v10 = vld [vmem:[#allocation8 + $0x81c] sm:$0xf0]  ;;  %v4297_v11 = vor.u32 %v5940_v3, %v4294_v4  ;;  %v5880_v3 = vld [vmem:[#allocation8 + $0x674] sm:$0xf] }
  0xc9   :  { %v445_v14 = vpop.f32.mrf.mxu0  ;;  %v6122_v19 = vpop.eup %6121  ;;  %v512_v21 = vadd.f32 1.0, %v6120_v15  ;;  %v6030_v15 = vld [vmem:[#allocation8 + $0xb1c] sm:$0xf0]  ;;  %v4054_v4 = vld [vmem:[#allocation8 + $0x6a0] sm:$0xf0] }
  0xca   :  { %v446_v17 = vadd.f32 %v445_v14, %v167_v5  ;;  %v458_v18 = vpop.f32.mrf.mxu1  ;;  %v513_v23 = vadd.f32 1.0, %v6122_v19  ;;  %v6036_v5 = vld [vmem:[#allocation8 + $0xb54] sm:$0xf]  ;;  %v4628_v14 = vld [vmem:[#allocation8 + $0xaf0] sm:$0xf] }
  0xcb   :  { %v459_v20 = vadd.f32 %v458_v18, %v168_v7  ;;  %v514_v26 = vmul.f32 0.5, %v512_v21  ;;  %v4293_v7 = vor.u32 %v5946_v61, %v4292_v60  ;;  %v4681_v13 = vor.u32 %v6036_v5, %v4678_v6  ;;  %v4246_v18 = vld [vmem:[#allocation8 + $0x820] sm:$0xf0]  ;;  %v6024_v19 = vld [vmem:[#allocation8 + $0xaf4] sm:$0xf] }
  0xcc   :  { %6123 = vtanh.f32 %v446_v17  ;;  %v515_v33 = vmul.f32 0.5, %v513_v23  ;;  %v5928_v17 = vld [vmem:[#allocation8 + $0x7f4] sm:$0xf]  ;;  %v4245_v21 = vor.u32 %v5934_v10, %v4244_v9  ;;  %v4196_v23 = vld [vmem:[#allocation8 + $0x790] sm:$0xf]  ;;  %v4437_v9 = vor.u32 %v5982_v2, %v4436_v1 }
  0xcd   :  { %6125 = vtanh.f32 %v459_v20  ;;  %v4630_v20 = vld [vmem:[#allocation8 + $0xb20] sm:$0xf0]  ;;  %v4052_v60 = vld [vmem:[#allocation8 + $0x670] sm:$0xf]  ;;  %v5886_v61 = vld [vmem:[#allocation8 + $0x69c] sm:$0xf0] }
  0xce   :  { %v5976_v5 = vld [vmem:[#allocation8 + $0x974] sm:$0xf]  ;;  %v4438_v6 = vld [vmem:[#allocation8 + $0x9a0] sm:$0xf0]  ;;  %v5874_v10 = vld [vmem:[#allocation8 + $0x63c] sm:$0xf0] }
  0xcf   :  { %v471_v25 = vpop.f32.mrf.mxu2  ;;  %v4588_v1 = vld [vmem:[#allocation8 + $0xa98] sm:$0xf]  ;;  %v6019_v2 = vld [vmem:[#allocation8 + $0xac4] sm:$0xf0] }
  0xd0   :  { %v472_v27 = vadd.f32 %v471_v25, %v169_v22  ;;  %v484_v28 = vpop.f32.mrf.mxu3  ;;  %v4629_v22 = vor.u32 %v6030_v15, %v4628_v14  ;;  %v4249_v25 = vor.u32 %v5928_v17, %v4246_v18  ;;  %v4057_v14 = vor.u32 %v5880_v3, %v4054_v4  ;;  %v5868_v17 = vld [vmem:[#allocation8 + $0x614] sm:$0xf]  ;;  %v4006_v18 = vld [vmem:[#allocation8 + $0x640] sm:$0xf0]  ;;  %v5917_v3 = vld [vmem:[#allocation8 + $0x79c] sm:$0xf] }
  0xd1   :  { %v447_v31 = vpop.f32.mrf.mxu0  ;;  %v485_v34 = vadd.f32 %v484_v28, %v170_v24  ;;  %v5922_v24 = vld [vmem:[#allocation8 + $0x7bc] sm:$0xf0]  ;;  %v4441_v15 = vor.u32 %v5976_v5, %v4438_v6  ;;  %v4206_v4 = vld [vmem:[#allocation8 + $0x7c8] sm:$0xf0]  ;;  %v6013_v5 = vld [vmem:[#allocation8 + $0xa9c] sm:$0xf] }
  0xd2   :  { %v6124_v32 = vpop.eup %6123  ;;  %v460_v35 = vpop.f32.mrf.mxu1  ;;  %6127 = vtanh.f32 %v472_v27  ;;  %v4580_v27 = vld [vmem:[#allocation8 + $0xa90] sm:$0xf]  ;;  %v6018_v28 = vld [vmem:[#allocation8 + $0xabc] sm:$0xf0]  ;;  %v5916_v31 = vld [vmem:[#allocation8 + $0x794] sm:$0xf] }
  0xd3   :  { %v6126_v36 = vpop.eup %6125  ;;  %v524_v37 = vmul.f32 %v6124_v32, %v514_v26  ;;  %6129 = vtanh.f32 %v485_v34  ;;  %v4633_v26 = vor.u32 %v6024_v19, %v4630_v20  ;;  %v4198_v32 = vld [vmem:[#allocation8 + $0x7c0] sm:$0xf0]  ;;  %v4197_v35 = vor.u32 %v5922_v24, %v4196_v23  ;;  %v5964_v19 = vld [vmem:[#allocation8 + $0x914] sm:$0xf]  ;;  %v4732_v23 = vld [vmem:[#allocation8 + $0xbb8] sm:$0xf] }
  0xd4   :  { %v525_v38 = vmul.f32 %v6126_v36, %v515_v33  ;;  %v6012_v33 = vld [vmem:[#allocation8 + $0xa94] sm:$0xf]  ;;  %v4582_v34 = vld [vmem:[#allocation8 + $0xac0] sm:$0xf0]  ;;  %v4581_v36 = vor.u32 %v6018_v28, %v4580_v27  ;;  %v6055_v24 = vld [vmem:[#allocation8 + $0xbe4] sm:$0xf0] }
  0xd5   :  { %6131 = vtanh.f32 %v524_v37  ;;  %v4148_v37 = vld [vmem:[#allocation8 + $0x730] sm:$0xf]  ;;  %v4390_v20 = vld [vmem:[#allocation8 + $0x940] sm:$0xf0]  ;;  %v4350_v28 = vld [vmem:[#allocation8 + $0x8e8] sm:$0xf0] }
  0xd6   :  { %6133 = vtanh.f32 %v525_v38  ;;  %v5910_v38 = vld [vmem:[#allocation8 + $0x75c] sm:$0xf0]  ;;  %v4590_v6 = vld [vmem:[#allocation8 + $0xac8] sm:$0xf0] }
  0xd7   :  { %v473_v39 = vpop.f32.mrf.mxu2 }
  0xd8   :  { %v6128_v40 = vpop.eup %6127  ;;  %v486_v41 = vpop.f32.mrf.mxu3  ;;  %v4201_v39 = vor.u32 %v5916_v31, %v4198_v32  ;;  %v6049_v31 = vld [vmem:[#allocation8 + $0xbbc] sm:$0xf]  ;;  %v4734_v32 = vld [vmem:[#allocation8 + $0xbe8] sm:$0xf0] }
  0xd9   :  { %v6130_v42 = vpop.eup %6129  ;;  %v520_v43 = vadd.f32 1.0, %v6128_v40  ;;  %v4585_v40 = vor.u32 %v6012_v33, %v4582_v34  ;;  %v4532_v41 = vld [vmem:[#allocation8 + $0xa30] sm:$0xf]  ;;  %v4009_v33 = vor.u32 %v5868_v17, %v4006_v18  ;;  %v4393_v34 = vor.u32 %v5964_v19, %v4390_v20  ;;  %v5905_v17 = vld [vmem:[#allocation8 + $0x73c] sm:$0xf] }
  0xda   :  { %v521_v45 = vadd.f32 1.0, %v6130_v42  ;;  %v6006_v42 = vld [vmem:[#allocation8 + $0xa5c] sm:$0xf0]  ;;  %v4158_v18 = vld [vmem:[#allocation8 + $0x768] sm:$0xf0] }
  0xdb   :  { %v6132_v44 = vpop.eup %6131  ;;  %v522_v48 = vmul.f32 0.5, %v520_v43  ;;  %v5904_v43 = vld [vmem:[#allocation8 + $0x734] sm:$0xf]  ;;  %v6001_v19 = vld [vmem:[#allocation8 + $0xa3c] sm:$0xf] }
  0xdc   :  { %v6134_v47 = vpop.eup %6133  ;;  %v523_v50 = vmul.f32 0.5, %v521_v45  ;;  %v6000_v45 = vld [vmem:[#allocation8 + $0xa34] sm:$0xf]  ;;  %v4542_v20 = vld [vmem:[#allocation8 + $0xa68] sm:$0xf0] }
  0xdd   :  { %v528_v53 = vmul.f32 %v6132_v44, %v522_v48  ;;  %v4150_v44 = vld [vmem:[#allocation8 + $0x760] sm:$0xf0]  ;;  %v4533_v48 = vor.u32 %v6006_v42, %v4532_v41  ;;  %v4537_v51 = vor.u32 %v6000_v45, %v4534_v46  ;;  %v4684_v41 = vld [vmem:[#allocation8 + $0xb58] sm:$0xf]  ;;  %v6043_v42 = vld [vmem:[#allocation8 + $0xb84] sm:$0xf0] }
  0xde   :  { %v529_v56 = vmul.f32 %v6134_v47, %v523_v50  ;;  %v4149_v47 = vor.u32 %v5910_v38, %v4148_v37  ;;  %v4153_v50 = vor.u32 %v5904_v43, %v4150_v44  ;;  %v4300_v37 = vld [vmem:[#allocation8 + $0x858] sm:$0xf]  ;;  %v5947_v38 = vld [vmem:[#allocation8 + $0x884] sm:$0xf0]  ;;  %v5941_v43 = vld [vmem:[#allocation8 + $0x85c] sm:$0xf] }
  0xdf   :  { %v6494_v57 = vpack.c.bf16 %v528_v53, %v528_v53  ;;  %v5994_v53 = vld [vmem:[#allocation8 + $0x9fc] sm:$0xf0]  ;;  %v4302_v44 = vld [vmem:[#allocation8 + $0x888] sm:$0xf0]  ;;  %v6037_v45 = vld [vmem:[#allocation8 + $0xb5c] sm:$0xf] }
  0xe0   :  { %v6496_v62 = vpack.c.bf16 %v529_v56, %v529_v56  ;;  %v4486_v56 = vld [vmem:[#allocation8 + $0xa00] sm:$0xf0]  ;;  %v4686_v46 = vld [vmem:[#allocation8 + $0xb88] sm:$0xf0] }
  0xe1   :  { %1884 = vmatmul.bf16.vlgmr.msrb.gmra.mxu0 %v6494_v57  ;;  %1910 = vmatmul.bf16.vlgmr.msrb.gmra.mxu2 %v6494_v57 }
  0xe2   :  { %1897 = vmatmul.bf16.vlgmr.msrb.gmra.mxu1 %v6496_v62  ;;  %1923 = vmatmul.bf16.vlgmr.msrb.gmra.mxu3 %v6496_v62 }
  0xe3   :  { %1980 = vmatpush.bf16.msrb.mxu0 %v4341_v58  ;;  %1993 = vmatpush.bf16.msrb.mxu1 %v4725_v59  ;;  %v4101_v58 = vor.u32 %v5898_v30, %v4100_v49  ;;  %v4485_v59 = vor.u32 %v5994_v53, %v4484_v52  ;;  %v4252_v49 = vld [vmem:[#allocation8 + $0x7f8] sm:$0xf]  ;;  %v5935_v30 = vld [vmem:[#allocation8 + $0x824] sm:$0xf0] }
  0xe4   :  { %2006 = vmatpush.bf16.msrb.mxu2 %v4345_v63  ;;  %2019 = vmatpush.bf16.msrb.mxu3 %v4729_v0  ;;  %v4105_v63 = vor.u32 %v5892_v54, %v4102_v55  ;;  %v4489_v0 = vor.u32 %v5988_v29, %v4486_v56  ;;  %v4636_v52 = vld [vmem:[#allocation8 + $0xaf8] sm:$0xf]  ;;  %v6031_v53 = vld [vmem:[#allocation8 + $0xb24] sm:$0xf0]  ;;  %v5929_v54 = vld [vmem:[#allocation8 + $0x7fc] sm:$0xf] }
  0xe5   :  { %v4254_v55 = vld [vmem:[#allocation8 + $0x828] sm:$0xf0]  ;;  %v6025_v29 = vld [vmem:[#allocation8 + $0xafc] sm:$0xf] }
  0xe6   :  { %v4638_v56 = vld [vmem:[#allocation8 + $0xb28] sm:$0xf0] }
  0xe7   :  { %1981 = vmatpush.bf16.msrb.mxu0 %v4293_v7  ;;  %1994 = vmatpush.bf16.msrb.mxu1 %v4677_v8  ;;  %v4004_v7 = vld [vmem:[#allocation8 + $0x610] sm:$0xf]  ;;  %v4053_v8 = vor.u32 %v5886_v61, %v4052_v60  ;;  %v4204_v60 = vld [vmem:[#allocation8 + $0x798] sm:$0xf]  ;;  %v5923_v61 = vld [vmem:[#allocation8 + $0x7c4] sm:$0xf0] }
  0xe8   :  { %2007 = vmatpush.bf16.msrb.mxu2 %v4297_v11  ;;  %2020 = vmatpush.bf16.msrb.mxu3 %v4681_v13  ;;  %v4388_v11 = vld [vmem:[#allocation8 + $0x910] sm:$0xf]  ;;  %v5970_v13 = vld [vmem:[#allocation8 + $0x93c] sm:$0xf0] }
  0xe9   :  { %v4389_v27 = vor.u32 %v5970_v13, %v4388_v11  ;;  %v4209_v11 = vor.u32 %v5917_v3, %v4206_v4  ;;  %v4593_v13 = vor.u32 %v6013_v5, %v4590_v6  ;;  %v6050_v3 = vld [vmem:[#allocation8 + $0xbc4] sm:$0xf]  ;;  %v4742_v4 = vld [vmem:[#allocation8 + $0xbf0] sm:$0xf0] }
  0xeb   :  { %1982 = vmatpush.bf16.msrb.mxu0 %v4245_v21  ;;  %1995 = vmatpush.bf16.msrb.mxu1 %v4629_v22  ;;  %v4348_v21 = vld [vmem:[#allocation8 + $0x8b8] sm:$0xf]  ;;  %v5959_v22 = vld [vmem:[#allocation8 + $0x8e4] sm:$0xf0] }
  0xec   :  { %2008 = vmatpush.bf16.msrb.mxu2 %v4249_v25  ;;  %2021 = vmatpush.bf16.msrb.mxu3 %v4633_v26  ;;  %v5953_v25 = vld [vmem:[#allocation8 + $0x8bc] sm:$0xf]  ;;  %v4005_v26 = vor.u32 %v5874_v10, %v4004_v7  ;;  %v4205_v7 = vor.u32 %v5923_v61, %v4204_v60  ;;  %v5911_v10 = vld [vmem:[#allocation8 + $0x764] sm:$0xf0]  ;;  %v4740_v60 = vld [vmem:[#allocation8 + $0xbc0] sm:$0xf] }
  0xed   :  { %v6056_v61 = vld [vmem:[#allocation8 + $0xbec] sm:$0xf0] }
  0xef   :  { %1983 = vmatpush.bf16.msrb.mxu0 %v4197_v35  ;;  %1996 = vmatpush.bf16.msrb.mxu1 %v4581_v36  ;;  %v4349_v35 = vor.u32 %v5959_v22, %v4348_v21  ;;  %v4733_v36 = vor.u32 %v6055_v24, %v4732_v23  ;;  %v4108_v23 = vld [vmem:[#allocation8 + $0x6d8] sm:$0xf]  ;;  %v5899_v24 = vld [vmem:[#allocation8 + $0x704] sm:$0xf0] }
  0xf0   :  { %2009 = vmatpush.bf16.msrb.mxu2 %v4201_v39  ;;  %2022 = vmatpush.bf16.msrb.mxu3 %v4585_v40  ;;  %v4353_v39 = vor.u32 %v5953_v25, %v4350_v28  ;;  %v4737_v40 = vor.u32 %v6049_v31, %v4734_v32  ;;  %v4161_v25 = vor.u32 %v5905_v17, %v4158_v18  ;;  %v5995_v28 = vld [vmem:[#allocation8 + $0xa04] sm:$0xf0]  ;;  %v5893_v31 = vld [vmem:[#allocation8 + $0x6dc] sm:$0xf]  ;;  %v4110_v32 = vld [vmem:[#allocation8 + $0x708] sm:$0xf0] }
  0xf1   :  { %1936 = vmatmul.bf16.vlgmr.msra.gmra.mxu0 %v6494_v57  ;;  %1962 = vmatmul.bf16.vlgmr.msra.gmra.mxu2 %v6494_v57  ;;  %v5942_v17 = vld [vmem:[#allocation8 + $0x864] sm:$0xf]  ;;  %v4310_v18 = vld [vmem:[#allocation8 + $0x890] sm:$0xf0] }
  0xf2   :  { %1949 = vmatmul.bf16.vlgmr.msra.gmra.mxu1 %v6496_v62  ;;  %1975 = vmatmul.bf16.vlgmr.msra.gmra.mxu3 %v6496_v62 }
  0xf3   :  { %1984 = vmatpush.bf16.msrb.mxu0 %v4149_v47  ;;  %1997 = vmatpush.bf16.msrb.mxu1 %v4533_v48  ;;  %v4301_v47 = vor.u32 %v5947_v38, %v4300_v37  ;;  %v4685_v48 = vor.u32 %v6043_v42, %v4684_v41  ;;  %v4060_v37 = vld [vmem:[#allocation8 + $0x678] sm:$0xf]  ;;  %v5887_v38 = vld [vmem:[#allocation8 + $0x6a4] sm:$0xf0] }
  0xf4   :  { %2010 = vmatpush.bf16.msrb.mxu2 %v4153_v50  ;;  %2023 = vmatpush.bf16.msrb.mxu3 %v4537_v51  ;;  %v4305_v50 = vor.u32 %v5941_v43, %v4302_v44  ;;  %v4689_v51 = vor.u32 %v6037_v45, %v4686_v46  ;;  %v4444_v41 = vld [vmem:[#allocation8 + $0x978] sm:$0xf]  ;;  %v5983_v42 = vld [vmem:[#allocation8 + $0x9a4] sm:$0xf0]  ;;  %v5881_v43 = vld [vmem:[#allocation8 + $0x67c] sm:$0xf] }
  0xf5   :  { %v4062_v44 = vld [vmem:[#allocation8 + $0x6a8] sm:$0xf0]  ;;  %v5977_v45 = vld [vmem:[#allocation8 + $0x97c] sm:$0xf] }
  0xf6   :  { %v4446_v46 = vld [vmem:[#allocation8 + $0x9a8] sm:$0xf0] }
  0xf7   :  { %1985 = vmatpush.bf16.msrb.mxu0 %v4101_v58  ;;  %1998 = vmatpush.bf16.msrb.mxu1 %v4485_v59  ;;  %v4253_v58 = vor.u32 %v5935_v30, %v4252_v49  ;;  %v4637_v59 = vor.u32 %v6031_v53, %v4636_v52  ;;  %v4445_v49 = vor.u32 %v5983_v42, %v4444_v41  ;;  %v5875_v30 = vld [vmem:[#allocation8 + $0x644] sm:$0xf0]  ;;  %v4596_v41 = vld [vmem:[#allocation8 + $0xaa0] sm:$0xf]  ;;  %v6020_v42 = vld [vmem:[#allocation8 + $0xacc] sm:$0xf0] }
  0xf8   :  { %2011 = vmatpush.bf16.msrb.mxu2 %v4105_v63  ;;  %2024 = vmatpush.bf16.msrb.mxu3 %v4489_v0  ;;  %v4257_v63 = vor.u32 %v5929_v54, %v4254_v55  ;;  %v4641_v0 = vor.u32 %v6025_v29, %v4638_v56  ;;  %v4065_v52 = vor.u32 %v5881_v43, %v4062_v44  ;;  %v5869_v54 = vld [vmem:[#allocation8 + $0x61c] sm:$0xf]  ;;  %v4014_v55 = vld [vmem:[#allocation8 + $0x648] sm:$0xf0]  ;;  %v5918_v43 = vld [vmem:[#allocation8 + $0x7a4] sm:$0xf] }
  0xf9   :  { %v4449_v53 = vor.u32 %v5977_v45, %v4446_v46  ;;  %v5965_v29 = vld [vmem:[#allocation8 + $0x91c] sm:$0xf]  ;;  %v4398_v56 = vld [vmem:[#allocation8 + $0x948] sm:$0xf0]  ;;  %v4017_v5 = vor.u32 %v5869_v54, %v4014_v55  ;;  %v4214_v44 = vld [vmem:[#allocation8 + $0x7d0] sm:$0xf0] }
  0xfa   :  { %v4401_v6 = vor.u32 %v5965_v29, %v4398_v56  ;;  %v6014_v45 = vld [vmem:[#allocation8 + $0xaa4] sm:$0xf]  ;;  %v4598_v46 = vld [vmem:[#allocation8 + $0xad0] sm:$0xf0] }
  0xfb   :  { %1986 = vmatpush.bf16.msrb.mxu0 %v4053_v8  ;;  %1999 = vmatpush.bf16.msrb.mxu1 %v4437_v9  ;;  %v4589_v8 = vor.u32 %v6019_v2, %v4588_v1  ;;  %v4156_v9 = vld [vmem:[#allocation8 + $0x738] sm:$0xf]  ;;  %v4358_v2 = vld [vmem:[#allocation8 + $0x8f0] sm:$0xf0]  ;;  %v5906_v54 = vld [vmem:[#allocation8 + $0x744] sm:$0xf] }
  0xfc   :  { %2012 = vmatpush.bf16.msrb.mxu2 %v4057_v14  ;;  %2025 = vmatpush.bf16.msrb.mxu3 %v4441_v15  ;;  %v4540_v14 = vld [vmem:[#allocation8 + $0xa38] sm:$0xf]  ;;  %v6007_v15 = vld [vmem:[#allocation8 + $0xa64] sm:$0xf0]  ;;  %v4157_v21 = vor.u32 %v5911_v10, %v4156_v9  ;;  %v4308_v9 = vld [vmem:[#allocation8 + $0x860] sm:$0xf] }
  0xfd   :  { %v4541_v22 = vor.u32 %v6007_v15, %v4540_v14  ;;  %v5948_v10 = vld [vmem:[#allocation8 + $0x88c] sm:$0xf0]  ;;  %v4692_v14 = vld [vmem:[#allocation8 + $0xb60] sm:$0xf]  ;;  %v4166_v55 = vld [vmem:[#allocation8 + $0x770] sm:$0xf0] }
  0xfe   :  { %v6044_v15 = vld [vmem:[#allocation8 + $0xb8c] sm:$0xf0]  ;;  %v6002_v29 = vld [vmem:[#allocation8 + $0xa44] sm:$0xf]  ;;  %v4550_v56 = vld [vmem:[#allocation8 + $0xa70] sm:$0xf0] }
  0xff   :  { %1987 = vmatpush.bf16.msrb.mxu0 %v4005_v26  ;;  %2000 = vmatpush.bf16.msrb.mxu1 %v4389_v27  ;;  %v4545_v26 = vor.u32 %v6001_v19, %v4542_v20  ;;  %v4492_v27 = vld [vmem:[#allocation8 + $0x9d8] sm:$0xf]  ;;  %v6038_v19 = vld [vmem:[#allocation8 + $0xb64] sm:$0xf]  ;;  %v4694_v20 = vld [vmem:[#allocation8 + $0xb90] sm:$0xf0] }
 0x100   :  { %2013 = vmatpush.bf16.msrb.mxu2 %v4009_v33  ;;  %2026 = vmatpush.bf16.msrb.mxu3 %v4393_v34  ;;  %v5989_v33 = vld [vmem:[#allocation8 + $0x9dc] sm:$0xf]  ;;  %v4494_v34 = vld [vmem:[#allocation8 + $0xa08] sm:$0xf0] }
 0x102   :  { %1988 = vmatmul.bf16.vlgmr.msrb.gmra.mxu0 %v6494_v57  ;;  %2001 = vmatmul.bf16.vlgmr.msrb.gmra.mxu1 %v6496_v62 }
 0x103   :  { %2032 = vmatpush.bf16.msra.mxu0 %v4349_v35  ;;  %2045 = vmatpush.bf16.msra.mxu1 %v4733_v36  ;;  %v4109_v35 = vor.u32 %v5899_v24, %v4108_v23  ;;  %v4493_v36 = vor.u32 %v5995_v28, %v4492_v27  ;;  %v4260_v23 = vld [vmem:[#allocation8 + $0x800] sm:$0xf]  ;;  %v5936_v24 = vld [vmem:[#allocation8 + $0x82c] sm:$0xf0] }
 0x104   :  { %2058 = vmatpush.bf16.msra.mxu2 %v4353_v39  ;;  %2071 = vmatpush.bf16.msra.mxu3 %v4737_v40  ;;  %v4113_v39 = vor.u32 %v5893_v31, %v4110_v32  ;;  %v4497_v40 = vor.u32 %v5989_v33, %v4494_v34  ;;  %v4644_v27 = vld [vmem:[#allocation8 + $0xb00] sm:$0xf]  ;;  %v6032_v28 = vld [vmem:[#allocation8 + $0xb2c] sm:$0xf0]  ;;  %v5930_v31 = vld [vmem:[#allocation8 + $0x804] sm:$0xf] }
 0x105   :  { %2014 = vmatmul.bf16.vlgmr.msrb.gmra.mxu2 %v6494_v57  ;;  %2027 = vmatmul.bf16.vlgmr.msrb.gmra.mxu3 %v6496_v62  ;;  %v4262_v32 = vld [vmem:[#allocation8 + $0x830] sm:$0xf0]  ;;  %v6026_v33 = vld [vmem:[#allocation8 + $0xb04] sm:$0xf] }
 0x106   :  { %v4646_v34 = vld [vmem:[#allocation8 + $0xb30] sm:$0xf0] }
 0x107   :  { %2033 = vmatpush.bf16.msra.mxu0 %v4301_v47  ;;  %2046 = vmatpush.bf16.msra.mxu1 %v4685_v48  ;;  %v4012_v47 = vld [vmem:[#allocation8 + $0x618] sm:$0xf]  ;;  %v4061_v48 = vor.u32 %v5887_v38, %v4060_v37  ;;  %v4212_v37 = vld [vmem:[#allocation8 + $0x7a0] sm:$0xf]  ;;  %v5924_v38 = vld [vmem:[#allocation8 + $0x7cc] sm:$0xf0] }
 0x108   :  { %2059 = vmatpush.bf16.msra.mxu2 %v4305_v50  ;;  %2072 = vmatpush.bf16.msra.mxu3 %v4689_v51  ;;  %v4396_v50 = vld [vmem:[#allocation8 + $0x918] sm:$0xf]  ;;  %v5971_v51 = vld [vmem:[#allocation8 + $0x944] sm:$0xf0] }
 0x109   :  { %v4397_v1 = vor.u32 %v5971_v51, %v4396_v50  ;;  %v4217_v50 = vor.u32 %v5918_v43, %v4214_v44  ;;  %v4601_v51 = vor.u32 %v6014_v45, %v4598_v46  ;;  %v6051_v43 = vld [vmem:[#allocation8 + $0xbcc] sm:$0xf]  ;;  %v4750_v44 = vld [vmem:[#allocation8 + $0xbf8] sm:$0xf0] }
 0x10b   :  { %2034 = vmatpush.bf16.msra.mxu0 %v4253_v58  ;;  %2047 = vmatpush.bf16.msra.mxu1 %v4637_v59  ;;  %v4356_v58 = vld [vmem:[#allocation8 + $0x8c0] sm:$0xf]  ;;  %v5960_v59 = vld [vmem:[#allocation8 + $0x8ec] sm:$0xf0] }
 0x10c   :  { %2060 = vmatpush.bf16.msra.mxu2 %v4257_v63  ;;  %2073 = vmatpush.bf16.msra.mxu3 %v4641_v0  ;;  %v5954_v63 = vld [vmem:[#allocation8 + $0x8c4] sm:$0xf]  ;;  %v4013_v0 = vor.u32 %v5875_v30, %v4012_v47  ;;  %v4213_v47 = vor.u32 %v5924_v38, %v4212_v37  ;;  %v5912_v30 = vld [vmem:[#allocation8 + $0x76c] sm:$0xf0]  ;;  %v4748_v37 = vld [vmem:[#allocation8 + $0xbc8] sm:$0xf] }
 0x10d   :  { %v6057_v38 = vld [vmem:[#allocation8 + $0xbf4] sm:$0xf0] }
 0x10f   :  { %2035 = vmatpush.bf16.msra.mxu0 %v4205_v7  ;;  %2048 = vmatpush.bf16.msra.mxu1 %v4589_v8  ;;  %v4357_v7 = vor.u32 %v5960_v59, %v4356_v58  ;;  %v4741_v8 = vor.u32 %v6056_v61, %v4740_v60  ;;  %v4116_v60 = vld [vmem:[#allocation8 + $0x6e0] sm:$0xf]  ;;  %v5900_v61 = vld [vmem:[#allocation8 + $0x70c] sm:$0xf0] }
 0x110   :  { %2061 = vmatpush.bf16.msra.mxu2 %v4209_v11  ;;  %2074 = vmatpush.bf16.msra.mxu3 %v4593_v13  ;;  %v4361_v11 = vor.u32 %v5954_v63, %v4358_v2  ;;  %v4745_v13 = vor.u32 %v6050_v3, %v4742_v4  ;;  %v4169_v63 = vor.u32 %v5906_v54, %v4166_v55  ;;  %v5996_v2 = vld [vmem:[#allocation8 + $0xa0c] sm:$0xf0]  ;;  %v5894_v3 = vld [vmem:[#allocation8 + $0x6e4] sm:$0xf]  ;;  %v4118_v4 = vld [vmem:[#allocation8 + $0x710] sm:$0xf0] }
 0x111   :  { %v5943_v54 = vld [vmem:[#allocation8 + $0x86c] sm:$0xf]  ;;  %v4318_v55 = vld [vmem:[#allocation8 + $0x898] sm:$0xf0] }
 0x113   :  { %2036 = vmatpush.bf16.msra.mxu0 %v4157_v21  ;;  %2049 = vmatpush.bf16.msra.mxu1 %v4541_v22  ;;  %v4309_v21 = vor.u32 %v5948_v10, %v4308_v9  ;;  %v4693_v22 = vor.u32 %v6044_v15, %v4692_v14  ;;  %v4068_v9 = vld [vmem:[#allocation8 + $0x680] sm:$0xf]  ;;  %v5888_v10 = vld [vmem:[#allocation8 + $0x6ac] sm:$0xf0] }
 0x114   :  { %2062 = vmatpush.bf16.msra.mxu2 %v4161_v25  ;;  %2075 = vmatpush.bf16.msra.mxu3 %v4545_v26  ;;  %v4313_v25 = vor.u32 %v5942_v17, %v4310_v18  ;;  %v4697_v26 = vor.u32 %v6038_v19, %v4694_v20  ;;  %v4452_v14 = vld [vmem:[#allocation8 + $0x980] sm:$0xf]  ;;  %v5984_v15 = vld [vmem:[#allocation8 + $0x9ac] sm:$0xf0]  ;;  %v5882_v17 = vld [vmem:[#allocation8 + $0x684] sm:$0xf] }
 0x115   :  { %v4070_v18 = vld [vmem:[#allocation8 + $0x6b0] sm:$0xf0]  ;;  %v5978_v19 = vld [vmem:[#allocation8 + $0x984] sm:$0xf] }
 0x116   :  { %v4454_v20 = vld [vmem:[#allocation8 + $0x9b0] sm:$0xf0] }
 0x117   :  { %2037 = vmatpush.bf16.msra.mxu0 %v4109_v35  ;;  %2050 = vmatpush.bf16.msra.mxu1 %v4493_v36  ;;  %v4261_v35 = vor.u32 %v5936_v24, %v4260_v23  ;;  %v4645_v36 = vor.u32 %v6032_v28, %v4644_v27  ;;  %v4453_v23 = vor.u32 %v5984_v15, %v4452_v14  ;;  %v5876_v24 = vld [vmem:[#allocation8 + $0x64c] sm:$0xf0]  ;;  %v4604_v14 = vld [vmem:[#allocation8 + $0xaa8] sm:$0xf]  ;;  %v6021_v15 = vld [vmem:[#allocation8 + $0xad4] sm:$0xf0] }
 0x118   :  { %2063 = vmatpush.bf16.msra.mxu2 %v4113_v39  ;;  %2076 = vmatpush.bf16.msra.mxu3 %v4497_v40  ;;  %v4265_v39 = vor.u32 %v5930_v31, %v4262_v32  ;;  %v4649_v40 = vor.u32 %v6026_v33, %v4646_v34  ;;  %v4073_v27 = vor.u32 %v5882_v17, %v4070_v18  ;;  %v5870_v31 = vld [vmem:[#allocation8 + $0x624] sm:$0xf]  ;;  %v4022_v32 = vld [vmem:[#allocation8 + $0x650] sm:$0xf0]  ;;  %v5919_v17 = vld [vmem:[#allocation8 + $0x7ac] sm:$0xf] }
 0x119   :  { %v4457_v28 = vor.u32 %v5978_v19, %v4454_v20  ;;  %v5966_v33 = vld [vmem:[#allocation8 + $0x924] sm:$0xf]  ;;  %v4406_v34 = vld [vmem:[#allocation8 + $0x950] sm:$0xf0]  ;;  %v4025_v45 = vor.u32 %v5870_v31, %v4022_v32  ;;  %v4222_v18 = vld [vmem:[#allocation8 + $0x7d8] sm:$0xf0] }
 0x11a   :  { %v4409_v46 = vor.u32 %v5966_v33, %v4406_v34  ;;  %v6015_v19 = vld [vmem:[#allocation8 + $0xaac] sm:$0xf]  ;;  %v4606_v20 = vld [vmem:[#allocation8 + $0xad8] sm:$0xf0] }
 0x11b   :  { %2038 = vmatpush.bf16.msra.mxu0 %v4061_v48  ;;  %2051 = vmatpush.bf16.msra.mxu1 %v4445_v49  ;;  %v4597_v48 = vor.u32 %v6020_v42, %v4596_v41  ;;  %v4164_v49 = vld [vmem:[#allocation8 + $0x740] sm:$0xf]  ;;  %v4366_v42 = vld [vmem:[#allocation8 + $0x8f8] sm:$0xf0]  ;;  %v5907_v31 = vld [vmem:[#allocation8 + $0x74c] sm:$0xf] }
 0x11c   :  { %2064 = vmatpush.bf16.msra.mxu2 %v4065_v52  ;;  %2077 = vmatpush.bf16.msra.mxu3 %v4449_v53  ;;  %v4548_v52 = vld [vmem:[#allocation8 + $0xa40] sm:$0xf]  ;;  %v6008_v53 = vld [vmem:[#allocation8 + $0xa6c] sm:$0xf0]  ;;  %v4165_v58 = vor.u32 %v5912_v30, %v4164_v49  ;;  %v4316_v49 = vld [vmem:[#allocation8 + $0x868] sm:$0xf] }
 0x11d   :  { %v4549_v59 = vor.u32 %v6008_v53, %v4548_v52  ;;  %v5949_v30 = vld [vmem:[#allocation8 + $0x894] sm:$0xf0]  ;;  %v4700_v52 = vld [vmem:[#allocation8 + $0xb68] sm:$0xf]  ;;  %v4174_v32 = vld [vmem:[#allocation8 + $0x778] sm:$0xf0] }
 0x11e   :  { %v6045_v53 = vld [vmem:[#allocation8 + $0xb94] sm:$0xf0]  ;;  %v6003_v33 = vld [vmem:[#allocation8 + $0xa4c] sm:$0xf]  ;;  %v4558_v34 = vld [vmem:[#allocation8 + $0xa78] sm:$0xf0] }
 0x11f   :  { %2039 = vmatpush.bf16.msra.mxu0 %v4013_v0  ;;  %2052 = vmatpush.bf16.msra.mxu1 %v4397_v1  ;;  %v4553_v0 = vor.u32 %v6002_v29, %v4550_v56  ;;  %v4500_v1 = vld [vmem:[#allocation8 + $0x9e0] sm:$0xf]  ;;  %v6039_v29 = vld [vmem:[#allocation8 + $0xb6c] sm:$0xf]  ;;  %v4702_v56 = vld [vmem:[#allocation8 + $0xb98] sm:$0xf0] }
 0x120   :  { %2065 = vmatpush.bf16.msra.mxu2 %v4017_v5  ;;  %2078 = vmatpush.bf16.msra.mxu3 %v4401_v6  ;;  %v5990_v5 = vld [vmem:[#allocation8 + $0x9e4] sm:$0xf]  ;;  %v4502_v6 = vld [vmem:[#allocation8 + $0xa10] sm:$0xf0] }
 0x122   :  { %2040 = vmatmul.bf16.vlgmr.msra.gmra.mxu0 %v6494_v57  ;;  %2053 = vmatmul.bf16.vlgmr.msra.gmra.mxu1 %v6496_v62 }
 0x123   :  { %2084 = vmatpush.bf16.msrb.mxu0 %v4357_v7  ;;  %2097 = vmatpush.bf16.msrb.mxu1 %v4741_v8  ;;  %v4117_v7 = vor.u32 %v5900_v61, %v4116_v60  ;;  %v4501_v8 = vor.u32 %v5996_v2, %v4500_v1  ;;  %v4268_v60 = vld [vmem:[#allocation8 + $0x808] sm:$0xf]  ;;  %v5937_v61 = vld [vmem:[#allocation8 + $0x834] sm:$0xf0] }
 0x124   :  { %2110 = vmatpush.bf16.msrb.mxu2 %v4361_v11  ;;  %2123 = vmatpush.bf16.msrb.mxu3 %v4745_v13  ;;  %v4121_v11 = vor.u32 %v5894_v3, %v4118_v4  ;;  %v4505_v13 = vor.u32 %v5990_v5, %v4502_v6  ;;  %v4652_v1 = vld [vmem:[#allocation8 + $0xb08] sm:$0xf]  ;;  %v6033_v2 = vld [vmem:[#allocation8 + $0xb34] sm:$0xf0]  ;;  %v5931_v3 = vld [vmem:[#allocation8 + $0x80c] sm:$0xf] }
 0x125   :  { %2066 = vmatmul.bf16.vlgmr.msra.gmra.mxu2 %v6494_v57  ;;  %2079 = vmatmul.bf16.vlgmr.msra.gmra.mxu3 %v6496_v62  ;;  %v4270_v4 = vld [vmem:[#allocation8 + $0x838] sm:$0xf0]  ;;  %v6027_v5 = vld [vmem:[#allocation8 + $0xb0c] sm:$0xf] }
 0x126   :  { %v4654_v6 = vld [vmem:[#allocation8 + $0xb38] sm:$0xf0] }
 0x127   :  { %2085 = vmatpush.bf16.msrb.mxu0 %v4309_v21  ;;  %2098 = vmatpush.bf16.msrb.mxu1 %v4693_v22  ;;  %v4020_v21 = vld [vmem:[#allocation8 + $0x620] sm:$0xf]  ;;  %v4069_v22 = vor.u32 %v5888_v10, %v4068_v9  ;;  %v4220_v9 = vld [vmem:[#allocation8 + $0x7a8] sm:$0xf]  ;;  %v5925_v10 = vld [vmem:[#allocation8 + $0x7d4] sm:$0xf0] }
 0x128   :  { %2111 = vmatpush.bf16.msrb.mxu2 %v4313_v25  ;;  %2124 = vmatpush.bf16.msrb.mxu3 %v4697_v26  ;;  %v4404_v25 = vld [vmem:[#allocation8 + $0x920] sm:$0xf]  ;;  %v5972_v26 = vld [vmem:[#allocation8 + $0x94c] sm:$0xf0] }
 0x129   :  { %v4405_v41 = vor.u32 %v5972_v26, %v4404_v25  ;;  %v4225_v25 = vor.u32 %v5919_v17, %v4222_v18  ;;  %v4609_v26 = vor.u32 %v6015_v19, %v4606_v20  ;;  %v5854_v17 = vld [vmem:[#allocation8 + $0x5a4] sm:$0xf]  ;;  %v5478_v18 = vld [vmem:[#allocation8 + $0x5d0] sm:$0xf0] }
 0x12b   :  { %2086 = vmatpush.bf16.msrb.mxu0 %v4261_v35  ;;  %2099 = vmatpush.bf16.msrb.mxu1 %v4645_v36  ;;  %v4364_v35 = vld [vmem:[#allocation8 + $0x8c8] sm:$0xf]  ;;  %v5961_v36 = vld [vmem:[#allocation8 + $0x8f4] sm:$0xf0] }
 0x12c   :  { %2112 = vmatpush.bf16.msrb.mxu2 %v4265_v39  ;;  %2125 = vmatpush.bf16.msrb.mxu3 %v4649_v40  ;;  %v5955_v39 = vld [vmem:[#allocation8 + $0x8cc] sm:$0xf]  ;;  %v4021_v40 = vor.u32 %v5876_v24, %v4020_v21  ;;  %v4221_v21 = vor.u32 %v5925_v10, %v4220_v9  ;;  %v5913_v24 = vld [vmem:[#allocation8 + $0x774] sm:$0xf0]  ;;  %v5476_v9 = vld [vmem:[#allocation8 + $0x5a0] sm:$0xf] }
 0x12d   :  { %v5860_v10 = vld [vmem:[#allocation8 + $0x5cc] sm:$0xf0] }
 0x12f   :  { %2087 = vmatpush.bf16.msrb.mxu0 %v4213_v47  ;;  %2100 = vmatpush.bf16.msrb.mxu1 %v4597_v48  ;;  %v4365_v47 = vor.u32 %v5961_v36, %v4364_v35  ;;  %v4749_v48 = vor.u32 %v6057_v38, %v4748_v37  ;;  %v4124_v37 = vld [vmem:[#allocation8 + $0x6e8] sm:$0xf]  ;;  %v5901_v38 = vld [vmem:[#allocation8 + $0x714] sm:$0xf0] }
 0x130   :  { %2113 = vmatpush.bf16.msrb.mxu2 %v4217_v50  ;;  %2126 = vmatpush.bf16.msrb.mxu3 %v4601_v51  ;;  %v4369_v50 = vor.u32 %v5955_v39, %v4366_v42  ;;  %v4753_v51 = vor.u32 %v6051_v43, %v4750_v44  ;;  %v4177_v39 = vor.u32 %v5907_v31, %v4174_v32  ;;  %v5997_v42 = vld [vmem:[#allocation8 + $0xa14] sm:$0xf0]  ;;  %v5895_v43 = vld [vmem:[#allocation8 + $0x6ec] sm:$0xf]  ;;  %v4126_v44 = vld [vmem:[#allocation8 + $0x718] sm:$0xf0] }
 0x131   :  { %v5746_v31 = vld [vmem:[#allocation8 + $0x244] sm:$0xf]  ;;  %v5046_v32 = vld [vmem:[#allocation8 + $0x270] sm:$0xf0] }
 0x133   :  { %2088 = vmatpush.bf16.msrb.mxu0 %v4165_v58  ;;  %2101 = vmatpush.bf16.msrb.mxu1 %v4549_v59  ;;  %v4317_v58 = vor.u32 %v5949_v30, %v4316_v49  ;;  %v4701_v59 = vor.u32 %v6045_v53, %v4700_v52  ;;  %v4076_v49 = vld [vmem:[#allocation8 + $0x688] sm:$0xf]  ;;  %v5889_v30 = vld [vmem:[#allocation8 + $0x6b4] sm:$0xf0] }
 0x134   :  { %2114 = vmatpush.bf16.msrb.mxu2 %v4169_v63  ;;  %2127 = vmatpush.bf16.msrb.mxu3 %v4553_v0  ;;  %v4321_v63 = vor.u32 %v5943_v54, %v4318_v55  ;;  %v4705_v0 = vor.u32 %v6039_v29, %v4702_v56  ;;  %v4460_v52 = vld [vmem:[#allocation8 + $0x988] sm:$0xf]  ;;  %v5985_v53 = vld [vmem:[#allocation8 + $0x9b4] sm:$0xf0]  ;;  %v5883_v54 = vld [vmem:[#allocation8 + $0x68c] sm:$0xf] }
 0x135   :  { %v4078_v55 = vld [vmem:[#allocation8 + $0x6b8] sm:$0xf0]  ;;  %v5979_v29 = vld [vmem:[#allocation8 + $0x98c] sm:$0xf] }
 0x136   :  { %v4462_v56 = vld [vmem:[#allocation8 + $0x9b8] sm:$0xf0] }
 0x137   :  { %2089 = vmatpush.bf16.msrb.mxu0 %v4117_v7  ;;  %2102 = vmatpush.bf16.msrb.mxu1 %v4501_v8  ;;  %v4269_v7 = vor.u32 %v5937_v61, %v4268_v60  ;;  %v4653_v8 = vor.u32 %v6033_v2, %v4652_v1  ;;  %v4461_v60 = vor.u32 %v5985_v53, %v4460_v52  ;;  %v5877_v61 = vld [vmem:[#allocation8 + $0x654] sm:$0xf0] }
 0x138   :  { %2115 = vmatpush.bf16.msrb.mxu2 %v4121_v11  ;;  %2128 = vmatpush.bf16.msrb.mxu3 %v4505_v13  ;;  %v4273_v11 = vor.u32 %v5931_v3, %v4270_v4  ;;  %v4657_v13 = vor.u32 %v6027_v5, %v4654_v6  ;;  %v4081_v1 = vor.u32 %v5883_v54, %v4078_v55  ;;  %v5871_v3 = vld [vmem:[#allocation8 + $0x62c] sm:$0xf]  ;;  %v4030_v4 = vld [vmem:[#allocation8 + $0x658] sm:$0xf0]  ;;  %v5332_v55 = vld [vmem:[#allocation8 + $0x480] sm:$0xf] }
 0x139   :  { %v4465_v2 = vor.u32 %v5979_v29, %v4462_v56  ;;  %v5967_v5 = vld [vmem:[#allocation8 + $0x92c] sm:$0xf]  ;;  %v4414_v6 = vld [vmem:[#allocation8 + $0x958] sm:$0xf0]  ;;  %v4033_v19 = vor.u32 %v5871_v3, %v4030_v4  ;;  %v5824_v29 = vld [vmem:[#allocation8 + $0x4ac] sm:$0xf0] }
 0x13a   :  { %v4417_v20 = vor.u32 %v5967_v5, %v4414_v6  ;;  %v5722_v56 = vld [vmem:[#allocation8 + $0x184] sm:$0xf]  ;;  %v5284_v3 = vld [vmem:[#allocation8 + $0x420] sm:$0xf]  ;;  %v5812_v4 = vld [vmem:[#allocation8 + $0x44c] sm:$0xf0] }
 0x13b   :  { %2090 = vmatpush.bf16.msrb.mxu0 %v4069_v22  ;;  %2103 = vmatpush.bf16.msrb.mxu1 %v4453_v23  ;;  %v4605_v22 = vor.u32 %v6021_v15, %v4604_v14  ;;  %v4172_v23 = vld [vmem:[#allocation8 + $0x748] sm:$0xf]  ;;  %v5094_v15 = vld [vmem:[#allocation8 + $0x2d0] sm:$0xf0]  ;;  %v5710_v5 = vld [vmem:[#allocation8 + $0x124] sm:$0xf] }
 0x13c   :  { %2116 = vmatpush.bf16.msrb.mxu2 %v4073_v27  ;;  %2129 = vmatpush.bf16.msrb.mxu3 %v4457_v28  ;;  %v4556_v27 = vld [vmem:[#allocation8 + $0xa48] sm:$0xf]  ;;  %v6009_v28 = vld [vmem:[#allocation8 + $0xa74] sm:$0xf0]  ;;  %v4173_v35 = vor.u32 %v5913_v24, %v4172_v23  ;;  %v5044_v23 = vld [vmem:[#allocation8 + $0x240] sm:$0xf] }
 0x13d   :  { %v4557_v36 = vor.u32 %v6009_v28, %v4556_v27  ;;  %v5752_v24 = vld [vmem:[#allocation8 + $0x26c] sm:$0xf0]  ;;  %v5428_v27 = vld [vmem:[#allocation8 + $0x540] sm:$0xf] }
 0x13e   :  { %v5848_v28 = vld [vmem:[#allocation8 + $0x56c] sm:$0xf0] }
 0x13f   :  { %2091 = vmatpush.bf16.msrb.mxu0 %v4021_v40  ;;  %2104 = vmatpush.bf16.msrb.mxu1 %v4405_v41  ;;  %v4561_v40 = vor.u32 %v6003_v33, %v4558_v34  ;;  %v4508_v41 = vld [vmem:[#allocation8 + $0x9e8] sm:$0xf]  ;;  %v5842_v33 = vld [vmem:[#allocation8 + $0x544] sm:$0xf]  ;;  %v5430_v34 = vld [vmem:[#allocation8 + $0x570] sm:$0xf0] }
 0x140   :  { %2117 = vmatpush.bf16.msrb.mxu2 %v4025_v45  ;;  %2130 = vmatpush.bf16.msrb.mxu3 %v4409_v46  ;;  %v5991_v45 = vld [vmem:[#allocation8 + $0x9ec] sm:$0xf]  ;;  %v4510_v46 = vld [vmem:[#allocation8 + $0xa18] sm:$0xf0] }
 0x142   :  { %2092 = vmatmul.bf16.vlgmr.msrb.gmra.mxu0 %v6494_v57  ;;  %2105 = vmatmul.bf16.vlgmr.msrb.gmra.mxu1 %v6496_v62 }
 0x143   :  { %2136 = vmatpush.bf16.msra.mxu0 %v4365_v47  ;;  %2149 = vmatpush.bf16.msra.mxu1 %v4749_v48  ;;  %v4125_v47 = vor.u32 %v5901_v38, %v4124_v37  ;;  %v4509_v48 = vor.u32 %v5997_v42, %v4508_v41  ;;  %v4996_v37 = vld [vmem:[#allocation8 + $0x1e0] sm:$0xf]  ;;  %v5740_v38 = vld [vmem:[#allocation8 + $0x20c] sm:$0xf0] }
 0x144   :  { %2162 = vmatpush.bf16.msra.mxu2 %v4369_v50  ;;  %2175 = vmatpush.bf16.msra.mxu3 %v4753_v51  ;;  %v4129_v50 = vor.u32 %v5895_v43, %v4126_v44  ;;  %v4513_v51 = vor.u32 %v5991_v45, %v4510_v46  ;;  %v5380_v41 = vld [vmem:[#allocation8 + $0x4e0] sm:$0xf]  ;;  %v5836_v42 = vld [vmem:[#allocation8 + $0x50c] sm:$0xf0]  ;;  %v5734_v43 = vld [vmem:[#allocation8 + $0x1e4] sm:$0xf] }
 0x145   :  { %2118 = vmatmul.bf16.vlgmr.msrb.gmra.mxu2 %v6494_v57  ;;  %2131 = vmatmul.bf16.vlgmr.msrb.gmra.mxu3 %v6496_v62  ;;  %v4998_v44 = vld [vmem:[#allocation8 + $0x210] sm:$0xf0]  ;;  %v5830_v45 = vld [vmem:[#allocation8 + $0x4e4] sm:$0xf] }
 0x146   :  { %v5382_v46 = vld [vmem:[#allocation8 + $0x510] sm:$0xf0]  ;;  %v5001_v52 = vor.u32 %v5734_v43, %v4998_v44  ;;  %v4756_v44 = vld [vmem:[#allocation8] sm:$0xf] }
 0x147   :  { %2137 = vmatpush.bf16.msra.mxu0 %v4317_v58  ;;  %2150 = vmatpush.bf16.msra.mxu1 %v4701_v59  ;;  %v4028_v58 = vld [vmem:[#allocation8 + $0x628] sm:$0xf]  ;;  %v4077_v59 = vor.u32 %v5889_v30, %v4076_v49  ;;  %v5381_v49 = vor.u32 %v5836_v42, %v5380_v41  ;;  %v5385_v53 = vor.u32 %v5830_v45, %v5382_v46  ;;  %v5782_v41 = vld [vmem:[#allocation8 + $0x364] sm:$0xf]  ;;  %v5190_v42 = vld [vmem:[#allocation8 + $0x390] sm:$0xf0] }
 0x148   :  { %2163 = vmatpush.bf16.msra.mxu2 %v4321_v63  ;;  %2176 = vmatpush.bf16.msra.mxu3 %v4705_v0  ;;  %v4412_v63 = vld [vmem:[#allocation8 + $0x928] sm:$0xf]  ;;  %v5973_v0 = vld [vmem:[#allocation8 + $0x954] sm:$0xf0] }
 0x149   :  { %v4413_v14 = vor.u32 %v5973_v0, %v4412_v63  ;;  %v5716_v63 = vld [vmem:[#allocation8 + $0x14c] sm:$0xf0] }
 0x14b   :  { %2138 = vmatpush.bf16.msra.mxu0 %v4269_v7  ;;  %2151 = vmatpush.bf16.msra.mxu1 %v4653_v8  ;;  %v5092_v7 = vld [vmem:[#allocation8 + $0x2a0] sm:$0xf]  ;;  %v5764_v8 = vld [vmem:[#allocation8 + $0x2cc] sm:$0xf0] }
 0x14c   :  { %2164 = vmatpush.bf16.msra.mxu2 %v4273_v11  ;;  %2177 = vmatpush.bf16.msra.mxu3 %v4657_v13  ;;  %v5758_v11 = vld [vmem:[#allocation8 + $0x2a4] sm:$0xf]  ;;  %v4029_v13 = vor.u32 %v5877_v61, %v4028_v58  ;;  %v4900_v61 = vld [vmem:[#allocation8 + $0x120] sm:$0xf] }
 0x14d   :  { %v5818_v58 = vld [vmem:[#allocation8 + $0x484] sm:$0xf] }
 0x14f   :  { %2139 = vmatpush.bf16.msra.mxu0 %v4221_v21  ;;  %2152 = vmatpush.bf16.msra.mxu1 %v4605_v22  ;;  %v5093_v21 = vor.u32 %v5764_v8, %v5092_v7  ;;  %v5477_v22 = vor.u32 %v5860_v10, %v5476_v9  ;;  %v4902_v7 = vld [vmem:[#allocation8 + $0x150] sm:$0xf0]  ;;  %v5806_v8 = vld [vmem:[#allocation8 + $0x424] sm:$0xf] }
 0x150   :  { %2165 = vmatpush.bf16.msra.mxu2 %v4225_v25  ;;  %2178 = vmatpush.bf16.msra.mxu3 %v4609_v26  ;;  %v5097_v25 = vor.u32 %v5758_v11, %v5094_v15  ;;  %v5481_v26 = vor.u32 %v5854_v17, %v5478_v18  ;;  %v5286_v9 = vld [vmem:[#allocation8 + $0x450] sm:$0xf0]  ;;  %v4852_v17 = vld [vmem:[#allocation8 + $0xc0] sm:$0xf]  ;;  %v5704_v18 = vld [vmem:[#allocation8 + $0xec] sm:$0xf0] }
 0x153   :  { %2140 = vmatpush.bf16.msra.mxu0 %v4173_v35  ;;  %2153 = vmatpush.bf16.msra.mxu1 %v4557_v36  ;;  %v5045_v35 = vor.u32 %v5752_v24, %v5044_v23  ;;  %v5429_v36 = vor.u32 %v5848_v28, %v5428_v27  ;;  %v5698_v23 = vld [vmem:[#allocation8 + $0xc4] sm:$0xf]  ;;  %v4854_v24 = vld [vmem:[#allocation8 + $0xf0] sm:$0xf0]  ;;  %v4853_v27 = vor.u32 %v5704_v18, %v4852_v17  ;;  %v5436_v18 = vld [vmem:[#allocation8 + $0x548] sm:$0xf] }
 0x154   :  { %2166 = vmatpush.bf16.msra.mxu2 %v4177_v39  ;;  %2179 = vmatpush.bf16.msra.mxu3 %v4561_v40  ;;  %v5049_v39 = vor.u32 %v5746_v31, %v5046_v32  ;;  %v5433_v40 = vor.u32 %v5842_v33, %v5430_v34  ;;  %v4804_v31 = vld [vmem:[#allocation8 + $0x60] sm:$0xf]  ;;  %v5692_v32 = vld [vmem:[#allocation8 + $0x8c] sm:$0xf0]  ;;  %v4857_v33 = vor.u32 %v5698_v23, %v4854_v24  ;;  %v5843_v23 = vld [vmem:[#allocation8 + $0x54c] sm:$0xf] }
 0x155   :  { %v4805_v45 = vor.u32 %v5692_v32, %v4804_v31  ;;  %v5438_v24 = vld [vmem:[#allocation8 + $0x578] sm:$0xf0]  ;;  %v5004_v31 = vld [vmem:[#allocation8 + $0x1e8] sm:$0xf]  ;;  %v5741_v32 = vld [vmem:[#allocation8 + $0x214] sm:$0xf0] }
 0x157   :  { %2141 = vmatpush.bf16.msra.mxu0 %v4125_v47  ;;  %2154 = vmatpush.bf16.msra.mxu1 %v4509_v48  ;;  %v4997_v48 = vor.u32 %v5740_v38, %v4996_v37  ;;  %v5788_v37 = vld [vmem:[#allocation8 + $0x38c] sm:$0xf0]  ;;  %v5686_v38 = vld [vmem:[#allocation8 + $0x64] sm:$0xf] }
 0x158   :  { %2167 = vmatpush.bf16.msra.mxu2 %v4129_v50  ;;  %2180 = vmatpush.bf16.msra.mxu3 %v4513_v51  ;;  %v4948_v50 = vld [vmem:[#allocation8 + $0x180] sm:$0xf]  ;;  %v5728_v51 = vld [vmem:[#allocation8 + $0x1ac] sm:$0xf0] }
 0x15b   :  { %2142 = vmatpush.bf16.msra.mxu0 %v4077_v59  ;;  %2155 = vmatpush.bf16.msra.mxu1 %v4461_v60  ;;  %v4949_v59 = vor.u32 %v5728_v51, %v4948_v50  ;;  %v5333_v60 = vor.u32 %v5824_v29, %v5332_v55  ;;  %v5193_v51 = vor.u32 %v5782_v41, %v5190_v42  ;;  %v4758_v55 = vld [vmem:[#allocation8 + $0x30] sm:$0xf0]  ;;  %v5770_v29 = vld [vmem:[#allocation8 + $0x304] sm:$0xf] }
 0x15c   :  { %2168 = vmatpush.bf16.msra.mxu2 %v4081_v1  ;;  %2181 = vmatpush.bf16.msra.mxu3 %v4465_v2 }
 0x15e   :  { %v1885_v47 = vpop.f32.mrf.mxu0 }
 0x15f   :  { %2143 = vmatpush.bf16.msra.mxu0 %v4029_v13  ;;  %2156 = vmatpush.bf16.msra.mxu1 %v4413_v14  ;;  %v1898_v30 = vpop.f32.mrf.mxu1  ;;  %v4901_v13 = vor.u32 %v5716_v63, %v4900_v61  ;;  %v5285_v14 = vor.u32 %v5812_v4, %v5284_v3 }
 0x160   :  { %2169 = vmatpush.bf16.msra.mxu2 %v4033_v19  ;;  %2182 = vmatpush.bf16.msra.mxu3 %v4417_v20  ;;  %v6522_v54 = vadd.f32 %v1898_v30, %v1885_v47  ;;  %v4905_v19 = vor.u32 %v5710_v5, %v4902_v7  ;;  %v5289_v20 = vor.u32 %v5806_v8, %v5286_v9  ;;  %v5776_v30 = vld [vmem:[#allocation8 + $0x32c] sm:$0xf0]  ;;  %v5052_v9 = vld [vmem:[#allocation8 + $0x248] sm:$0xf] }
 0x162   :  { %2144 = vmatmul.bf16.vlgmr.msra.gmra.mxu0 %v6494_v57  ;;  %2157 = vmatmul.bf16.vlgmr.msra.gmra.mxu1 %v6496_v62 }
 0x163   :  { %3148 = vmatpush.bf16.msrb.mxu0 %v5093_v21  ;;  %3161 = vmatpush.bf16.msrb.mxu1 %v5477_v22  ;;  %v5236_v21 = vld [vmem:[#allocation8 + $0x3c0] sm:$0xf]  ;;  %v5800_v22 = vld [vmem:[#allocation8 + $0x3ec] sm:$0xf0] }
 0x164   :  { %3174 = vmatpush.bf16.msrb.mxu2 %v5097_v25  ;;  %3187 = vmatpush.bf16.msrb.mxu3 %v5481_v26  ;;  %v1911_v2 = vpop.f32.mrf.mxu2  ;;  %v5794_v25 = vld [vmem:[#allocation8 + $0x3c4] sm:$0xf]  ;;  %v5238_v26 = vld [vmem:[#allocation8 + $0x3f0] sm:$0xf0]  ;;  %v5237_v28 = vor.u32 %v5800_v22, %v5236_v21  ;;  %v5054_v22 = vld [vmem:[#allocation8 + $0x278] sm:$0xf0] }
 0x165   :  { %2170 = vmatmul.bf16.vlgmr.msra.gmra.mxu2 %v6494_v57  ;;  %2183 = vmatmul.bf16.vlgmr.msra.gmra.mxu3 %v6496_v62  ;;  %v4950_v57 = vld [vmem:[#allocation8 + $0x1b0] sm:$0xf0]  ;;  %v1924_v6 = vpop.f32.mrf.mxu3  ;;  %v5241_v34 = vor.u32 %v5794_v25, %v5238_v26  ;;  %v6532_v25 = vpack.c.bf16 %v6490_v12, %v6490_v12  ;;  %v6536_v26 = vpack.c.bf16 %v6492_v16, %v6492_v16  ;;  %v5735_v12 = vld [vmem:[#allocation8 + $0x1ec] sm:$0xf] }
 0x166   :  { %v5334_v62 = vld [vmem:[#allocation8 + $0x4b0] sm:$0xf0]  ;;  %v4953_v0 = vor.u32 %v5722_v56, %v4950_v57  ;;  %v6524_v10 = vadd.f32 %v1924_v6, %v1911_v2  ;;  %v1887_v11 = vpop.f32.mrf.mxu0  ;;  %v5100_v57 = vld [vmem:[#allocation8 + $0x2a8] sm:$0xf]  ;;  %v5486_v2 = vld [vmem:[#allocation8 + $0x5d8] sm:$0xf0] }
 0x167   :  { %3149 = vmatpush.bf16.msrb.mxu0 %v5045_v35  ;;  %3162 = vmatpush.bf16.msrb.mxu1 %v5429_v36  ;;  %v5337_v1 = vor.u32 %v5818_v58, %v5334_v62  ;;  %v1900_v15 = vpop.f32.mrf.mxu1  ;;  %v5188_v36 = vld [vmem:[#allocation8 + $0x360] sm:$0xf]  ;;  %v5142_v56 = vld [vmem:[#allocation8 + $0x330] sm:$0xf0]  ;;  %v5765_v58 = vld [vmem:[#allocation8 + $0x2d4] sm:$0xf0] }
 0x168   :  { %3175 = vmatpush.bf16.msrb.mxu2 %v5049_v39  ;;  %3188 = vmatpush.bf16.msrb.mxu3 %v5433_v40  ;;  %v4806_v40 = vld [vmem:[#allocation8 + $0x90] sm:$0xf0]  ;;  %v5189_v46 = vor.u32 %v5788_v37, %v5188_v36  ;;  %v5484_v62 = vld [vmem:[#allocation8 + $0x5a8] sm:$0xf]  ;;  %v5145_v4 = vor.u32 %v5770_v29, %v5142_v56  ;;  %v5101_v6 = vor.u32 %v5765_v58, %v5100_v57  ;;  %v5753_v11 = vld [vmem:[#allocation8 + $0x274] sm:$0xf0] }
 0x169   :  { %v4809_v50 = vor.u32 %v5686_v38, %v4806_v40  ;;  %v5837_v36 = vld [vmem:[#allocation8 + $0x514] sm:$0xf0]  ;;  %v5006_v37 = vld [vmem:[#allocation8 + $0x218] sm:$0xf0]  ;;  %v5831_v16 = vld [vmem:[#allocation8 + $0x4ec] sm:$0xf]  ;;  %v5005_v40 = vor.u32 %v5741_v32, %v5004_v31 }
 0x16a   :  { %v5390_v38 = vld [vmem:[#allocation8 + $0x518] sm:$0xf0]  ;;  %v4908_v58 = vld [vmem:[#allocation8 + $0x128] sm:$0xf]  ;;  %v5693_v32 = vld [vmem:[#allocation8 + $0x94] sm:$0xf0] }
 0x16b   :  { %3150 = vmatpush.bf16.msrb.mxu0 %v4997_v48  ;;  %3163 = vmatpush.bf16.msrb.mxu1 %v5381_v49  ;;  %v5680_v48 = vld [vmem:[#allocation8 + $0x2c] sm:$0xf0]  ;;  %v5140_v49 = vld [vmem:[#allocation8 + $0x300] sm:$0xf]  ;;  %v4812_v31 = vld [vmem:[#allocation8 + $0x68] sm:$0xf] }
 0x16c   :  { %3176 = vmatpush.bf16.msrb.mxu2 %v5001_v52  ;;  %3189 = vmatpush.bf16.msrb.mxu3 %v5385_v53  ;;  %v1913_v35 = vpop.f32.mrf.mxu2  ;;  %v5674_v53 = vld [vmem:[#allocation8 + $0x4] sm:$0xf]  ;;  %v4757_v61 = vor.u32 %v5680_v48, %v4756_v44  ;;  %v5141_v63 = vor.u32 %v5776_v30, %v5140_v49  ;;  %v5729_v44 = vld [vmem:[#allocation8 + $0x1b4] sm:$0xf0]  ;;  %v5723_v49 = vld [vmem:[#allocation8 + $0x18c] sm:$0xf] }
 0x16d   :  { %v1926_v39 = vpop.f32.mrf.mxu3  ;;  %v4761_v3 = vor.u32 %v5674_v53, %v4758_v55  ;;  %v5388_v35 = vld [vmem:[#allocation8 + $0x4e8] sm:$0xf]  ;;  %v5825_v48 = vld [vmem:[#allocation8 + $0x4b4] sm:$0xf0]  ;;  %v4958_v30 = vld [vmem:[#allocation8 + $0x1b8] sm:$0xf0] }
 0x16e   :  { %v1937_v43 = vpop.f32.mrf.mxu0  ;;  %v5389_v41 = vor.u32 %v5837_v36, %v5388_v35  ;;  %v5196_v35 = vld [vmem:[#allocation8 + $0x368] sm:$0xf]  ;;  %v5789_v36 = vld [vmem:[#allocation8 + $0x394] sm:$0xf0] }
 0x16f   :  { %3151 = vmatpush.bf16.msrb.mxu0 %v4949_v59  ;;  %3164 = vmatpush.bf16.msrb.mxu1 %v5333_v60  ;;  %v1950_v47 = vpop.f32.mrf.mxu1  ;;  %v5861_v59 = vld [vmem:[#allocation8 + $0x5d4] sm:$0xf0]  ;;  %v5759_v60 = vld [vmem:[#allocation8 + $0x2ac] sm:$0xf] }
 0x170   :  { %3177 = vmatpush.bf16.msrb.mxu2 %v4953_v0  ;;  %3190 = vmatpush.bf16.msrb.mxu3 %v5337_v1  ;;  %v6526_v52 = vadd.f32 %v1950_v47, %v1937_v43  ;;  %v5102_v0 = vld [vmem:[#allocation8 + $0x2d8] sm:$0xf0]  ;;  %v5855_v1 = vld [vmem:[#allocation8 + $0x5ac] sm:$0xf]  ;;  %v5485_v7 = vor.u32 %v5861_v59, %v5484_v62  ;;  %v4956_v43 = vld [vmem:[#allocation8 + $0x188] sm:$0xf]  ;;  %v4961_v59 = vor.u32 %v5723_v49, %v4958_v30 }
 0x171   :  { %v5340_v47 = vld [vmem:[#allocation8 + $0x488] sm:$0xf]  ;;  %v4957_v56 = vor.u32 %v5729_v44, %v4956_v43  ;;  %v5717_v62 = vld [vmem:[#allocation8 + $0x154] sm:$0xf0]  ;;  %v5771_v49 = vld [vmem:[#allocation8 + $0x30c] sm:$0xf] }
 0x172   :  { %v5341_v57 = vor.u32 %v5825_v48, %v5340_v47  ;;  %v5148_v43 = vld [vmem:[#allocation8 + $0x308] sm:$0xf]  ;;  %v5777_v44 = vld [vmem:[#allocation8 + $0x334] sm:$0xf0]  ;;  %v5675_v47 = vld [vmem:[#allocation8 + $0xc] sm:$0xf] }
 0x173   :  { %3152 = vmatpush.bf16.msrb.mxu0 %v4901_v13  ;;  %3165 = vmatpush.bf16.msrb.mxu1 %v5285_v14  ;;  %v5105_v13 = vor.u32 %v5759_v60, %v5102_v0  ;;  %v5489_v14 = vor.u32 %v5855_v1, %v5486_v2  ;;  %v5711_v0 = vld [vmem:[#allocation8 + $0x12c] sm:$0xf]  ;;  %v4910_v1 = vld [vmem:[#allocation8 + $0x158] sm:$0xf0] }
 0x174   :  { %3178 = vmatpush.bf16.msrb.mxu2 %v4905_v19  ;;  %3191 = vmatpush.bf16.msrb.mxu3 %v5289_v20  ;;  %v1963_v5 = vpop.f32.mrf.mxu2  ;;  %v5849_v19 = vld [vmem:[#allocation8 + $0x574] sm:$0xf0]  ;;  %v5747_v20 = vld [vmem:[#allocation8 + $0x24c] sm:$0xf]  ;;  %v4766_v48 = vld [vmem:[#allocation8 + $0x38] sm:$0xf0] }
 0x175   :  { %v1976_v8 = vpop.f32.mrf.mxu3  ;;  %v5807_v2 = vld [vmem:[#allocation8 + $0x42c] sm:$0xf] }
 0x176   :  { %v6528_v15 = vadd.f32 %v1976_v8, %v1963_v5  ;;  %v1939_v17 = vpop.f32.mrf.mxu0  ;;  %v4913_v8 = vor.u32 %v5711_v0, %v4910_v1  ;;  %v4769_v0 = vor.u32 %v5675_v47, %v4766_v48 }
 0x177   :  { %3153 = vmatpush.bf16.msrb.mxu0 %v4853_v27  ;;  %3166 = vmatpush.bf16.msrb.mxu1 %v5237_v28  ;;  %v1952_v21 = vpop.f32.mrf.mxu1  ;;  %v5053_v27 = vor.u32 %v5753_v11, %v5052_v9  ;;  %v5437_v28 = vor.u32 %v5849_v19, %v5436_v18  ;;  %v5244_v11 = vld [vmem:[#allocation8 + $0x3c8] sm:$0xf]  ;;  %v4862_v19 = vld [vmem:[#allocation8 + $0xf8] sm:$0xf0] }
 0x178   :  { %3179 = vmatpush.bf16.msrb.mxu2 %v4857_v33  ;;  %3192 = vmatpush.bf16.msrb.mxu3 %v5241_v34  ;;  %v5057_v33 = vor.u32 %v5747_v20, %v5054_v22  ;;  %v5441_v34 = vor.u32 %v5843_v23, %v5438_v24  ;;  %v5795_v20 = vld [vmem:[#allocation8 + $0x3cc] sm:$0xf]  ;;  %v5246_v21 = vld [vmem:[#allocation8 + $0x3f8] sm:$0xf0] }
 0x17b   :  { %3154 = vmatpush.bf16.msrb.mxu0 %v4805_v45  ;;  %3167 = vmatpush.bf16.msrb.mxu1 %v5189_v46  ;;  %v5009_v45 = vor.u32 %v5735_v12, %v5006_v37  ;;  %v5393_v46 = vor.u32 %v5831_v16, %v5390_v38  ;;  %v5687_v12 = vld [vmem:[#allocation8 + $0x6c] sm:$0xf]  ;;  %v4814_v37 = vld [vmem:[#allocation8 + $0x98] sm:$0xf0] }
 0x17c   :  { %3180 = vmatpush.bf16.msrb.mxu2 %v4809_v50  ;;  %3193 = vmatpush.bf16.msrb.mxu3 %v5193_v51  ;;  %v1965_v39 = vpop.f32.mrf.mxu2  ;;  %v5819_v50 = vld [vmem:[#allocation8 + $0x48c] sm:$0xf]  ;;  %v5342_v51 = vld [vmem:[#allocation8 + $0x4b8] sm:$0xf0] }
 0x17d   :  { %v1978_v42 = vpop.f32.mrf.mxu3  ;;  %v5345_v60 = vor.u32 %v5819_v50, %v5342_v51  ;;  %v5783_v16 = vld [vmem:[#allocation8 + $0x36c] sm:$0xf]  ;;  %v5198_v38 = vld [vmem:[#allocation8 + $0x398] sm:$0xf0]  ;;  %v4764_v39 = vld [vmem:[#allocation8 + $0x8] sm:$0xf] }
 0x17e   :  { %v5681_v42 = vld [vmem:[#allocation8 + $0x34] sm:$0xf0]  ;;  %v5150_v51 = vld [vmem:[#allocation8 + $0x338] sm:$0xf0] }
 0x17f   :  { %3155 = vmatpush.bf16.msrb.mxu0 %v4757_v61  ;;  %3168 = vmatpush.bf16.msrb.mxu1 %v5141_v63  ;;  %v1989_v53 = vpop.f32.mrf.mxu0  ;;  %v2002_v55 = vpop.f32.mrf.mxu1  ;;  %v5292_v61 = vld [vmem:[#allocation8 + $0x428] sm:$0xf]  ;;  %v5813_v63 = vld [vmem:[#allocation8 + $0x454] sm:$0xf0]  ;;  %v5153_v1 = vor.u32 %v5771_v49, %v5150_v51 }
 0x180   :  { %3181 = vmatpush.bf16.msrb.mxu2 %v4761_v3  ;;  %3194 = vmatpush.bf16.msrb.mxu3 %v5145_v4  ;;  %v6542_v29 = vadd.f32 %v2002_v55, %v1989_v53  ;;  %v5294_v3 = vld [vmem:[#allocation8 + $0x458] sm:$0xf0]  ;;  %v4909_v4 = vor.u32 %v5717_v62, %v4908_v58  ;;  %v5293_v5 = vor.u32 %v5813_v63, %v5292_v61  ;;  %v5108_v53 = vld [vmem:[#allocation8 + $0x2b0] sm:$0xf]  ;;  %v5766_v55 = vld [vmem:[#allocation8 + $0x2dc] sm:$0xf0] }
 0x181   :  { %v5297_v9 = vor.u32 %v5807_v2, %v5294_v3  ;;  %v5760_v58 = vld [vmem:[#allocation8 + $0x2b4] sm:$0xf]  ;;  %v4765_v62 = vor.u32 %v5681_v42, %v4764_v39  ;;  %v5494_v63 = vld [vmem:[#allocation8 + $0x5e0] sm:$0xf0]  ;;  %v5109_v2 = vor.u32 %v5766_v55, %v5108_v53  ;;  %v5348_v39 = vld [vmem:[#allocation8 + $0x490] sm:$0xf] }
 0x182   :  { %3156 = vmatmul.bf16.vlgmr.msrb.gmra.mxu0 %v6532_v25  ;;  %3169 = vmatmul.bf16.vlgmr.msrb.gmra.mxu1 %v6536_v26  ;;  %v5856_v61 = vld [vmem:[#allocation8 + $0x5b4] sm:$0xf]  ;;  %v4966_v42 = vld [vmem:[#allocation8 + $0x1c0] sm:$0xf0]  ;;  %v5300_v55 = vld [vmem:[#allocation8 + $0x430] sm:$0xf] }
 0x183   :  { %3200 = vmatpush.bf16.msra.mxu0 %v5101_v6  ;;  %3213 = vmatpush.bf16.msra.mxu1 %v5485_v7  ;;  %v4860_v6 = vld [vmem:[#allocation8 + $0xc8] sm:$0xf]  ;;  %v5705_v7 = vld [vmem:[#allocation8 + $0xf4] sm:$0xf0] }
 0x184   :  { %3226 = vmatpush.bf16.msra.mxu2 %v5105_v13  ;;  %3239 = vmatpush.bf16.msra.mxu3 %v5489_v14  ;;  %v5801_v13 = vld [vmem:[#allocation8 + $0x3f4] sm:$0xf0]  ;;  %v5699_v14 = vld [vmem:[#allocation8 + $0xcc] sm:$0xf] }
 0x185   :  { %3182 = vmatmul.bf16.vlgmr.msrb.gmra.mxu2 %v6532_v25  ;;  %3195 = vmatmul.bf16.vlgmr.msrb.gmra.mxu3 %v6536_v26 }
 0x187   :  { %3201 = vmatpush.bf16.msra.mxu0 %v5053_v27  ;;  %3214 = vmatpush.bf16.msra.mxu1 %v5437_v28  ;;  %v1991_v23 = vpop.f32.mrf.mxu0  ;;  %v2004_v24 = vpop.f32.mrf.mxu1  ;;  %v4861_v27 = vor.u32 %v5705_v7, %v4860_v6  ;;  %v5245_v28 = vor.u32 %v5801_v13, %v5244_v11  ;;  %v5497_v7 = vor.u32 %v5856_v61, %v5494_v63  ;;  %v5748_v11 = vld [vmem:[#allocation8 + $0x254] sm:$0xf]  ;;  %v5062_v13 = vld [vmem:[#allocation8 + $0x280] sm:$0xf0]  ;;  %v4868_v63 = vld [vmem:[#allocation8 + $0xd0] sm:$0xf] }
 0x188   :  { %3227 = vmatpush.bf16.msra.mxu2 %v5057_v33  ;;  %3240 = vmatpush.bf16.msra.mxu3 %v5441_v34  ;;  %v2015_v17 = vpop.f32.mrf.mxu2  ;;  %v2028_v18 = vpop.f32.mrf.mxu3  ;;  %v4865_v33 = vor.u32 %v5699_v14, %v4862_v19  ;;  %v5249_v34 = vor.u32 %v5795_v20, %v5246_v21  ;;  %v5844_v14 = vld [vmem:[#allocation8 + $0x554] sm:$0xf]  ;;  %v5012_v20 = vld [vmem:[#allocation8 + $0x1f0] sm:$0xf]  ;;  %v5742_v21 = vld [vmem:[#allocation8 + $0x21c] sm:$0xf0]  ;;  %v5065_v23 = vor.u32 %v5748_v11, %v5062_v13 }
 0x189   :  { %v6544_v22 = vadd.f32 %v2028_v18, %v2015_v17  ;;  %v5446_v17 = vld [vmem:[#allocation8 + $0x580] sm:$0xf0] }
 0x18a   :  { %v5449_v24 = vor.u32 %v5844_v14, %v5446_v17  ;;  %v5254_v11 = vld [vmem:[#allocation8 + $0x400] sm:$0xf0] }
 0x18b   :  { %3202 = vmatpush.bf16.msra.mxu0 %v5005_v40  ;;  %3215 = vmatpush.bf16.msra.mxu1 %v5389_v41  ;;  %v4813_v40 = vor.u32 %v5693_v32, %v4812_v31  ;;  %v5197_v41 = vor.u32 %v5789_v36, %v5196_v35  ;;  %v5736_v31 = vld [vmem:[#allocation8 + $0x1f4] sm:$0xf]  ;;  %v5014_v32 = vld [vmem:[#allocation8 + $0x220] sm:$0xf0]  ;;  %v5013_v35 = vor.u32 %v5742_v21, %v5012_v20  ;;  %v4820_v20 = vld [vmem:[#allocation8 + $0x70] sm:$0xf] }
 0x18c   :  { %3228 = vmatpush.bf16.msra.mxu2 %v5009_v45  ;;  %3241 = vmatpush.bf16.msra.mxu3 %v5393_v46  ;;  %v4817_v45 = vor.u32 %v5687_v12, %v4814_v37  ;;  %v5201_v46 = vor.u32 %v5783_v16, %v5198_v38  ;;  %v4964_v12 = vld [vmem:[#allocation8 + $0x190] sm:$0xf]  ;;  %v5730_v37 = vld [vmem:[#allocation8 + $0x1bc] sm:$0xf0]  ;;  %v5017_v16 = vor.u32 %v5736_v31, %v5014_v32  ;;  %v5688_v31 = vld [vmem:[#allocation8 + $0x74] sm:$0xf] }
 0x18d   :  { %v4965_v48 = vor.u32 %v5730_v37, %v4964_v12  ;;  %v5694_v21 = vld [vmem:[#allocation8 + $0x9c] sm:$0xf0]  ;;  %v4822_v32 = vld [vmem:[#allocation8 + $0xa0] sm:$0xf0] }
 0x18e   :  { %v5682_v37 = vld [vmem:[#allocation8 + $0x3c] sm:$0xf0] }
 0x18f   :  { %3203 = vmatpush.bf16.msra.mxu0 %v4957_v56  ;;  %3216 = vmatpush.bf16.msra.mxu1 %v5341_v57  ;;  %v5492_v56 = vld [vmem:[#allocation8 + $0x5b0] sm:$0xf]  ;;  %v5862_v57 = vld [vmem:[#allocation8 + $0x5dc] sm:$0xf0] }
 0x190   :  { %3229 = vmatpush.bf16.msra.mxu2 %v4961_v59  ;;  %3242 = vmatpush.bf16.msra.mxu3 %v5345_v60  ;;  %v2017_v30 = vpop.f32.mrf.mxu2  ;;  %v2030_v50 = vpop.f32.mrf.mxu3  ;;  %v5149_v59 = vor.u32 %v5777_v44, %v5148_v43  ;;  %v5110_v60 = vld [vmem:[#allocation8 + $0x2e0] sm:$0xf0]  ;;  %v5493_v3 = vor.u32 %v5862_v57, %v5492_v56  ;;  %v5820_v43 = vld [vmem:[#allocation8 + $0x494] sm:$0xf]  ;;  %v5814_v56 = vld [vmem:[#allocation8 + $0x45c] sm:$0xf0] }
 0x191   :  { %v5113_v6 = vor.u32 %v5760_v58, %v5110_v60  ;;  %v5350_v44 = vld [vmem:[#allocation8 + $0x4c0] sm:$0xf0]  ;;  %v4916_v30 = vld [vmem:[#allocation8 + $0x130] sm:$0xf]  ;;  %v5718_v50 = vld [vmem:[#allocation8 + $0x15c] sm:$0xf0]  ;;  %v5301_v61 = vor.u32 %v5814_v56, %v5300_v55 }
 0x192   :  { %v5353_v53 = vor.u32 %v5820_v43, %v5350_v44  ;;  %v5712_v57 = vld [vmem:[#allocation8 + $0x134] sm:$0xf]  ;;  %v4918_v58 = vld [vmem:[#allocation8 + $0x160] sm:$0xf0]  ;;  %v4917_v60 = vor.u32 %v5718_v50, %v4916_v30  ;;  %v5500_v30 = vld [vmem:[#allocation8 + $0x5b8] sm:$0xf] }
 0x193   :  { %3204 = vmatpush.bf16.msra.mxu0 %v4909_v4  ;;  %3217 = vmatpush.bf16.msra.mxu1 %v5293_v5  ;;  %v5060_v4 = vld [vmem:[#allocation8 + $0x250] sm:$0xf]  ;;  %v5754_v5 = vld [vmem:[#allocation8 + $0x27c] sm:$0xf0]  ;;  %v5772_v43 = vld [vmem:[#allocation8 + $0x314] sm:$0xf] }
 0x194   :  { %3230 = vmatpush.bf16.msra.mxu2 %v4913_v8  ;;  %3243 = vmatpush.bf16.msra.mxu3 %v5297_v9  ;;  %v5444_v8 = vld [vmem:[#allocation8 + $0x550] sm:$0xf]  ;;  %v5850_v9 = vld [vmem:[#allocation8 + $0x57c] sm:$0xf0]  ;;  %v5061_v18 = vor.u32 %v5754_v5, %v5060_v4  ;;  %v5700_v5 = vld [vmem:[#allocation8 + $0xd4] sm:$0xf] }
 0x195   :  { %v5445_v19 = vor.u32 %v5850_v9, %v5444_v8  ;;  %v5802_v4 = vld [vmem:[#allocation8 + $0x3fc] sm:$0xf0]  ;;  %v4870_v8 = vld [vmem:[#allocation8 + $0x100] sm:$0xf0]  ;;  %v5796_v9 = vld [vmem:[#allocation8 + $0x3d4] sm:$0xf] }
 0x196   :  { %v5863_v50 = vld [vmem:[#allocation8 + $0x5e4] sm:$0xf0]  ;;  %v5118_v56 = vld [vmem:[#allocation8 + $0x2e8] sm:$0xf0] }
 0x197   :  { %3205 = vmatpush.bf16.msra.mxu0 %v4861_v27  ;;  %3218 = vmatpush.bf16.msra.mxu1 %v5245_v28  ;;  %v5396_v27 = vld [vmem:[#allocation8 + $0x4f0] sm:$0xf]  ;;  %v5838_v28 = vld [vmem:[#allocation8 + $0x51c] sm:$0xf0] }
 0x198   :  { %3231 = vmatpush.bf16.msra.mxu2 %v4865_v33  ;;  %3244 = vmatpush.bf16.msra.mxu3 %v5249_v34  ;;  %v5832_v33 = vld [vmem:[#allocation8 + $0x4f4] sm:$0xf]  ;;  %v5398_v34 = vld [vmem:[#allocation8 + $0x520] sm:$0xf0]  ;;  %v5397_v36 = vor.u32 %v5838_v28, %v5396_v27  ;;  %v5204_v27 = vld [vmem:[#allocation8 + $0x370] sm:$0xf] }
 0x199   :  { %v5401_v38 = vor.u32 %v5832_v33, %v5398_v34  ;;  %v5790_v28 = vld [vmem:[#allocation8 + $0x39c] sm:$0xf0]  ;;  %v5784_v33 = vld [vmem:[#allocation8 + $0x374] sm:$0xf]  ;;  %v5206_v34 = vld [vmem:[#allocation8 + $0x3a0] sm:$0xf0] }
 0x19a   :  { %v5205_v12 = vor.u32 %v5790_v28, %v5204_v27  ;;  %v5833_v27 = vld [vmem:[#allocation8 + $0x4fc] sm:$0xf]  ;;  %v5406_v28 = vld [vmem:[#allocation8 + $0x528] sm:$0xf0] }
 0x19b   :  { %3206 = vmatpush.bf16.msra.mxu0 %v4813_v40  ;;  %3219 = vmatpush.bf16.msra.mxu1 %v5197_v41  ;;  %v5826_v40 = vld [vmem:[#allocation8 + $0x4bc] sm:$0xf0]  ;;  %v5724_v41 = vld [vmem:[#allocation8 + $0x194] sm:$0xf] }
 0x19c   :  { %3232 = vmatpush.bf16.msra.mxu2 %v4817_v45  ;;  %3245 = vmatpush.bf16.msra.mxu3 %v5201_v46  ;;  %v5349_v49 = vor.u32 %v5826_v40, %v5348_v39  ;;  %v4969_v51 = vor.u32 %v5724_v41, %v4966_v42  ;;  %v4825_v39 = vor.u32 %v5688_v31, %v4822_v32  ;;  %v5676_v41 = vld [vmem:[#allocation8 + $0x14] sm:$0xf]  ;;  %v4774_v42 = vld [vmem:[#allocation8 + $0x40] sm:$0xf0] }
 0x19d   :  { %v5209_v40 = vor.u32 %v5784_v33, %v5206_v34  ;;  %v4972_v33 = vld [vmem:[#allocation8 + $0x198] sm:$0xf]  ;;  %v5731_v34 = vld [vmem:[#allocation8 + $0x1c4] sm:$0xf0] }
 0x19f   :  { %3207 = vmatpush.bf16.msra.mxu0 %v4765_v62  ;;  %3220 = vmatpush.bf16.msra.mxu1 %v5149_v59  ;;  %v2041_v45 = vpop.f32.mrf.mxu0  ;;  %v2054_v46 = vpop.f32.mrf.mxu1  ;;  %v5808_v62 = vld [vmem:[#allocation8 + $0x434] sm:$0xf]  ;;  %v5302_v59 = vld [vmem:[#allocation8 + $0x460] sm:$0xf0] }
 0x1a0   :  { %3233 = vmatpush.bf16.msra.mxu2 %v4769_v0  ;;  %3246 = vmatpush.bf16.msra.mxu3 %v5153_v1  ;;  %v6550_v47 = vadd.f32 %v2054_v46, %v2041_v45  ;;  %v5706_v0 = vld [vmem:[#allocation8 + $0xfc] sm:$0xf0]  ;;  %v4921_v1 = vor.u32 %v5712_v57, %v4918_v58  ;;  %v5158_v46 = vld [vmem:[#allocation8 + $0x340] sm:$0xf0]  ;;  %v5857_v57 = vld [vmem:[#allocation8 + $0x5bc] sm:$0xf] }
 0x1a1   :  { %v5502_v58 = vld [vmem:[#allocation8 + $0x5e8] sm:$0xf0] }
 0x1a2   :  { %3208 = vmatmul.bf16.vlgmr.msra.gmra.mxu0 %v6532_v25  ;;  %3221 = vmatmul.bf16.vlgmr.msra.gmra.mxu1 %v6536_v26 }
 0x1a3   :  { %3252 = vmatpush.bf16.msrb.mxu0 %v5109_v2  ;;  %3265 = vmatpush.bf16.msrb.mxu1 %v5493_v3  ;;  %v5305_v2 = vor.u32 %v5808_v62, %v5302_v59  ;;  %v5252_v3 = vld [vmem:[#allocation8 + $0x3d0] sm:$0xf]  ;;  %v4777_v62 = vor.u32 %v5676_v41, %v4774_v42  ;;  %v5161_v59 = vor.u32 %v5772_v43, %v5158_v46  ;;  %v4924_v46 = vld [vmem:[#allocation8 + $0x138] sm:$0xf] }
 0x1a4   :  { %3278 = vmatpush.bf16.msrb.mxu2 %v5113_v6  ;;  %3291 = vmatpush.bf16.msrb.mxu3 %v5497_v7 }
 0x1a5   :  { %3234 = vmatmul.bf16.vlgmr.msra.gmra.mxu2 %v6532_v25  ;;  %3247 = vmatmul.bf16.vlgmr.msra.gmra.mxu3 %v6536_v26 }
 0x1a7   :  { %3253 = vmatpush.bf16.msrb.mxu0 %v5061_v18  ;;  %3266 = vmatpush.bf16.msrb.mxu1 %v5445_v19  ;;  %v2043_v14 = vpop.f32.mrf.mxu0  ;;  %v2056_v17 = vpop.f32.mrf.mxu1  ;;  %v4869_v18 = vor.u32 %v5706_v0, %v4868_v63  ;;  %v5253_v19 = vor.u32 %v5802_v4, %v5252_v3  ;;  %v5068_v63 = vld [vmem:[#allocation8 + $0x258] sm:$0xf]  ;;  %v5755_v0 = vld [vmem:[#allocation8 + $0x284] sm:$0xf0] }
 0x1a8   :  { %3279 = vmatpush.bf16.msrb.mxu2 %v5065_v23  ;;  %3292 = vmatpush.bf16.msrb.mxu3 %v5449_v24  ;;  %v2067_v6 = vpop.f32.mrf.mxu2  ;;  %v2080_v7 = vpop.f32.mrf.mxu3  ;;  %v4873_v23 = vor.u32 %v5700_v5, %v4870_v8  ;;  %v5257_v24 = vor.u32 %v5796_v9, %v5254_v11  ;;  %v5452_v3 = vld [vmem:[#allocation8 + $0x558] sm:$0xf]  ;;  %v5851_v4 = vld [vmem:[#allocation8 + $0x584] sm:$0xf0]  ;;  %v5749_v5 = vld [vmem:[#allocation8 + $0x25c] sm:$0xf]  ;;  %v5069_v9 = vor.u32 %v5755_v0, %v5068_v63 }
 0x1a9   :  { %v6552_v13 = vadd.f32 %v2080_v7, %v2067_v6  ;;  %v5070_v6 = vld [vmem:[#allocation8 + $0x288] sm:$0xf0]  ;;  %v5845_v7 = vld [vmem:[#allocation8 + $0x55c] sm:$0xf]  ;;  %v5453_v11 = vor.u32 %v5851_v4, %v5452_v3  ;;  %v5020_v14 = vld [vmem:[#allocation8 + $0x1f8] sm:$0xf] }
 0x1aa   :  { %v5454_v8 = vld [vmem:[#allocation8 + $0x588] sm:$0xf0]  ;;  %v5743_v17 = vld [vmem:[#allocation8 + $0x224] sm:$0xf0]  ;;  %v5260_v0 = vld [vmem:[#allocation8 + $0x3d8] sm:$0xf] }
 0x1ab   :  { %3254 = vmatpush.bf16.msrb.mxu0 %v5013_v35  ;;  %3267 = vmatpush.bf16.msrb.mxu1 %v5397_v36  ;;  %v4772_v35 = vld [vmem:[#allocation8 + $0x10] sm:$0xf]  ;;  %v4821_v36 = vor.u32 %v5694_v21, %v4820_v20  ;;  %v5404_v20 = vld [vmem:[#allocation8 + $0x4f8] sm:$0xf]  ;;  %v5839_v21 = vld [vmem:[#allocation8 + $0x524] sm:$0xf0]  ;;  %v5021_v31 = vor.u32 %v5743_v17, %v5020_v14 }
 0x1ac   :  { %3280 = vmatpush.bf16.msrb.mxu2 %v5017_v16  ;;  %3293 = vmatpush.bf16.msrb.mxu3 %v5401_v38  ;;  %v5156_v16 = vld [vmem:[#allocation8 + $0x310] sm:$0xf]  ;;  %v5778_v38 = vld [vmem:[#allocation8 + $0x33c] sm:$0xf0]  ;;  %v5405_v32 = vor.u32 %v5839_v21, %v5404_v20 }
 0x1ad   :  { %v5157_v55 = vor.u32 %v5778_v38, %v5156_v16  ;;  %v5725_v16 = vld [vmem:[#allocation8 + $0x19c] sm:$0xf]  ;;  %v4974_v38 = vld [vmem:[#allocation8 + $0x1c8] sm:$0xf0] }
 0x1af   :  { %3255 = vmatpush.bf16.msrb.mxu0 %v4965_v48  ;;  %3268 = vmatpush.bf16.msrb.mxu1 %v5349_v49  ;;  %v5116_v48 = vld [vmem:[#allocation8 + $0x2b8] sm:$0xf]  ;;  %v5767_v49 = vld [vmem:[#allocation8 + $0x2e4] sm:$0xf0] }
 0x1b0   :  { %3281 = vmatpush.bf16.msrb.mxu2 %v4969_v51  ;;  %3294 = vmatpush.bf16.msrb.mxu3 %v5353_v53  ;;  %v2069_v44 = vpop.f32.mrf.mxu2  ;;  %v2082_v45 = vpop.f32.mrf.mxu3  ;;  %v5761_v51 = vld [vmem:[#allocation8 + $0x2bc] sm:$0xf]  ;;  %v4773_v53 = vor.u32 %v5682_v37, %v4772_v35  ;;  %v5827_v37 = vld [vmem:[#allocation8 + $0x4c4] sm:$0xf0] }
 0x1b1   :  { %v4973_v44 = vor.u32 %v5731_v34, %v4972_v33  ;;  %v4780_v33 = vld [vmem:[#allocation8 + $0x18] sm:$0xf] }
 0x1b3   :  { %3256 = vmatpush.bf16.msrb.mxu0 %v4917_v60  ;;  %3269 = vmatpush.bf16.msrb.mxu1 %v5301_v61  ;;  %v5117_v60 = vor.u32 %v5767_v49, %v5116_v48  ;;  %v5501_v61 = vor.u32 %v5863_v50, %v5500_v30  ;;  %v5719_v48 = vld [vmem:[#allocation8 + $0x164] sm:$0xf0]  ;;  %v4977_v49 = vor.u32 %v5725_v16, %v4974_v38  ;;  %v5308_v50 = vld [vmem:[#allocation8 + $0x438] sm:$0xf] }
 0x1b4   :  { %3282 = vmatpush.bf16.msrb.mxu2 %v4921_v1  ;;  %3295 = vmatpush.bf16.msrb.mxu3 %v5305_v2  ;;  %v5121_v1 = vor.u32 %v5761_v51, %v5118_v56  ;;  %v5505_v2 = vor.u32 %v5857_v57, %v5502_v58  ;;  %v5815_v51 = vld [vmem:[#allocation8 + $0x464] sm:$0xf0]  ;;  %v5809_v56 = vld [vmem:[#allocation8 + $0x43c] sm:$0xf]  ;;  %v5310_v57 = vld [vmem:[#allocation8 + $0x468] sm:$0xf0]  ;;  %v4925_v58 = vor.u32 %v5719_v48, %v4924_v46 }
 0x1b5   :  { %v5313_v63 = vor.u32 %v5809_v56, %v5310_v57  ;;  %v5124_v46 = vld [vmem:[#allocation8 + $0x2c0] sm:$0xf]  ;;  %v5768_v48 = vld [vmem:[#allocation8 + $0x2ec] sm:$0xf0]  ;;  %v5858_v56 = vld [vmem:[#allocation8 + $0x5c4] sm:$0xf] }
 0x1b6   :  { %v5510_v57 = vld [vmem:[#allocation8 + $0x5f0] sm:$0xf0] }
 0x1b7   :  { %3257 = vmatpush.bf16.msrb.mxu0 %v4869_v18  ;;  %3270 = vmatpush.bf16.msrb.mxu1 %v5253_v19  ;;  %v5073_v18 = vor.u32 %v5749_v5, %v5070_v6  ;;  %v5457_v19 = vor.u32 %v5845_v7, %v5454_v8  ;;  %v4878_v5 = vld [vmem:[#allocation8 + $0x108] sm:$0xf0]  ;;  %v5797_v6 = vld [vmem:[#allocation8 + $0x3dc] sm:$0xf] }
 0x1b8   :  { %3283 = vmatpush.bf16.msrb.mxu2 %v4873_v23  ;;  %3296 = vmatpush.bf16.msrb.mxu3 %v5257_v24  ;;  %v5737_v23 = vld [vmem:[#allocation8 + $0x1fc] sm:$0xf]  ;;  %v5022_v24 = vld [vmem:[#allocation8 + $0x228] sm:$0xf0] }
 0x1b9   :  { %v5025_v35 = vor.u32 %v5737_v23, %v5022_v24  ;;  %v5262_v7 = vld [vmem:[#allocation8 + $0x408] sm:$0xf0]  ;;  %v5212_v23 = vld [vmem:[#allocation8 + $0x378] sm:$0xf]  ;;  %v5791_v24 = vld [vmem:[#allocation8 + $0x3a4] sm:$0xf0] }
 0x1ba   :  { %v5265_v21 = vor.u32 %v5797_v6, %v5262_v7  ;;  %v5846_v6 = vld [vmem:[#allocation8 + $0x564] sm:$0xf]  ;;  %v5462_v7 = vld [vmem:[#allocation8 + $0x590] sm:$0xf0] }
 0x1bb   :  { %3258 = vmatpush.bf16.msrb.mxu0 %v4821_v36  ;;  %3271 = vmatpush.bf16.msrb.mxu1 %v5205_v12  ;;  %v5409_v36 = vor.u32 %v5833_v27, %v5406_v28  ;;  %v5356_v12 = vld [vmem:[#allocation8 + $0x498] sm:$0xf]  ;;  %v5689_v27 = vld [vmem:[#allocation8 + $0x7c] sm:$0xf]  ;;  %v4830_v28 = vld [vmem:[#allocation8 + $0xa8] sm:$0xf0] }
 0x1bc   :  { %3284 = vmatpush.bf16.msrb.mxu2 %v4825_v39  ;;  %3297 = vmatpush.bf16.msrb.mxu3 %v5209_v40  ;;  %v5821_v39 = vld [vmem:[#allocation8 + $0x49c] sm:$0xf]  ;;  %v5358_v40 = vld [vmem:[#allocation8 + $0x4c8] sm:$0xf0]  ;;  %v5357_v45 = vor.u32 %v5827_v37, %v5356_v12  ;;  %v5164_v12 = vld [vmem:[#allocation8 + $0x318] sm:$0xf]  ;;  %v4833_v16 = vor.u32 %v5689_v27, %v4830_v28 }
 0x1bd   :  { %v5361_v30 = vor.u32 %v5821_v39, %v5358_v40  ;;  %v5779_v37 = vld [vmem:[#allocation8 + $0x344] sm:$0xf0]  ;;  %v5677_v39 = vld [vmem:[#allocation8 + $0x1c] sm:$0xf]  ;;  %v4782_v40 = vld [vmem:[#allocation8 + $0x48] sm:$0xf0] }
 0x1be   :  { %v5834_v27 = vld [vmem:[#allocation8 + $0x504] sm:$0xf]  ;;  %v5414_v28 = vld [vmem:[#allocation8 + $0x530] sm:$0xf0] }
 0x1bf   :  { %3259 = vmatpush.bf16.msrb.mxu0 %v4773_v53  ;;  %3272 = vmatpush.bf16.msrb.mxu1 %v5157_v55  ;;  %v2093_v41 = vpop.f32.mrf.mxu0  ;;  %v2106_v42 = vpop.f32.mrf.mxu1  ;;  %v5713_v53 = vld [vmem:[#allocation8 + $0x13c] sm:$0xf]  ;;  %v4926_v55 = vld [vmem:[#allocation8 + $0x168] sm:$0xf0] }
 0x1c0   :  { %3285 = vmatpush.bf16.msrb.mxu2 %v4777_v62  ;;  %3298 = vmatpush.bf16.msrb.mxu3 %v5161_v59  ;;  %v6558_v43 = vadd.f32 %v2106_v42, %v2093_v41  ;;  %v5309_v62 = vor.u32 %v5815_v51, %v5308_v50  ;;  %v4876_v59 = vld [vmem:[#allocation8 + $0xd8] sm:$0xf]  ;;  %v5773_v41 = vld [vmem:[#allocation8 + $0x31c] sm:$0xf]  ;;  %v5762_v50 = vld [vmem:[#allocation8 + $0x2c4] sm:$0xf] }
 0x1c2   :  { %3260 = vmatmul.bf16.vlgmr.msrb.gmra.mxu0 %v6532_v25  ;;  %3273 = vmatmul.bf16.vlgmr.msrb.gmra.mxu1 %v6536_v26 }
 0x1c3   :  { %3304 = vmatpush.bf16.msra.mxu0 %v5117_v60  ;;  %3317 = vmatpush.bf16.msra.mxu1 %v5501_v61  ;;  %v5707_v60 = vld [vmem:[#allocation8 + $0x104] sm:$0xf0]  ;;  %v4929_v61 = vor.u32 %v5713_v53, %v4926_v55  ;;  %v5165_v53 = vor.u32 %v5779_v37, %v5164_v12  ;;  %v5126_v55 = vld [vmem:[#allocation8 + $0x2f0] sm:$0xf0]  ;;  %v5364_v12 = vld [vmem:[#allocation8 + $0x4a0] sm:$0xf] }
 0x1c4   :  { %3330 = vmatpush.bf16.msra.mxu2 %v5121_v1  ;;  %3343 = vmatpush.bf16.msra.mxu3 %v5505_v2  ;;  %v5803_v1 = vld [vmem:[#allocation8 + $0x404] sm:$0xf0]  ;;  %v5701_v2 = vld [vmem:[#allocation8 + $0xdc] sm:$0xf]  ;;  %v4877_v14 = vor.u32 %v5707_v60, %v4876_v59  ;;  %v5125_v59 = vor.u32 %v5768_v48, %v5124_v46  ;;  %v5828_v37 = vld [vmem:[#allocation8 + $0x4cc] sm:$0xf0] }
 0x1c5   :  { %3286 = vmatmul.bf16.vlgmr.msrb.gmra.mxu2 %v6532_v25  ;;  %3299 = vmatmul.bf16.vlgmr.msrb.gmra.mxu3 %v6536_v26  ;;  %v5261_v17 = vor.u32 %v5803_v1, %v5260_v0  ;;  %v4881_v20 = vor.u32 %v5701_v2, %v4878_v5  ;;  %v5129_v0 = vor.u32 %v5762_v50, %v5126_v55  ;;  %v5460_v2 = vld [vmem:[#allocation8 + $0x560] sm:$0xf]  ;;  %v5078_v5 = vld [vmem:[#allocation8 + $0x290] sm:$0xf0]  ;;  %v5714_v55 = vld [vmem:[#allocation8 + $0x144] sm:$0xf] }
 0x1c6   :  { %v5513_v1 = vor.u32 %v5858_v56, %v5510_v57  ;;  %v5365_v46 = vor.u32 %v5828_v37, %v5364_v12  ;;  %v4932_v48 = vld [vmem:[#allocation8 + $0x140] sm:$0xf]  ;;  %v4934_v56 = vld [vmem:[#allocation8 + $0x170] sm:$0xf0]  ;;  %v5810_v57 = vld [vmem:[#allocation8 + $0x444] sm:$0xf] }
 0x1c7   :  { %3305 = vmatpush.bf16.msra.mxu0 %v5069_v9  ;;  %3318 = vmatpush.bf16.msra.mxu1 %v5453_v11  ;;  %v2095_v9 = vpop.f32.mrf.mxu0  ;;  %v2108_v11 = vpop.f32.mrf.mxu1  ;;  %v5684_v37 = vld [vmem:[#allocation8 + $0x4c] sm:$0xf0] }
 0x1c8   :  { %3331 = vmatpush.bf16.msra.mxu2 %v5073_v18  ;;  %3344 = vmatpush.bf16.msra.mxu3 %v5457_v19  ;;  %v2119_v3 = vpop.f32.mrf.mxu2  ;;  %v2132_v4 = vpop.f32.mrf.mxu3  ;;  %v4828_v18 = vld [vmem:[#allocation8 + $0x78] sm:$0xf]  ;;  %v5695_v19 = vld [vmem:[#allocation8 + $0xa4] sm:$0xf0] }
 0x1c9   :  { %v6560_v8 = vadd.f32 %v2132_v4, %v2119_v3  ;;  %v4829_v34 = vor.u32 %v5695_v19, %v4828_v18  ;;  %v5852_v3 = vld [vmem:[#allocation8 + $0x58c] sm:$0xf0]  ;;  %v5750_v4 = vld [vmem:[#allocation8 + $0x264] sm:$0xf]  ;;  %v5465_v19 = vor.u32 %v5846_v6, %v5462_v7  ;;  %v4886_v6 = vld [vmem:[#allocation8 + $0x110] sm:$0xf0] }
 0x1ca   :  { %v5461_v11 = vor.u32 %v5852_v3, %v5460_v2  ;;  %v5081_v18 = vor.u32 %v5750_v4, %v5078_v5  ;;  %v5804_v2 = vld [vmem:[#allocation8 + $0x40c] sm:$0xf0]  ;;  %v5702_v3 = vld [vmem:[#allocation8 + $0xe4] sm:$0xf] }
 0x1cb   :  { %3306 = vmatpush.bf16.msra.mxu0 %v5021_v31  ;;  %3319 = vmatpush.bf16.msra.mxu1 %v5405_v32  ;;  %v5785_v31 = vld [vmem:[#allocation8 + $0x37c] sm:$0xf]  ;;  %v5214_v32 = vld [vmem:[#allocation8 + $0x3a8] sm:$0xf0]  ;;  %v5798_v7 = vld [vmem:[#allocation8 + $0x3e4] sm:$0xf] }
 0x1cc   :  { %3332 = vmatpush.bf16.msra.mxu2 %v5025_v35  ;;  %3345 = vmatpush.bf16.msra.mxu3 %v5409_v36  ;;  %v5213_v35 = vor.u32 %v5791_v24, %v5212_v23  ;;  %v5683_v36 = vld [vmem:[#allocation8 + $0x44] sm:$0xf0]  ;;  %v5217_v38 = vor.u32 %v5785_v31, %v5214_v32  ;;  %v5738_v23 = vld [vmem:[#allocation8 + $0x204] sm:$0xf]  ;;  %v5030_v24 = vld [vmem:[#allocation8 + $0x230] sm:$0xf0] }
 0x1cd   :  { %v4781_v51 = vor.u32 %v5683_v36, %v4780_v33  ;;  %v4980_v33 = vld [vmem:[#allocation8 + $0x1a0] sm:$0xf]  ;;  %v5417_v36 = vor.u32 %v5834_v27, %v5414_v28  ;;  %v5792_v28 = vld [vmem:[#allocation8 + $0x3ac] sm:$0xf0] }
 0x1ce   :  { %v5220_v27 = vld [vmem:[#allocation8 + $0x380] sm:$0xf] }
 0x1cf   :  { %3307 = vmatpush.bf16.msra.mxu0 %v4973_v44  ;;  %3320 = vmatpush.bf16.msra.mxu1 %v5357_v45  ;;  %v5166_v45 = vld [vmem:[#allocation8 + $0x348] sm:$0xf0]  ;;  %v5221_v12 = vor.u32 %v5792_v28, %v5220_v27  ;;  %v5420_v27 = vld [vmem:[#allocation8 + $0x508] sm:$0xf]  ;;  %v5841_v28 = vld [vmem:[#allocation8 + $0x534] sm:$0xf0] }
 0x1d0   :  { %3333 = vmatpush.bf16.msra.mxu2 %v4977_v49  ;;  %3346 = vmatpush.bf16.msra.mxu3 %v5361_v30  ;;  %v2121_v42 = vpop.f32.mrf.mxu2  ;;  %v2134_v44 = vpop.f32.mrf.mxu3  ;;  %v5508_v49 = vld [vmem:[#allocation8 + $0x5c0] sm:$0xf]  ;;  %v5864_v30 = vld [vmem:[#allocation8 + $0x5ec] sm:$0xf0] }
 0x1d1   :  { %v5509_v60 = vor.u32 %v5864_v30, %v5508_v49  ;;  %v5720_v49 = vld [vmem:[#allocation8 + $0x16c] sm:$0xf0] }
 0x1d3   :  { %3308 = vmatpush.bf16.msra.mxu0 %v4925_v58  ;;  %3321 = vmatpush.bf16.msra.mxu1 %v5309_v62  ;;  %v4785_v58 = vor.u32 %v5677_v39, %v4782_v40  ;;  %v5169_v62 = vor.u32 %v5773_v41, %v5166_v45  ;;  %v5822_v39 = vld [vmem:[#allocation8 + $0x4a4] sm:$0xf]  ;;  %v5366_v40 = vld [vmem:[#allocation8 + $0x4d0] sm:$0xf0] }
 0x1d4   :  { %3334 = vmatpush.bf16.msra.mxu2 %v4929_v61  ;;  %3347 = vmatpush.bf16.msra.mxu3 %v5313_v63  ;;  %v5076_v61 = vld [vmem:[#allocation8 + $0x260] sm:$0xf]  ;;  %v5756_v63 = vld [vmem:[#allocation8 + $0x28c] sm:$0xf0]  ;;  %v5369_v50 = vor.u32 %v5822_v39, %v5366_v40 }
 0x1d5   :  { %v5077_v9 = vor.u32 %v5756_v63, %v5076_v61  ;;  %v5708_v61 = vld [vmem:[#allocation8 + $0x10c] sm:$0xf0]  ;;  %v4937_v63 = vor.u32 %v5714_v55, %v4934_v56  ;;  %v5763_v55 = vld [vmem:[#allocation8 + $0x2cc] sm:$0xf] }
 0x1d7   :  { %3309 = vmatpush.bf16.msra.mxu0 %v4877_v14  ;;  %3322 = vmatpush.bf16.msra.mxu1 %v5261_v17  ;;  %v5028_v14 = vld [vmem:[#allocation8 + $0x200] sm:$0xf]  ;;  %v5744_v17 = vld [vmem:[#allocation8 + $0x22c] sm:$0xf0] }
 0x1d8   :  { %3335 = vmatpush.bf16.msra.mxu2 %v4881_v20  ;;  %3348 = vmatpush.bf16.msra.mxu3 %v5265_v21  ;;  %v5412_v20 = vld [vmem:[#allocation8 + $0x500] sm:$0xf]  ;;  %v5840_v21 = vld [vmem:[#allocation8 + $0x52c] sm:$0xf0]  ;;  %v5029_v31 = vor.u32 %v5744_v17, %v5028_v14 }
 0x1d9   :  { %v5413_v32 = vor.u32 %v5840_v21, %v5412_v20  ;;  %v4836_v20 = vld [vmem:[#allocation8 + $0x80] sm:$0xf]  ;;  %v5696_v21 = vld [vmem:[#allocation8 + $0xac] sm:$0xf0] }
 0x1db   :  { %3310 = vmatpush.bf16.msra.mxu0 %v4829_v34  ;;  %3323 = vmatpush.bf16.msra.mxu1 %v5213_v35  ;;  %v5732_v34 = vld [vmem:[#allocation8 + $0x1cc] sm:$0xf0]  ;;  %v5033_v35 = vor.u32 %v5738_v23, %v5030_v24  ;;  %v4889_v23 = vor.u32 %v5702_v3, %v4886_v6  ;;  %v5853_v6 = vld [vmem:[#allocation8 + $0x594] sm:$0xf0] }
 0x1dc   :  { %3336 = vmatpush.bf16.msra.mxu2 %v4833_v16  ;;  %3349 = vmatpush.bf16.msra.mxu3 %v5217_v38  ;;  %v5726_v16 = vld [vmem:[#allocation8 + $0x1a4] sm:$0xf]  ;;  %v4982_v38 = vld [vmem:[#allocation8 + $0x1d0] sm:$0xf0]  ;;  %v4981_v45 = vor.u32 %v5732_v34, %v4980_v33 }
 0x1dd   :  { %v4985_v30 = vor.u32 %v5726_v16, %v4982_v38  ;;  %v5786_v33 = vld [vmem:[#allocation8 + $0x384] sm:$0xf]  ;;  %v5222_v34 = vld [vmem:[#allocation8 + $0x3b0] sm:$0xf0]  ;;  %v5172_v16 = vld [vmem:[#allocation8 + $0x320] sm:$0xf] }
 0x1de   :  { %v5780_v38 = vld [vmem:[#allocation8 + $0x34c] sm:$0xf0]  ;;  %v5225_v40 = vor.u32 %v5786_v33, %v5222_v34  ;;  %v5835_v33 = vld [vmem:[#allocation8 + $0x50c] sm:$0xf]  ;;  %v5422_v34 = vld [vmem:[#allocation8 + $0x538] sm:$0xf0] }
 0x1df   :  { %3311 = vmatpush.bf16.msra.mxu0 %v4781_v51  ;;  %3324 = vmatpush.bf16.msra.mxu1 %v5165_v53  ;;  %v2145_v41 = vpop.f32.mrf.mxu0  ;;  %v2158_v42 = vpop.f32.mrf.mxu1  ;;  %v5316_v51 = vld [vmem:[#allocation8 + $0x440] sm:$0xf]  ;;  %v5816_v53 = vld [vmem:[#allocation8 + $0x46c] sm:$0xf0] }
 0x1e0   :  { %3337 = vmatpush.bf16.msra.mxu2 %v4785_v58  ;;  %3350 = vmatpush.bf16.msra.mxu3 %v5169_v62  ;;  %v6566_v44 = vadd.f32 %v2158_v42, %v2145_v41  ;;  %v5318_v58 = vld [vmem:[#allocation8 + $0x470] sm:$0xf0]  ;;  %v4933_v62 = vor.u32 %v5720_v49, %v4932_v48  ;;  %v5678_v41 = vld [vmem:[#allocation8 + $0x24] sm:$0xf] }
 0x1e1   :  { %v4790_v42 = vld [vmem:[#allocation8 + $0x50] sm:$0xf0] }
 0x1e2   :  { %3312 = vmatmul.bf16.vlgmr.msra.gmra.mxu0 %v6532_v25  ;;  %3325 = vmatmul.bf16.vlgmr.msra.gmra.mxu1 %v6536_v26  ;;  %v5174_v49 = vld [vmem:[#allocation8 + $0x350] sm:$0xf0] }
 0x1e3   :  { %3356 = vmatpush.bf16.msrb.mxu0 %v5125_v59  ;;  %3369 = vmatpush.bf16.msrb.mxu1 %v5509_v60  ;;  %v5317_v59 = vor.u32 %v5816_v53, %v5316_v51  ;;  %v4884_v60 = vld [vmem:[#allocation8 + $0xe0] sm:$0xf]  ;;  %v5516_v51 = vld [vmem:[#allocation8 + $0x5c8] sm:$0xf]  ;;  %v5865_v53 = vld [vmem:[#allocation8 + $0x5f4] sm:$0xf0] }
 0x1e4   :  { %3382 = vmatpush.bf16.msrb.mxu2 %v5129_v0  ;;  %3395 = vmatpush.bf16.msrb.mxu3 %v5513_v1  ;;  %v5321_v0 = vor.u32 %v5810_v57, %v5318_v58  ;;  %v5268_v1 = vld [vmem:[#allocation8 + $0x3e0] sm:$0xf]  ;;  %v5173_v57 = vor.u32 %v5780_v38, %v5172_v16  ;;  %v5134_v58 = vld [vmem:[#allocation8 + $0x2f8] sm:$0xf0]  ;;  %v5425_v38 = vor.u32 %v5835_v33, %v5422_v34  ;;  %v5228_v33 = vld [vmem:[#allocation8 + $0x388] sm:$0xf] }
 0x1e5   :  { %3338 = vmatmul.bf16.vlgmr.msra.gmra.mxu2 %v6532_v25  ;;  %3351 = vmatmul.bf16.vlgmr.msra.gmra.mxu3 %v6536_v26  ;;  %v5137_v3 = vor.u32 %v5763_v55, %v5134_v58  ;;  %v5817_v58 = vld [vmem:[#allocation8 + $0x474] sm:$0xf0] }
 0x1e6   :  { %v5793_v34 = vld [vmem:[#allocation8 + $0x3b4] sm:$0xf0] }
 0x1e7   :  { %3357 = vmatpush.bf16.msrb.mxu0 %v5077_v9  ;;  %3370 = vmatpush.bf16.msrb.mxu1 %v5461_v11  ;;  %v5270_v9 = vld [vmem:[#allocation8 + $0x410] sm:$0xf0]  ;;  %v2147_v14 = vpop.f32.mrf.mxu0  ;;  %v2160_v17 = vpop.f32.mrf.mxu1 }
 0x1e8   :  { %3383 = vmatpush.bf16.msrb.mxu2 %v5081_v18  ;;  %3396 = vmatpush.bf16.msrb.mxu3 %v5465_v19  ;;  %v2171_v4 = vpop.f32.mrf.mxu2  ;;  %v2184_v5 = vpop.f32.mrf.mxu3  ;;  %v4885_v18 = vor.u32 %v5708_v61, %v4884_v60  ;;  %v5269_v19 = vor.u32 %v5804_v2, %v5268_v1  ;;  %v5273_v24 = vor.u32 %v5798_v7, %v5270_v9  ;;  %v5084_v1 = vld [vmem:[#allocation8 + $0x268] sm:$0xf]  ;;  %v5757_v2 = vld [vmem:[#allocation8 + $0x294] sm:$0xf0]  ;;  %v5751_v7 = vld [vmem:[#allocation8 + $0x26c] sm:$0xf] }
 0x1e9   :  { %v6568_v11 = vadd.f32 %v2184_v5, %v2171_v4  ;;  %v4793_v60 = vor.u32 %v5678_v41, %v4790_v42  ;;  %v5468_v5 = vld [vmem:[#allocation8 + $0x568] sm:$0xf]  ;;  %v5086_v9 = vld [vmem:[#allocation8 + $0x298] sm:$0xf0]  ;;  %v5847_v14 = vld [vmem:[#allocation8 + $0x56c] sm:$0xf] }
 0x1ea   :  { %v5470_v17 = vld [vmem:[#allocation8 + $0x598] sm:$0xf0]  ;;  %v5727_v41 = vld [vmem:[#allocation8 + $0x1ac] sm:$0xf] }
 0x1eb   :  { %3358 = vmatpush.bf16.msrb.mxu0 %v5029_v31  ;;  %3371 = vmatpush.bf16.msrb.mxu1 %v5413_v32  ;;  %v5690_v31 = vld [vmem:[#allocation8 + $0x84] sm:$0xf]  ;;  %v4838_v32 = vld [vmem:[#allocation8 + $0xb0] sm:$0xf0]  ;;  %v4990_v42 = vld [vmem:[#allocation8 + $0x1d8] sm:$0xf0] }
 0x1ec   :  { %3384 = vmatpush.bf16.msrb.mxu2 %v5033_v35  ;;  %3397 = vmatpush.bf16.msrb.mxu3 %v5417_v36  ;;  %v4788_v35 = vld [vmem:[#allocation8 + $0x20] sm:$0xf]  ;;  %v4837_v36 = vor.u32 %v5696_v21, %v4836_v20  ;;  %v4841_v39 = vor.u32 %v5690_v31, %v4838_v32  ;;  %v5036_v20 = vld [vmem:[#allocation8 + $0x208] sm:$0xf]  ;;  %v5745_v21 = vld [vmem:[#allocation8 + $0x234] sm:$0xf0]  ;;  %v4993_v55 = vor.u32 %v5727_v41, %v4990_v42 }
 0x1ed   :  { %v4789_v56 = vor.u32 %v5684_v37, %v4788_v35  ;;  %v5739_v31 = vld [vmem:[#allocation8 + $0x20c] sm:$0xf]  ;;  %v5038_v32 = vld [vmem:[#allocation8 + $0x238] sm:$0xf0]  ;;  %v5037_v35 = vor.u32 %v5745_v21, %v5036_v20  ;;  %v5733_v37 = vld [vmem:[#allocation8 + $0x1d4] sm:$0xf0] }
 0x1ee   :  { %v5041_v16 = vor.u32 %v5739_v31, %v5038_v32 }
 0x1ef   :  { %3359 = vmatpush.bf16.msrb.mxu0 %v4981_v45  ;;  %3372 = vmatpush.bf16.msrb.mxu1 %v5365_v46  ;;  %v5774_v45 = vld [vmem:[#allocation8 + $0x324] sm:$0xf] }
 0x1f0   :  { %3385 = vmatpush.bf16.msrb.mxu2 %v4985_v30  ;;  %3398 = vmatpush.bf16.msrb.mxu3 %v5369_v50  ;;  %v2173_v46 = vpop.f32.mrf.mxu2  ;;  %v2186_v48 = vpop.f32.mrf.mxu3  ;;  %v5132_v30 = vld [vmem:[#allocation8 + $0x2c8] sm:$0xf]  ;;  %v5769_v50 = vld [vmem:[#allocation8 + $0x2f4] sm:$0xf0]  ;;  %v5177_v61 = vor.u32 %v5774_v45, %v5174_v49  ;;  %v5823_v45 = vld [vmem:[#allocation8 + $0x4ac] sm:$0xf] }
 0x1f1   :  { %v5374_v46 = vld [vmem:[#allocation8 + $0x4d8] sm:$0xf0] }
 0x1f3   :  { %3360 = vmatpush.bf16.msrb.mxu0 %v4933_v62  ;;  %3373 = vmatpush.bf16.msrb.mxu1 %v5317_v59  ;;  %v5859_v62 = vld [vmem:[#allocation8 + $0x5cc] sm:$0xf]  ;;  %v5518_v59 = vld [vmem:[#allocation8 + $0x5f8] sm:$0xf0] }
 0x1f4   :  { %3386 = vmatpush.bf16.msrb.mxu2 %v4937_v63  ;;  %3399 = vmatpush.bf16.msrb.mxu3 %v5321_v0  ;;  %v5133_v63 = vor.u32 %v5769_v50, %v5132_v30  ;;  %v5517_v0 = vor.u32 %v5865_v53, %v5516_v51  ;;  %v5521_v4 = vor.u32 %v5859_v62, %v5518_v59  ;;  %v4940_v51 = vld [vmem:[#allocation8 + $0x148] sm:$0xf]  ;;  %v5721_v53 = vld [vmem:[#allocation8 + $0x174] sm:$0xf0]  ;;  %v5715_v62 = vld [vmem:[#allocation8 + $0x14c] sm:$0xf] }
 0x1f5   :  { %v4942_v59 = vld [vmem:[#allocation8 + $0x178] sm:$0xf0] }
 0x1f7   :  { %3361 = vmatpush.bf16.msrb.mxu0 %v4885_v18  ;;  %3374 = vmatpush.bf16.msrb.mxu1 %v5269_v19  ;;  %v5085_v18 = vor.u32 %v5757_v2, %v5084_v1  ;;  %v5469_v19 = vor.u32 %v5853_v6, %v5468_v5  ;;  %v4892_v1 = vld [vmem:[#allocation8 + $0xe8] sm:$0xf]  ;;  %v5709_v2 = vld [vmem:[#allocation8 + $0x114] sm:$0xf0] }
 0x1f8   :  { %3387 = vmatpush.bf16.msrb.mxu2 %v4889_v23  ;;  %3400 = vmatpush.bf16.msrb.mxu3 %v5273_v24  ;;  %v5089_v23 = vor.u32 %v5751_v7, %v5086_v9  ;;  %v5473_v24 = vor.u32 %v5847_v14, %v5470_v17  ;;  %v5276_v5 = vld [vmem:[#allocation8 + $0x3e8] sm:$0xf]  ;;  %v5805_v6 = vld [vmem:[#allocation8 + $0x414] sm:$0xf0]  ;;  %v5703_v7 = vld [vmem:[#allocation8 + $0xec] sm:$0xf] }
 0x1f9   :  { %v4894_v17 = vld [vmem:[#allocation8 + $0x118] sm:$0xf0] }
 0x1fa   :  { %v4897_v31 = vor.u32 %v5703_v7, %v4894_v17  ;;  %v6072_v17 = vld [vmem:[#allocation11 + $0x70] sm:$0xff] }
 0x1fb   :  { %3362 = vmatpush.bf16.msrb.mxu0 %v4837_v36  ;;  %3375 = vmatpush.bf16.msrb.mxu1 %v5221_v12  ;;  %v5421_v36 = vor.u32 %v5841_v28, %v5420_v27  ;;  %v4988_v12 = vld [vmem:[#allocation8 + $0x1a8] sm:$0xf]  ;;  %v5697_v28 = vld [vmem:[#allocation8 + $0xb4] sm:$0xf0] }
 0x1fc   :  { %3388 = vmatpush.bf16.msrb.mxu2 %v4841_v39  ;;  %3401 = vmatpush.bf16.msrb.mxu3 %v5225_v40  ;;  %v5372_v39 = vld [vmem:[#allocation8 + $0x4a8] sm:$0xf]  ;;  %v5829_v40 = vld [vmem:[#allocation8 + $0x4d4] sm:$0xf0]  ;;  %v4989_v30 = vor.u32 %v5733_v37, %v4988_v12  ;;  %v5787_v12 = vld [vmem:[#allocation8 + $0x38c] sm:$0xf] }
 0x1fd   :  { %v5373_v50 = vor.u32 %v5829_v40, %v5372_v39  ;;  %v4844_v27 = vld [vmem:[#allocation8 + $0x88] sm:$0xf]  ;;  %v5230_v37 = vld [vmem:[#allocation8 + $0x3b8] sm:$0xf0]  ;;  %v5685_v40 = vld [vmem:[#allocation8 + $0x54] sm:$0xf0] }
 0x1fe   :  { %v4796_v39 = vld [vmem:[#allocation8 + $0x28] sm:$0xf]  ;;  %v5233_v42 = vor.u32 %v5787_v12, %v5230_v37 }
 0x1ff   :  { %3363 = vmatpush.bf16.msrb.mxu0 %v4789_v56  ;;  %3376 = vmatpush.bf16.msrb.mxu1 %v5173_v57  ;;  %v6574_v48 = vpop.f32.mrf.mxu0  ;;  %v6576_v49 = vpop.f32.mrf.mxu1  ;;  %v5377_v56 = vor.u32 %v5823_v45, %v5374_v46  ;;  %v5324_v57 = vld [vmem:[#allocation8 + $0x448] sm:$0xf]  ;;  %v5781_v46 = vld [vmem:[#allocation8 + $0x354] sm:$0xf0] }
 0x200   :  { %3389 = vmatpush.bf16.msrb.mxu2 %v4793_v60  ;;  %3402 = vmatpush.bf16.msrb.mxu3 %v5177_v61  ;;  %v5811_v60 = vld [vmem:[#allocation8 + $0x44c] sm:$0xf]  ;;  %v5326_v61 = vld [vmem:[#allocation8 + $0x478] sm:$0xf0]  ;;  %v5180_v45 = vld [vmem:[#allocation8 + $0x328] sm:$0xf] }
 0x202   :  { %3364 = vmatmul.bf16.vlgmr.msrb.gmra.mxu0 %v6532_v25  ;;  %3377 = vmatmul.bf16.vlgmr.msrb.gmra.mxu1 %v6536_v26 }
 0x203   :  { %3408 = vmatpush.bf16.msra.mxu0 %v5133_v63  ;;  %3421 = vmatpush.bf16.msra.mxu1 %v5517_v0  ;;  %v4941_v63 = vor.u32 %v5721_v53, %v4940_v51  ;;  %v5325_v0 = vor.u32 %v5817_v58, %v5324_v57  ;;  %v4798_v53 = vld [vmem:[#allocation8 + $0x58] sm:$0xf0]  ;;  %v3158_v57 = vadd.f32 %v6574_v48, %v6522_v54 }
 0x204   :  { %3434 = vmatpush.bf16.msra.mxu2 %v5137_v3  ;;  %3447 = vmatpush.bf16.msra.mxu3 %v5521_v4  ;;  %v4945_v3 = vor.u32 %v5715_v62, %v4942_v59  ;;  %v5329_v4 = vor.u32 %v5811_v60, %v5326_v61  ;;  %v4797_v58 = vor.u32 %v5685_v40, %v4796_v39  ;;  %v6582_v59 = vld [vmem:[#allocation10] sm:$0xff]  ;;  %v6059_v40 = vld [vmem:[#allocation11 + $0x8] sm:$0xff] }
 0x205   :  { %3390 = vmatmul.bf16.vlgmr.msrb.gmra.mxu2 %v6532_v25  ;;  %3403 = vmatmul.bf16.vlgmr.msrb.gmra.mxu3 %v6536_v26  ;;  %v5181_v62 = vor.u32 %v5781_v46, %v5180_v45  ;;  %v6064_v54 = vld [vmem:[#allocation11 + $0x30] sm:$0xff]  ;;  %v6058_v46 = vld [vmem:[#allocation11] sm:$0xff] }
 0x206   :  { %v6068_v45 = vld [vmem:[#allocation11 + $0x50] sm:$0xff] }
 0x207   :  { %3409 = vmatpush.bf16.msra.mxu0 %v5085_v18  ;;  %3422 = vmatpush.bf16.msra.mxu1 %v5469_v19  ;;  %v5799_v18 = vld [vmem:[#allocation8 + $0x3ec] sm:$0xf]  ;;  %v5278_v19 = vld [vmem:[#allocation8 + $0x418] sm:$0xf0]  ;;  %v3159_v20 = vpop.f32.mrf.mxu0  ;;  %v3172_v21 = vpop.f32.mrf.mxu1 }
 0x208   :  { %3435 = vmatpush.bf16.msra.mxu2 %v5089_v23  ;;  %3448 = vmatpush.bf16.msra.mxu3 %v5473_v24  ;;  %v3183_v9 = vpop.f32.mrf.mxu2  ;;  %v6578_v14 = vpop.f32.mrf.mxu3  ;;  %v4893_v23 = vor.u32 %v5709_v2, %v4892_v1  ;;  %v5277_v24 = vor.u32 %v5805_v6, %v5276_v5  ;;  %v5281_v32 = vor.u32 %v5799_v18, %v5278_v19  ;;  %v3464_v1 = vperm.slane %v6582_v59, 0  ;;  %v6073_v2 = vld [vmem:[#allocation11 + $0x78] sm:$0xff] }
 0x209   :  { %v3184_v48 = vadd.f32 %v3183_v9, %v6524_v10  ;;  %v3465_v5 = vperm.slane %v6582_v59, 1  ;;  %v3466_v9 = vperm.slane %v6582_v59, 2 }
 0x20b   :  { %3410 = vmatpush.bf16.msra.mxu0 %v5037_v35  ;;  %3423 = vmatpush.bf16.msra.mxu1 %v5421_v36  ;;  %v5691_v35 = vld [vmem:[#allocation8 + $0x8c] sm:$0xf]  ;;  %v4846_v36 = vld [vmem:[#allocation8 + $0xb8] sm:$0xf0] }
 0x20c   :  { %3436 = vmatpush.bf16.msra.mxu2 %v5041_v16  ;;  %3449 = vmatpush.bf16.msra.mxu3 %v5425_v38  ;;  %v4845_v16 = vor.u32 %v5697_v28, %v4844_v27  ;;  %v5229_v38 = vor.u32 %v5793_v34, %v5228_v33  ;;  %v4849_v41 = vor.u32 %v5691_v35, %v4846_v36  ;;  %v3467_v28 = vperm.slane %v6582_v59, 3  ;;  %v6070_v33 = vld [vmem:[#allocation11 + $0x60] sm:$0xff]  ;;  %v6060_v35 = vld [vmem:[#allocation11 + $0x10] sm:$0xff] }
 0x20f   :  { %3411 = vmatpush.bf16.msra.mxu0 %v4989_v30  ;;  %3424 = vmatpush.bf16.msra.mxu1 %v5373_v50  ;;  %v5679_v30 = vld [vmem:[#allocation8 + $0x2c] sm:$0xf] }
 0x210   :  { %3437 = vmatpush.bf16.msra.mxu2 %v4993_v55  ;;  %3450 = vmatpush.bf16.msra.mxu3 %v5377_v56  ;;  %v3185_v50 = vpop.f32.mrf.mxu2  ;;  %v3198_v51 = vpop.f32.mrf.mxu3  ;;  %v5775_v55 = vld [vmem:[#allocation8 + $0x32c] sm:$0xf]  ;;  %v5182_v56 = vld [vmem:[#allocation8 + $0x358] sm:$0xf0]  ;;  %v4801_v60 = vor.u32 %v5679_v30, %v4798_v53 }
 0x211   :  { %v5185_v61 = vor.u32 %v5775_v55, %v5182_v56  ;;  %v6067_v51 = vld [vmem:[#allocation11 + $0x48] sm:$0xff]  ;;  %v6066_v55 = vld [vmem:[#allocation11 + $0x40] sm:$0xff] }
 0x213   :  { %3412 = vmatpush.bf16.msra.mxu0 %v4941_v63  ;;  %3425 = vmatpush.bf16.msra.mxu1 %v5325_v0  ;;  %v6065_v63 = vld [vmem:[#allocation11 + $0x38] sm:$0xff]  ;;  %v3171_v0 = vadd.f32 %v6576_v49, %v3158_v57  ;;  %v6063_v49 = vld [vmem:[#allocation11 + $0x28] sm:$0xff] }
 0x214   :  { %3438 = vmatpush.bf16.msra.mxu2 %v4945_v3  ;;  %3451 = vmatpush.bf16.msra.mxu3 %v5329_v4  ;;  %v3197_v4 = vadd.f32 %v6578_v14, %v3184_v48  ;;  %v6061_v14 = vld [vmem:[#allocation11 + $0x18] sm:$0xff] }
 0x215   :  { %v3488_v3 = vadd.f32 %v3464_v1, %v3171_v0 }
 0x216   :  { %v3489_v18 = vadd.f32 %v3465_v5, %v3197_v4 }
 0x217   :  { %3413 = vmatpush.bf16.msra.mxu0 %v4893_v23  ;;  %3426 = vmatpush.bf16.msra.mxu1 %v5277_v24  ;;  %6135 = vtanh.f32 %v3488_v3 }
 0x218   :  { %3439 = vmatpush.bf16.msra.mxu2 %v4897_v31  ;;  %3452 = vmatpush.bf16.msra.mxu3 %v5281_v32  ;;  %6137 = vtanh.f32 %v3489_v18 }
 0x21b   :  { %3414 = vmatpush.bf16.msra.mxu0 %v4845_v16  ;;  %3427 = vmatpush.bf16.msra.mxu1 %v5229_v38  ;;  %v6069_v16 = vld [vmem:[#allocation11 + $0x58] sm:$0xff] }
 0x21c   :  { %3440 = vmatpush.bf16.msra.mxu2 %v4849_v41  ;;  %3453 = vmatpush.bf16.msra.mxu3 %v5233_v42 }
 0x21d   :  { %v6136_v20 = vpop.eup %6135 }
 0x21e   :  { %v3502_v27 = vadd.f32 1.0, %v6136_v20  ;;  %v6138_v36 = vpop.eup %6137 }
 0x21f   :  { %3415 = vmatpush.bf16.msra.mxu0 %v4797_v58  ;;  %3428 = vmatpush.bf16.msra.mxu1 %v5181_v62  ;;  %v3209_v6 = vpop.f32.mrf.mxu0  ;;  %v3222_v7 = vpop.f32.mrf.mxu1  ;;  %v3468_v62 = vperm.slane %v6582_v59, 4 }
 0x220   :  { %3441 = vmatpush.bf16.msra.mxu2 %v4801_v60  ;;  %3454 = vmatpush.bf16.msra.mxu3 %v5185_v61  ;;  %v3210_v10 = vadd.f32 %v3209_v6, %v6526_v52  ;;  %v3504_v12 = vmul.f32 0.5, %v3502_v27 }
 0x222   :  { %3416 = vmatmul.bf16.vlgmr.msra.gmra.mxu0 %v6532_v25  ;;  %3429 = vmatmul.bf16.vlgmr.msra.gmra.mxu1 %v6536_v26  ;;  %v3223_v19 = vadd.f32 %v3222_v7, %v3210_v10 }
 0x223   :  { %3442 = vmatmul.bf16.vlgmr.msra.gmra.mxu2 %v6532_v25  ;;  %3455 = vmatmul.bf16.vlgmr.msra.gmra.mxu3 %v6536_v26  ;;  %v6062_v25 = vld [vmem:[#allocation11 + $0x20] sm:$0xff]  ;;  %v6071_v26 = vld [vmem:[#allocation11 + $0x68] sm:$0xff] }
 0x224   :  { %3826 = vmatpush.bf16.msrb.mxu2 %v6065_v63  ;;  %3839 = vmatpush.bf16.msrb.mxu3 %v6073_v2  ;;  %v3490_v21 = vadd.f32 %v3466_v9, %v3223_v19  ;;  %v3469_v2 = vperm.slane %v6582_v59, 5 }
 0x226   :  { %6139 = vtanh.f32 %v3490_v21 }
 0x227   :  { %v3211_v31 = vpop.f32.mrf.mxu0  ;;  %v3224_v32 = vpop.f32.mrf.mxu1 }
 0x228   :  { %3827 = vmatpush.bf16.msrb.mxu2 %v6064_v54  ;;  %3840 = vmatpush.bf16.msrb.mxu3 %v6072_v17  ;;  %v3235_v23 = vpop.f32.mrf.mxu2  ;;  %v3248_v24 = vpop.f32.mrf.mxu3 }
 0x229   :  { %v3236_v52 = vadd.f32 %v3235_v23, %v6528_v15  ;;  %v3503_v15 = vadd.f32 1.0, %v6138_v36  ;;  %v6080_v36 = vld [vmem:[#allocation11 + $0xb0] sm:$0xff] }
 0x22b   :  { %v3249_v34 = vadd.f32 %v3248_v24, %v3236_v52  ;;  %v3505_v30 = vmul.f32 0.5, %v3503_v15  ;;  %v3471_v15 = vperm.slane %v6582_v59, 7 }
 0x22c   :  { %3828 = vmatpush.bf16.msrb.mxu2 %v6063_v49  ;;  %3841 = vmatpush.bf16.msrb.mxu3 %v6071_v26  ;;  %v6140_v38 = vpop.eup %6139 }
 0x22d   :  { %v3491_v37 = vadd.f32 %v3467_v28, %v3249_v34  ;;  %v3514_v39 = vmul.f32 %v6140_v38, %v3504_v12  ;;  %v6089_v12 = vld [vmem:[#allocation11 + $0xf8] sm:$0xff] }
 0x22e   :  { %3717 = vmatpush.bf16.msrb.mxu1 %v6089_v12 }
 0x22f   :  { %6141 = vtanh.f32 %v3491_v37  ;;  %v6079_v37 = vld [vmem:[#allocation11 + $0xa8] sm:$0xff] }
 0x230   :  { %3829 = vmatpush.bf16.msrb.mxu2 %v6062_v25  ;;  %3842 = vmatpush.bf16.msrb.mxu3 %v6070_v33  ;;  %v3237_v41 = vpop.f32.mrf.mxu2  ;;  %v3250_v42 = vpop.f32.mrf.mxu3  ;;  %v6081_v33 = vld [vmem:[#allocation11 + $0xb8] sm:$0xff] }
 0x231   :  { %3704 = vmatpush.bf16.msrb.mxu0 %v6081_v33  ;;  %v6605_v41 = vld [vmem:[#allocation10 + $0x8] sm:$0xf] }
 0x234   :  { %3830 = vmatpush.bf16.msrb.mxu2 %v6061_v14  ;;  %3843 = vmatpush.bf16.msrb.mxu3 %v6069_v16 }
 0x235   :  { %v6142_v50 = vpop.eup %6141  ;;  %3705 = vmatpush.bf16.msrb.mxu0 %v6080_v36 }
 0x236   :  { %v3515_v53 = vmul.f32 %v6142_v50, %v3505_v30  ;;  %v3472_v30 = vperm.slane %v6605_v41, 0  ;;  %v6087_v50 = vld [vmem:[#allocation11 + $0xe8] sm:$0xff] }
 0x238   :  { %3831 = vmatpush.bf16.msrb.mxu2 %v6060_v35  ;;  %3844 = vmatpush.bf16.msrb.mxu3 %v6068_v45  ;;  %v3470_v35 = vperm.slane %v6582_v59, 6  ;;  %v6086_v59 = vld [vmem:[#allocation11 + $0xe0] sm:$0xff] }
 0x239   :  { %3706 = vmatpush.bf16.msrb.mxu0 %v6079_v37 }
 0x23c   :  { %3832 = vmatpush.bf16.msrb.mxu2 %v6059_v40  ;;  %3845 = vmatpush.bf16.msrb.mxu3 %v6067_v51 }
 0x23f   :  { %v3261_v56 = vpop.f32.mrf.mxu0  ;;  %v3274_v57 = vpop.f32.mrf.mxu1 }
 0x240   :  { %3833 = vmatpush.bf16.msrb.mxu2 %v6058_v46  ;;  %3846 = vmatpush.bf16.msrb.mxu3 %v6066_v55  ;;  %v3262_v58 = vadd.f32 %v3261_v56, %v6542_v29 }
 0x242   :  { %v3275_v60 = vadd.f32 %v3274_v57, %v3262_v58 }
 0x244   :  { %v3492_v61 = vadd.f32 %v3468_v62, %v3275_v60  ;;  %v6076_v62 = vld [vmem:[#allocation11 + $0x90] sm:$0xff] }
 0x246   :  { %6143 = vtanh.f32 %v3492_v61  ;;  %v3473_v61 = vperm.slane %v6605_v41, 1 }
 0x247   :  { %v3263_v54 = vpop.f32.mrf.mxu0  ;;  %v3276_v48 = vpop.f32.mrf.mxu1  ;;  %6145 = vtanh.f32 %v3514_v39  ;;  %v6088_v39 = vld [vmem:[#allocation11 + $0xf0] sm:$0xff] }
 0x248   :  { %v3287_v63 = vpop.f32.mrf.mxu2  ;;  %v3300_v0 = vpop.f32.mrf.mxu3  ;;  %3718 = vmatpush.bf16.msrb.mxu1 %v6088_v39  ;;  %v6075_v54 = vld [vmem:[#allocation11 + $0x88] sm:$0xff] }
 0x249   :  { %v3288_v1 = vadd.f32 %v3287_v63, %v6544_v22 }
 0x24b   :  { %v3301_v3 = vadd.f32 %v3300_v0, %v3288_v1  ;;  %v6085_v1 = vld [vmem:[#allocation11 + $0xd8] sm:$0xff] }
 0x24c   :  { %v6144_v4 = vpop.eup %6143  ;;  %3719 = vmatpush.bf16.msrb.mxu1 %v6087_v50 }
 0x24d   :  { %v3493_v49 = vadd.f32 %v3469_v2, %v3301_v3  ;;  %v3510_v5 = vadd.f32 1.0, %v6144_v4  ;;  %v6146_v17 = vpop.eup %6145 }
 0x24f   :  { %6147 = vtanh.f32 %v3493_v49  ;;  %v3512_v7 = vmul.f32 0.5, %v3510_v5  ;;  %v6084_v5 = vld [vmem:[#allocation11 + $0xd0] sm:$0xff] }
 0x250   :  { %v3289_v29 = vpop.f32.mrf.mxu2  ;;  %v3302_v6 = vpop.f32.mrf.mxu3  ;;  %6149 = vtanh.f32 %v3515_v53  ;;  %v6077_v53 = vld [vmem:[#allocation11 + $0x98] sm:$0xff]  ;;  %3720 = vmatpush.bf16.msrb.mxu1 %v6086_v59  ;;  %v6102_v59 = vld [vmem:[#allocation13] ss:$0 sm:$0xff] }
 0x251   :  { %v3518_v10 = vmul.f32 %v6146_v17, %v3512_v7  ;;  %v6074_v17 = vld [vmem:[#allocation11 + $0x80] sm:$0xff] }
 0x253   :  { %v3520_v18 = vpack.c.bf16 %v3518_v10, %v3518_v10  ;;  %v6083_v10 = vld [vmem:[#allocation11 + $0xc8] sm:$0xff] }
 0x254   :  { %3721 = vmatpush.bf16.msrb.mxu1 %v6085_v1 }
 0x255   :  { %v6148_v9 = vpop.eup %6147  ;;  %3834 = vmatmul.bf16.vlgmr.msrb.gmra.mxu2 %v3520_v18 }
 0x256   :  { %v3511_v25 = vadd.f32 1.0, %v6148_v9  ;;  %v6150_v19 = vpop.eup %6149 }
 0x258   :  { %v3513_v22 = vmul.f32 0.5, %v3511_v25  ;;  %3722 = vmatpush.bf16.msrb.mxu1 %v6084_v5 }
 0x25a   :  { %v3519_v26 = vmul.f32 %v6150_v19, %v3513_v22  ;;  %v6082_v22 = vld [vmem:[#allocation11 + $0xc0] sm:$0xff] }
 0x25c   :  { %v3521_v20 = vpack.c.bf16 %v3519_v26, %v3519_v26  ;;  %3723 = vmatpush.bf16.msrb.mxu1 %v6083_v10 }
 0x25e   :  { %3847 = vmatmul.bf16.vlgmr.msrb.gmra.mxu3 %v3521_v20 }
 0x25f   :  { %v3313_v21 = vpop.f32.mrf.mxu0  ;;  %v3326_v14 = vpop.f32.mrf.mxu1 }
 0x260   :  { %v3314_v32 = vadd.f32 %v3313_v21, %v6550_v47  ;;  %v6078_v47 = vld [vmem:[#allocation11 + $0xa0] sm:$0xff]  ;;  %3724 = vmatpush.bf16.msrb.mxu1 %v6082_v22  ;;  %v3474_v21 = vperm.slane %v6605_v41, 2 }
 0x261   :  { %3707 = vmatpush.bf16.msrb.mxu0 %v6078_v47 }
 0x262   :  { %v3327_v34 = vadd.f32 %v3326_v14, %v3314_v32 }
 0x264   :  { %v3494_v38 = vadd.f32 %v3470_v35, %v3327_v34 }
 0x265   :  { %3708 = vmatpush.bf16.msrb.mxu0 %v6077_v53 }
 0x266   :  { %6151 = vtanh.f32 %v3494_v38 }
 0x267   :  { %v3315_v27 = vpop.f32.mrf.mxu0  ;;  %v3328_v52 = vpop.f32.mrf.mxu1 }
 0x268   :  { %v3339_v23 = vpop.f32.mrf.mxu2  ;;  %v3352_v24 = vpop.f32.mrf.mxu3 }
 0x269   :  { %v3340_v16 = vadd.f32 %v3339_v23, %v6552_v13  ;;  %3709 = vmatpush.bf16.msrb.mxu0 %v6076_v62 }
 0x26b   :  { %v3353_v40 = vadd.f32 %v3352_v24, %v3340_v16 }
 0x26c   :  { %v6152_v55 = vpop.eup %6151 }
 0x26d   :  { %v3495_v13 = vadd.f32 %v3471_v15, %v3353_v40  ;;  %v3524_v60 = vadd.f32 1.0, %v6152_v55  ;;  %3710 = vmatpush.bf16.msrb.mxu0 %v6075_v54 }
 0x26f   :  { %6153 = vtanh.f32 %v3495_v13  ;;  %v3526_v3 = vmul.f32 0.5, %v3524_v60 }
 0x270   :  { %v3341_v28 = vpop.f32.mrf.mxu2  ;;  %v3354_v31 = vpop.f32.mrf.mxu3 }
 0x271   :  { %3711 = vmatpush.bf16.msrb.mxu0 %v6074_v17  ;;  %v3475_v28 = vperm.slane %v6605_v41, 3 }
 0x275   :  { %v6154_v48 = vpop.eup %6153 }
 0x276   :  { %v3525_v6 = vadd.f32 1.0, %v6154_v48 }
 0x278   :  { %v3527_v9 = vmul.f32 0.5, %v3525_v6 }
 0x27f   :  { %v3365_v42 = vpop.f32.mrf.mxu0  ;;  %v3378_v45 = vpop.f32.mrf.mxu1 }
 0x280   :  { %v3366_v46 = vadd.f32 %v3365_v42, %v6558_v43 }
 0x282   :  { %v3379_v51 = vadd.f32 %v3378_v45, %v3366_v46 }
 0x284   :  { %v3496_v56 = vadd.f32 %v3472_v30, %v3379_v51 }
 0x286   :  { %6155 = vtanh.f32 %v3496_v56 }
 0x287   :  { %v3367_v63 = vpop.f32.mrf.mxu0  ;;  %v3380_v0 = vpop.f32.mrf.mxu1 }
 0x288   :  { %v3391_v57 = vpop.f32.mrf.mxu2  ;;  %v3404_v58 = vpop.f32.mrf.mxu3 }
 0x289   :  { %v3392_v43 = vadd.f32 %v3391_v57, %v6560_v8 }
 0x28b   :  { %v3405_v2 = vadd.f32 %v3404_v58, %v3392_v43 }
 0x28c   :  { %v6156_v4 = vpop.eup %6155 }
 0x28d   :  { %v3497_v49 = vadd.f32 %v3473_v61, %v3405_v2  ;;  %v3536_v29 = vmul.f32 %v6156_v4, %v3526_v3 }
 0x28f   :  { %6157 = vtanh.f32 %v3497_v49 }
 0x290   :  { %v3393_v7 = vpop.f32.mrf.mxu2  ;;  %v3406_v8 = vpop.f32.mrf.mxu3 }
 0x295   :  { %v6158_v18 = vpop.eup %6157 }
 0x296   :  { %v3537_v25 = vmul.f32 %v6158_v18, %v3527_v9 }
 0x29f   :  { %v3417_v19 = vpop.f32.mrf.mxu0  ;;  %v3430_v26 = vpop.f32.mrf.mxu1 }
 0x2a0   :  { %v3418_v20 = vadd.f32 %v3417_v19, %v6566_v44 }
 0x2a2   :  { %v3431_v14 = vadd.f32 %v3430_v26, %v3418_v20 }
 0x2a4   :  { %v3498_v23 = vadd.f32 %v3474_v21, %v3431_v14 }
 0x2a6   :  { %6159 = vtanh.f32 %v3498_v23  ;;  %v3443_v24 = vpop.f32.mrf.mxu2  ;;  %v3456_v27 = vpop.f32.mrf.mxu3 }
 0x2a7   :  { %v3444_v52 = vadd.f32 %v3443_v24, %v6568_v11  ;;  %v3419_v31 = vpop.f32.mrf.mxu0  ;;  %v3432_v32 = vpop.f32.mrf.mxu1  ;;  %6161 = vtanh.f32 %v3536_v29 }
 0x2a9   :  { %v3457_v33 = vadd.f32 %v3456_v27, %v3444_v52 }
 0x2ab   :  { %v3499_v34 = vadd.f32 %v3475_v28, %v3457_v33 }
 0x2ac   :  { %v6160_v35 = vpop.eup %6159 }
 0x2ad   :  { %v3532_v36 = vadd.f32 1.0, %v6160_v35  ;;  %6163 = vtanh.f32 %v3499_v34  ;;  %v6162_v16 = vpop.eup %6161 }
 0x2ae   :  { %v3445_v44 = vpop.f32.mrf.mxu2  ;;  %v3458_v12 = vpop.f32.mrf.mxu3  ;;  %6165 = vtanh.f32 %v3537_v25 }
 0x2af   :  { %v3534_v37 = vmul.f32 0.5, %v3532_v36 }
 0x2b1   :  { %v3540_v38 = vmul.f32 %v6162_v16, %v3534_v37 }
 0x2b3   :  { %v6164_v39 = vpop.eup %6163  ;;  %v3542_v40 = vpack.c.bf16 %v3540_v38, %v3540_v38 }
 0x2b4   :  { %v3533_v15 = vadd.f32 1.0, %v6164_v39  ;;  %v6166_v41 = vpop.eup %6165 }
 0x2b5   :  { %3712 = vmatmul.bf16.vlgmr.msrb.gmra.mxu0 %v3542_v40 }
 0x2b6   :  { %v3535_v11 = vmul.f32 0.5, %v3533_v15 }
 0x2b8   :  { %v3541_v47 = vmul.f32 %v6166_v41, %v3535_v11 }
 0x2ba   :  { %v3543_v42 = vpack.c.bf16 %v3541_v47, %v3541_v47 }
 0x2bc   :  { %3725 = vmatmul.bf16.vlgmr.msrb.gmra.mxu1 %v3543_v42 }
 0x2d8   :  { %v3835_v45 = vpop.f32.mrf.mxu2 }
 0x2e0   :  { %v3837_v30 = vpop.f32.mrf.mxu2 }
 0x2e1   :  { %v3848_v46 = vpop.f32.mrf.mxu3 }
 0x2e9   :  { %v3850_v50 = vpop.f32.mrf.mxu3 }
 0x332   :  { %v3713_v13 = vpop.f32.mrf.mxu0 }
 0x339   :  { %v3726_v51 = vpop.f32.mrf.mxu1 }
 0x33a   :  { %v3727_v53 = vadd.f32 %v3726_v51, %v3713_v13  ;;  %v3715_v55 = vpop.f32.mrf.mxu0 }
 0x33c   :  { %v3836_v56 = vadd.f32 %v3835_v45, %v3727_v53 }
 0x33e   :  { %v3849_v57 = vadd.f32 %v3848_v46, %v3836_v56 }
 0x340   :  { %v3856_v58 = vadd.f32 %v6102_v59, %v3849_v57 }
 0x341   :  { %v3728_v62 = vpop.f32.mrf.mxu1 }
 0x342   :  { %3857 = vst [vmem:[#allocation14] sm:$0x3] %v3856_v58 }
 0x343   :  { %3868 = dma.vmem_to_hbm [thread:$0]  %s3864_s6, 32, %s3866_s14, [#allocation4]  }
 0x344   :  { %6367 = dma.done.wait [#allocation4], 32  }
 0x345   :  { %6368 = vsyncadd [#allocation4], 4294967264 }
 0x346   :  { %3873 = vsyncpa [#allocation3], 1 }
 0x347   :  { %3874 = vsyncpa [#allocation6], 1 }
 0x348   :  { %3875 = vsyncpa [#allocation9], 1 }
 0x349   :  { %3876 = vsyncpa [#allocation12], 1 }
 0x34a   :  { %3877 = vsyncpa [#allocation4], 1 }

</bundles_post_ra>
